<compile_context>
chip_gen: v6e
topology: v6e:2x2x1
jax: 0.10.0
libtpu: 0.0.40
codegen_flags: <defaults>
</compile_context>

<pallas_src>
import functools

import numpy as np
import jax
import jax.numpy as jnp
from jax.experimental import pallas as pl
from jax.experimental.pallas import tpu as pltpu


BN_EPS = 0.8
LEAKY_SLOPE = 0.2
DEPTH = 128


def _generator_kernel(onehot_ref, noise_ref,
                      ew0a_ref, w0b_ref, b0_ref, g0_ref, be0_ref,
                      w1_ref, b1_ref, g1_ref, be1_ref,
                      w2_ref, b2_ref, g2_ref, be2_ref,
                      w3_ref, b3_ref, g3_ref, be3_ref,
                      w4_ref, b4_ref,
                      out_ref,
                      h_ref):
    """Grid = (parallel shard, N-tile).  Trunk computed once per shard into h_ref."""

    @pl.when(pl.program_id(1) == 0)
    def _compute_trunk():
        B = noise_ref.shape[0]
        inv_b = 1.0 / B

        def bn_leaky(h, g, be):
            # BatchNorm1d (training mode), fused single-pass stats, eps = 0.8.
            mean = jnp.sum(h, axis=0, keepdims=True) * inv_b
            mean_sq = jnp.sum(h * h, axis=0, keepdims=True) * inv_b
            var = mean_sq - mean * mean
            h = (h - mean) * jax.lax.rsqrt(var + BN_EPS)
            h = h * g + be
            return jnp.where(h > 0, h, LEAKY_SLOPE * h)      # LeakyReLU(0.2)

        # Layer 0: x = [emb | noise]; embedding pre-folded into EW0a, concat
        # replaced by a split matmul.
        h = (jnp.dot(onehot_ref[...], ew0a_ref[...],
                     preferred_element_type=jnp.float32)
             + jnp.dot(noise_ref[...], w0b_ref[...],
                       preferred_element_type=jnp.float32)
             + b0_ref[...])
        h = bn_leaky(h, g0_ref[...], be0_ref[...])

        # Layers 1..3.
        for w_ref, b_ref, g_ref, be_ref in ((w1_ref, b1_ref, g1_ref, be1_ref),
                                            (w2_ref, b2_ref, g2_ref, be2_ref),
                                            (w3_ref, b3_ref, g3_ref, be3_ref)):
            h = jnp.dot(h.astype(jnp.bfloat16), w_ref[...],
                        preferred_element_type=jnp.float32) + b_ref[...]
            h = bn_leaky(h, g_ref[...], be_ref[...])

        h_ref[...] = h

    # Per-tile work: one slab of the final Linear + Tanh.
    y = jnp.dot(h_ref[...].astype(jnp.bfloat16), w4_ref[...],
                preferred_element_type=jnp.float32) + b4_ref[...]
    out_ref[...] = jnp.tanh(y)


def _choose_output_tiling(out_dim, max_tn=2048):
    """Pad out_dim to a lane-dense multiple of 128 and pick the widest tile
    that still leaves >= 2 tiles (so dual-TC chips can split the work)."""
    out_pad = ((out_dim + 127) // 128) * 128
    tn = 128
    for cand in range(128, min(out_pad // 2, max_tn) + 1, 128):
        if out_pad % cand == 0:
            tn = cand
    if out_pad < 256:           # only a single 128-lane tile is possible
        tn = out_pad
    return out_pad, tn


def _num_parallel_shards(n_tiles):
    """2 on dual-TensorCore chips (v4 / v5p / v7x) when the tile count splits
    evenly; 1 otherwise (v5e / v6e single core -> pure 'arbitrary' inner loop)."""
    if n_tiles < 2 or n_tiles % 2 != 0:
        return 1
    try:
        kind = jax.devices()[0].device_kind.lower()
    except Exception:
        return 1
    if any(tag in kind for tag in ("v4", "v5p", "v7")):
        return 2
    return 1


def init_generator_params(key, class_num, latent_size, img_shape=(3, 32, 32),
                          depth=DEPTH):
    """Deterministic synthetic parameter init (shapes match the PyTorch module)."""
    out_dim = int(np.prod(img_shape))
    dims = [latent_size + class_num, depth, depth * 2, depth * 4, depth * 8, out_dim]

    keys = jax.random.split(key, 1 + 2 * (len(dims) - 1))
    params = {"embed": 0.1 * jax.random.normal(keys[0], (class_num, class_num),
                                               dtype=jnp.float32)}
    linears, bns = [], []
    ki = 1
    for li in range(len(dims) - 1):
        fan_in, fan_out = dims[li], dims[li + 1]
        scale = 1.0 / jnp.sqrt(jnp.float32(fan_in))
        w = scale * jax.random.normal(keys[ki], (fan_in, fan_out), dtype=jnp.float32)
        b = scale * jax.random.normal(keys[ki + 1], (1, fan_out), dtype=jnp.float32)
        ki += 2
        linears.append((w, b))
        if li < len(dims) - 2:  # first four layers are normalized
            bns.append((jnp.ones((1, fan_out), jnp.float32),
                        jnp.zeros((1, fan_out), jnp.float32)))
    params["linears"] = linears
    params["bns"] = bns
    params["img_shape"] = img_shape
    return params


def prepare_generator_params(params, class_num):
    """One-time conversion to kernel-ready args: bf16 weights, embedding folded
    into layer 0 (EW0a = embed @ W0[:class_num]), final layer padded lane-dense."""
    out_dim = int(params["linears"][-1][0].shape[1])
    out_pad, tn = _choose_output_tiling(out_dim)

    w0, b0 = params["linears"][0]
    g0, be0 = params["bns"][0]
    ew0a = jnp.dot(params["embed"], w0[:class_num],
                   preferred_element_type=jnp.float32).astype(jnp.bfloat16)
    w0b = w0[class_num:].astype(jnp.bfloat16)

    flat = [ew0a, w0b, b0.astype(jnp.float32),
            g0.astype(jnp.float32), be0.astype(jnp.float32)]
    for li in (1, 2, 3):
        w, b = params["linears"][li]
        g, be = params["bns"][li]
        flat += [w.astype(jnp.bfloat16), b.astype(jnp.float32),
                 g.astype(jnp.float32), be.astype(jnp.float32)]

    w4, b4 = params["linears"][4]
    w4p = jnp.zeros((w4.shape[0], out_pad), jnp.bfloat16)
    w4p = w4p.at[:, :out_dim].set(w4.astype(jnp.bfloat16))
    b4p = jnp.zeros((1, out_pad), jnp.float32)
    b4p = b4p.at[:, :out_dim].set(b4.astype(jnp.float32))
    flat += [w4p, b4p]

    n_tiles = out_pad // tn
    return {"flat": tuple(jax.device_put(a) for a in flat),
            "out_dim": out_dim, "out_pad": out_pad, "tn": tn,
            "n_shards": _num_parallel_shards(n_tiles)}


@functools.partial(jax.jit,
                   static_argnames=("img_shape", "out_dim", "out_pad", "tn",
                                    "n_shards"))
def generator_forward(noise, labels, flat_params, *, img_shape, out_dim,
                      out_pad, tn, n_shards):
    B = noise.shape[0]

    (ew0a, w0b, b0, g0, be0,
     w1, b1, g1, be1,
     w2, b2, g2, be2,
     w3, b3, g3, be3,
     w4, b4) = flat_params

    class_num = ew0a.shape[0]
    latent = w0b.shape[0]
    d1, d2, d3, d4 = ew0a.shape[1], w1.shape[1], w2.shape[1], w3.shape[1]

    # Wrapper-side prep: bf16 one-hot (no gather / concat / label DMA) + bf16 noise.
    onehot = jax.nn.one_hot(labels.astype(jnp.int32), class_num, dtype=jnp.bfloat16)
    noise_bf16 = noise.astype(jnp.bfloat16)

    n_tiles = out_pad // tn
    P = n_shards
    T = n_tiles // P

    def const(a):
        # Full-array block, constant index map => loaded once, VMEM resident.
        return pl.BlockSpec(a.shape, lambda p, t: (0,) * len(a.shape))

    in_specs = [
        const(onehot), const(noise_bf16),
        const(ew0a), const(w0b), const(b0), const(g0), const(be0),
        const(w1), const(b1), const(g1), const(be1),
        const(w2), const(b2), const(g2), const(be2),
        const(w3), const(b3), const(g3), const(be3),
        pl.BlockSpec((w4.shape[0], tn), lambda p, t: (0, p * T + t)),  # w4 N-tile
        pl.BlockSpec((1, tn), lambda p, t: (0, p * T + t)),            # b4 N-tile
    ]
    out_specs = pl.BlockSpec((B, tn), lambda p, t: (0, p * T + t))     # lane-dense

    flops = 2 * B * (class_num * d1 + latent * d1
                     + d1 * d2 + d2 * d3 + d3 * d4 + d4 * out_pad)
    bytes_accessed = (sum(int(np.prod(a.shape)) * a.dtype.itemsize
                          for a in flat_params)
                      + B * (class_num + latent) * 2 + B * out_pad * 4)
    cost = pl.CostEstimate(flops=flops,
                           transcendentals=B * out_pad,
                           bytes_accessed=bytes_accessed)

    flat_out = pl.pallas_call(
        _generator_kernel,
        out_shape=jax.ShapeDtypeStruct((B, out_pad), jnp.float32),
        grid_spec=pltpu.PrefetchScalarGridSpec(
            num_scalar_prefetch=0,
            grid=(P, T),
            in_specs=in_specs,
            out_specs=out_specs,
            scratch_shapes=[pltpu.VMEM((B, d4), jnp.float32)]),   # trunk output h
        compiler_params=pltpu.CompilerParams(
            dimension_semantics=("parallel", "arbitrary"),
            vmem_limit_bytes=32 * 1024 * 1024),
        cost_estimate=cost,
    )(onehot, noise_bf16, ew0a, w0b, b0, g0, be0,
      w1, b1, g1, be1, w2, b2, g2, be2, w3, b3, g3, be3, w4, b4)

    # Same as img.view(B, *img_shape) -> NCHW (drop lane padding first).
    return flat_out[:, :out_dim].reshape((B,) + tuple(img_shape))


def reference_forward(noise, labels, flat_params, img_shape, out_dim):
    """Pure-JAX reference mirroring the kernel math (same bf16 weights)."""
    (ew0a, w0b, b0, g0, be0,
     w1, b1, g1, be1,
     w2, b2, g2, be2,
     w3, b3, g3, be3,
     w4, b4) = flat_params
    class_num = ew0a.shape[0]
    B = noise.shape[0]
    onehot = jax.nn.one_hot(labels.astype(jnp.int32), class_num, dtype=jnp.bfloat16)
    noise_bf = noise.astype(jnp.bfloat16)

    def bn_leaky(h, g, be):
        mean = jnp.mean(h, axis=0, keepdims=True)
        var = jnp.mean(h * h, axis=0, keepdims=True) - mean * mean
        h = (h - mean) * jax.lax.rsqrt(var + BN_EPS)
        h = h * g + be
        return jnp.where(h > 0, h, LEAKY_SLOPE * h)

    h = (jnp.dot(onehot, ew0a, preferred_element_type=jnp.float32)
         + jnp.dot(noise_bf, w0b, preferred_element_type=jnp.float32) + b0)
    h = bn_leaky(h, g0, be0)
    for w, b, g, be in ((w1, b1, g1, be1), (w2, b2, g2, be2), (w3, b3, g3, be3)):
        h = jnp.dot(h.astype(jnp.bfloat16), w, preferred_element_type=jnp.float32) + b
        h = bn_leaky(h, g, be)
    y = jnp.dot(h.astype(jnp.bfloat16), w4, preferred_element_type=jnp.float32) + b4
    return jnp.tanh(y)[:, :out_dim].reshape((B,) + tuple(img_shape))


if __name__ == "__main__":
    # Small, module-consistent shapes.
    class_num = 10
    latent_size = 32
    img_shape = (3, 8, 8)     # prod = 192 (padded to 256 lanes inside the kernel)
    batch = 8

    key = jax.random.PRNGKey(0)
    k_params, k_noise, k_labels = jax.random.split(key, 3)

    params = init_generator_params(k_params, class_num, latent_size, img_shape)
    prepared = prepare_generator_params(params, class_num)

    noise = jax.random.normal(k_noise, (batch, latent_size), dtype=jnp.float32)
    labels = jax.random.randint(k_labels, (batch,), 0, class_num, dtype=jnp.int32)

    img = generator_forward(noise, labels, prepared["flat"],
                            img_shape=img_shape,
                            out_dim=prepared["out_dim"],
                            out_pad=prepared["out_pad"],
                            tn=prepared["tn"],
                            n_shards=prepared["n_shards"])
    jax.block_until_ready(img)

    assert img.shape == (batch,) + img_shape, img.shape
    assert img.dtype == jnp.float32
    # Tanh output must be in [-1, 1].
    assert bool(jnp.all(jnp.abs(img) <= 1.0 + 1e-6))
    assert bool(jnp.all(jnp.isfinite(img)))

    # Compare against a pure-JAX reference using the same bf16 weights.
    ref = reference_forward(noise, labels, prepared["flat"], img_shape,
                            prepared["out_dim"])
    max_err = float(jnp.max(jnp.abs(img - ref)))
    assert max_err < 2e-2, max_err

    print("KERNEL_OK")
</pallas_src>

<mosaic_0001>
module attributes {stable_mosaic.version = 11 : i64} {
  func.func @_generator_kernel(%arg0: i32, %arg1: i32, %arg2: memref<8x10xbf16, #tpu.memory_space<vmem>>, %arg3: memref<8x32xbf16, #tpu.memory_space<vmem>>, %arg4: memref<10x128xbf16, #tpu.memory_space<vmem>>, %arg5: memref<32x128xbf16, #tpu.memory_space<vmem>>, %arg6: memref<1x128xf32, #tpu.memory_space<vmem>>, %arg7: memref<1x128xf32, #tpu.memory_space<vmem>>, %arg8: memref<1x128xf32, #tpu.memory_space<vmem>>, %arg9: memref<128x256xbf16, #tpu.memory_space<vmem>>, %arg10: memref<1x256xf32, #tpu.memory_space<vmem>>, %arg11: memref<1x256xf32, #tpu.memory_space<vmem>>, %arg12: memref<1x256xf32, #tpu.memory_space<vmem>>, %arg13: memref<256x512xbf16, #tpu.memory_space<vmem>>, %arg14: memref<1x512xf32, #tpu.memory_space<vmem>>, %arg15: memref<1x512xf32, #tpu.memory_space<vmem>>, %arg16: memref<1x512xf32, #tpu.memory_space<vmem>>, %arg17: memref<512x1024xbf16, #tpu.memory_space<vmem>>, %arg18: memref<1x1024xf32, #tpu.memory_space<vmem>>, %arg19: memref<1x1024xf32, #tpu.memory_space<vmem>>, %arg20: memref<1x1024xf32, #tpu.memory_space<vmem>>, %arg21: memref<1024x128xbf16, #tpu.memory_space<vmem>>, %arg22: memref<1x128xf32, #tpu.memory_space<vmem>>, %arg23: memref<8x128xf32, #tpu.memory_space<vmem>>, %arg24: memref<8x1024xf32, #tpu.memory_space<vmem>>) attributes {dimension_semantics = [#tpu.dimension_semantics<parallel>, #tpu.dimension_semantics<arbitrary>], iteration_bounds = array<i64: 1, 2>, scalar_prefetch = 0 : i64, scratch_operands = 1 : i64, tpu.core_type = #tpu.core_type<tc>, window_params = [{pipeline_mode = #tpu.pipeline_mode<synchronous>, transform_indices = @transform_0, window_bounds = array<i64: 8, 10>}, {pipeline_mode = #tpu.pipeline_mode<synchronous>, transform_indices = @transform_1, window_bounds = array<i64: 8, 32>}, {pipeline_mode = #tpu.pipeline_mode<synchronous>, transform_indices = @transform_2, window_bounds = array<i64: 10, 128>}, {pipeline_mode = #tpu.pipeline_mode<synchronous>, transform_indices = @transform_3, window_bounds = array<i64: 32, 128>}, {pipeline_mode = #tpu.pipeline_mode<synchronous>, transform_indices = @transform_4, window_bounds = array<i64: 1, 128>}, {pipeline_mode = #tpu.pipeline_mode<synchronous>, transform_indices = @transform_5, window_bounds = array<i64: 1, 128>}, {pipeline_mode = #tpu.pipeline_mode<synchronous>, transform_indices = @transform_6, window_bounds = array<i64: 1, 128>}, {pipeline_mode = #tpu.pipeline_mode<synchronous>, transform_indices = @transform_7, window_bounds = array<i64: 128, 256>}, {pipeline_mode = #tpu.pipeline_mode<synchronous>, transform_indices = @transform_8, window_bounds = array<i64: 1, 256>}, {pipeline_mode = #tpu.pipeline_mode<synchronous>, transform_indices = @transform_9, window_bounds = array<i64: 1, 256>}, {pipeline_mode = #tpu.pipeline_mode<synchronous>, transform_indices = @transform_10, window_bounds = array<i64: 1, 256>}, {pipeline_mode = #tpu.pipeline_mode<synchronous>, transform_indices = @transform_11, window_bounds = array<i64: 256, 512>}, {pipeline_mode = #tpu.pipeline_mode<synchronous>, transform_indices = @transform_12, window_bounds = array<i64: 1, 512>}, {pipeline_mode = #tpu.pipeline_mode<synchronous>, transform_indices = @transform_13, window_bounds = array<i64: 1, 512>}, {pipeline_mode = #tpu.pipeline_mode<synchronous>, transform_indices = @transform_14, window_bounds = array<i64: 1, 512>}, {pipeline_mode = #tpu.pipeline_mode<synchronous>, transform_indices = @transform_15, window_bounds = array<i64: 512, 1024>}, {pipeline_mode = #tpu.pipeline_mode<synchronous>, transform_indices = @transform_16, window_bounds = array<i64: 1, 1024>}, {pipeline_mode = #tpu.pipeline_mode<synchronous>, transform_indices = @transform_17, window_bounds = array<i64: 1, 1024>}, {pipeline_mode = #tpu.pipeline_mode<synchronous>, transform_indices = @transform_18, window_bounds = array<i64: 1, 1024>}, {transform_indices = @transform_19, window_bounds = array<i64: 1024, 128>}, {transform_indices = @transform_20, window_bounds = array<i64: 1, 128>}, {transform_indices = @transform_21, window_bounds = array<i64: 8, 128>}]} {
    %c0_i32 = arith.constant 0 : i32
    %0 = arith.cmpi eq, %arg1, %c0_i32 : i32
    %1 = arith.extui %0 : i1 to i32
    %c0_i32_0 = arith.constant 0 : i32
    %2 = arith.cmpi ne, %1, %c0_i32_0 : i32
    scf.if %2 {
      %c0_8 = arith.constant 0 : index
      %c0_9 = arith.constant 0 : index
      %12 = vector.load %arg2[%c0_8, %c0_9] : memref<8x10xbf16, #tpu.memory_space<vmem>>, vector<8x10xbf16>
      %c0_10 = arith.constant 0 : index
      %c0_11 = arith.constant 0 : index
      %13 = vector.load %arg4[%c0_10, %c0_11] : memref<10x128xbf16, #tpu.memory_space<vmem>>, vector<10x128xbf16>
      %cst_12 = arith.constant dense<0.000000e+00> : vector<8x128xf32>
      %14 = tpu.matmul %12, %13, %cst_12 {dimension_numbers = #tpu.dot_dimension_numbers<[1], [0], [0], [1], [0, 0, 1, 1], [], []>} : vector<8x10xbf16>, vector<10x128xbf16>, vector<8x128xf32> -> vector<8x128xf32>
      %c0_13 = arith.constant 0 : index
      %c0_14 = arith.constant 0 : index
      %15 = vector.load %arg3[%c0_13, %c0_14] : memref<8x32xbf16, #tpu.memory_space<vmem>>, vector<8x32xbf16>
      %c0_15 = arith.constant 0 : index
      %c0_16 = arith.constant 0 : index
      %16 = vector.load %arg5[%c0_15, %c0_16] : memref<32x128xbf16, #tpu.memory_space<vmem>>, vector<32x128xbf16>
      %cst_17 = arith.constant dense<0.000000e+00> : vector<8x128xf32>
      %17 = tpu.matmul %15, %16, %cst_17 {dimension_numbers = #tpu.dot_dimension_numbers<[1], [0], [0], [1], [0, 0, 1, 1], [], []>} : vector<8x32xbf16>, vector<32x128xbf16>, vector<8x128xf32> -> vector<8x128xf32>
      %18 = arith.addf %14, %17 : vector<8x128xf32>
      %c0_18 = arith.constant 0 : index
      %c0_19 = arith.constant 0 : index
      %19 = vector.load %arg6[%c0_18, %c0_19] : memref<1x128xf32, #tpu.memory_space<vmem>>, vector<1x128xf32>
      %20 = vector.broadcast %19 : vector<1x128xf32> to vector<8x128xf32>
      %21 = arith.addf %18, %20 : vector<8x128xf32>
      %c0_20 = arith.constant 0 : index
      %c0_21 = arith.constant 0 : index
      %22 = vector.load %arg7[%c0_20, %c0_21] : memref<1x128xf32, #tpu.memory_space<vmem>>, vector<1x128xf32>
      %c0_22 = arith.constant 0 : index
      %c0_23 = arith.constant 0 : index
      %23 = vector.load %arg8[%c0_22, %c0_23] : memref<1x128xf32, #tpu.memory_space<vmem>>, vector<1x128xf32>
      %cst_24 = arith.constant dense<0.000000e+00> : vector<128xf32>
      %24 = vector.multi_reduction <add>, %21, %cst_24 [0] : vector<8x128xf32> to vector<128xf32>
      %25 = vector.shape_cast %24 : vector<128xf32> to vector<1x128xf32>
      %cst_25 = arith.constant 1.250000e-01 : f32
      %26 = vector.broadcast %cst_25 : f32 to vector<1x128xf32>
      %27 = arith.mulf %25, %26 : vector<1x128xf32>
      %28 = arith.mulf %21, %21 : vector<8x128xf32>
      %cst_26 = arith.constant dense<0.000000e+00> : vector<128xf32>
      %29 = vector.multi_reduction <add>, %28, %cst_26 [0] : vector<8x128xf32> to vector<128xf32>
      %30 = vector.shape_cast %29 : vector<128xf32> to vector<1x128xf32>
      %cst_27 = arith.constant 1.250000e-01 : f32
      %31 = vector.broadcast %cst_27 : f32 to vector<1x128xf32>
      %32 = arith.mulf %30, %31 : vector<1x128xf32>
      %33 = arith.mulf %27, %27 : vector<1x128xf32>
      %34 = arith.subf %32, %33 : vector<1x128xf32>
      %35 = vector.broadcast %27 : vector<1x128xf32> to vector<8x128xf32>
      %36 = arith.subf %21, %35 : vector<8x128xf32>
      %cst_28 = arith.constant 8.000000e-01 : f32
      %37 = vector.broadcast %cst_28 : f32 to vector<1x128xf32>
      %38 = arith.addf %34, %37 : vector<1x128xf32>
      %39 = math.rsqrt %38 : vector<1x128xf32>
      %40 = vector.broadcast %39 : vector<1x128xf32> to vector<8x128xf32>
      %41 = arith.mulf %36, %40 : vector<8x128xf32>
      %42 = vector.broadcast %22 : vector<1x128xf32> to vector<8x128xf32>
      %43 = arith.mulf %41, %42 : vector<8x128xf32>
      %44 = vector.broadcast %23 : vector<1x128xf32> to vector<8x128xf32>
      %45 = arith.addf %43, %44 : vector<8x128xf32>
      %cst_29 = arith.constant 0.000000e+00 : f32
      %46 = vector.broadcast %cst_29 : f32 to vector<8x128xf32>
      %47 = arith.cmpf ogt, %45, %46 : vector<8x128xf32>
      %cst_30 = arith.constant 2.000000e-01 : f32
      %48 = vector.broadcast %cst_30 : f32 to vector<8x128xf32>
      %49 = arith.mulf %48, %45 : vector<8x128xf32>
      %50 = arith.select %47, %45, %49 : vector<8x128xi1>, vector<8x128xf32>
      %51 = arith.truncf %50 : vector<8x128xf32> to vector<8x128xbf16>
      %c0_31 = arith.constant 0 : index
      %c0_32 = arith.constant 0 : index
      %52 = vector.load %arg9[%c0_31, %c0_32] : memref<128x256xbf16, #tpu.memory_space<vmem>>, vector<128x256xbf16>
      %cst_33 = arith.constant dense<0.000000e+00> : vector<8x256xf32>
      %53 = tpu.matmul %51, %52, %cst_33 {dimension_numbers = #tpu.dot_dimension_numbers<[1], [0], [0], [1], [0, 0, 1, 1], [], []>} : vector<8x128xbf16>, vector<128x256xbf16>, vector<8x256xf32> -> vector<8x256xf32>
      %c0_34 = arith.constant 0 : index
      %c0_35 = arith.constant 0 : index
      %54 = vector.load %arg10[%c0_34, %c0_35] : memref<1x256xf32, #tpu.memory_space<vmem>>, vector<1x256xf32>
      %55 = vector.broadcast %54 : vector<1x256xf32> to vector<8x256xf32>
      %56 = arith.addf %53, %55 : vector<8x256xf32>
      %c0_36 = arith.constant 0 : index
      %c0_37 = arith.constant 0 : index
      %57 = vector.load %arg11[%c0_36, %c0_37] : memref<1x256xf32, #tpu.memory_space<vmem>>, vector<1x256xf32>
      %c0_38 = arith.constant 0 : index
      %c0_39 = arith.constant 0 : index
      %58 = vector.load %arg12[%c0_38, %c0_39] : memref<1x256xf32, #tpu.memory_space<vmem>>, vector<1x256xf32>
      %cst_40 = arith.constant dense<0.000000e+00> : vector<256xf32>
      %59 = vector.multi_reduction <add>, %56, %cst_40 [0] : vector<8x256xf32> to vector<256xf32>
      %60 = vector.shape_cast %59 : vector<256xf32> to vector<1x256xf32>
      %cst_41 = arith.constant 1.250000e-01 : f32
      %61 = vector.broadcast %cst_41 : f32 to vector<1x256xf32>
      %62 = arith.mulf %60, %61 : vector<1x256xf32>
      %63 = arith.mulf %56, %56 : vector<8x256xf32>
      %cst_42 = arith.constant dense<0.000000e+00> : vector<256xf32>
      %64 = vector.multi_reduction <add>, %63, %cst_42 [0] : vector<8x256xf32> to vector<256xf32>
      %65 = vector.shape_cast %64 : vector<256xf32> to vector<1x256xf32>
      %cst_43 = arith.constant 1.250000e-01 : f32
      %66 = vector.broadcast %cst_43 : f32 to vector<1x256xf32>
      %67 = arith.mulf %65, %66 : vector<1x256xf32>
      %68 = arith.mulf %62, %62 : vector<1x256xf32>
      %69 = arith.subf %67, %68 : vector<1x256xf32>
      %70 = vector.broadcast %62 : vector<1x256xf32> to vector<8x256xf32>
      %71 = arith.subf %56, %70 : vector<8x256xf32>
      %cst_44 = arith.constant 8.000000e-01 : f32
      %72 = vector.broadcast %cst_44 : f32 to vector<1x256xf32>
      %73 = arith.addf %69, %72 : vector<1x256xf32>
      %74 = math.rsqrt %73 : vector<1x256xf32>
      %75 = vector.broadcast %74 : vector<1x256xf32> to vector<8x256xf32>
      %76 = arith.mulf %71, %75 : vector<8x256xf32>
      %77 = vector.broadcast %57 : vector<1x256xf32> to vector<8x256xf32>
      %78 = arith.mulf %76, %77 : vector<8x256xf32>
      %79 = vector.broadcast %58 : vector<1x256xf32> to vector<8x256xf32>
      %80 = arith.addf %78, %79 : vector<8x256xf32>
      %cst_45 = arith.constant 0.000000e+00 : f32
      %81 = vector.broadcast %cst_45 : f32 to vector<8x256xf32>
      %82 = arith.cmpf ogt, %80, %81 : vector<8x256xf32>
      %cst_46 = arith.constant 2.000000e-01 : f32
      %83 = vector.broadcast %cst_46 : f32 to vector<8x256xf32>
      %84 = arith.mulf %83, %80 : vector<8x256xf32>
      %85 = arith.select %82, %80, %84 : vector<8x256xi1>, vector<8x256xf32>
      %86 = arith.truncf %85 : vector<8x256xf32> to vector<8x256xbf16>
      %c0_47 = arith.constant 0 : index
      %c0_48 = arith.constant 0 : index
      %87 = vector.load %arg13[%c0_47, %c0_48] : memref<256x512xbf16, #tpu.memory_space<vmem>>, vector<256x512xbf16>
      %cst_49 = arith.constant dense<0.000000e+00> : vector<8x512xf32>
      %88 = tpu.matmul %86, %87, %cst_49 {dimension_numbers = #tpu.dot_dimension_numbers<[1], [0], [0], [1], [0, 0, 1, 1], [], []>} : vector<8x256xbf16>, vector<256x512xbf16>, vector<8x512xf32> -> vector<8x512xf32>
      %c0_50 = arith.constant 0 : index
      %c0_51 = arith.constant 0 : index
      %89 = vector.load %arg14[%c0_50, %c0_51] : memref<1x512xf32, #tpu.memory_space<vmem>>, vector<1x512xf32>
      %90 = vector.broadcast %89 : vector<1x512xf32> to vector<8x512xf32>
      %91 = arith.addf %88, %90 : vector<8x512xf32>
      %c0_52 = arith.constant 0 : index
      %c0_53 = arith.constant 0 : index
      %92 = vector.load %arg15[%c0_52, %c0_53] : memref<1x512xf32, #tpu.memory_space<vmem>>, vector<1x512xf32>
      %c0_54 = arith.constant 0 : index
      %c0_55 = arith.constant 0 : index
      %93 = vector.load %arg16[%c0_54, %c0_55] : memref<1x512xf32, #tpu.memory_space<vmem>>, vector<1x512xf32>
      %cst_56 = arith.constant dense<0.000000e+00> : vector<512xf32>
      %94 = vector.multi_reduction <add>, %91, %cst_56 [0] : vector<8x512xf32> to vector<512xf32>
      %95 = vector.shape_cast %94 : vector<512xf32> to vector<1x512xf32>
      %cst_57 = arith.constant 1.250000e-01 : f32
      %96 = vector.broadcast %cst_57 : f32 to vector<1x512xf32>
      %97 = arith.mulf %95, %96 : vector<1x512xf32>
      %98 = arith.mulf %91, %91 : vector<8x512xf32>
      %cst_58 = arith.constant dense<0.000000e+00> : vector<512xf32>
      %99 = vector.multi_reduction <add>, %98, %cst_58 [0] : vector<8x512xf32> to vector<512xf32>
      %100 = vector.shape_cast %99 : vector<512xf32> to vector<1x512xf32>
      %cst_59 = arith.constant 1.250000e-01 : f32
      %101 = vector.broadcast %cst_59 : f32 to vector<1x512xf32>
      %102 = arith.mulf %100, %101 : vector<1x512xf32>
      %103 = arith.mulf %97, %97 : vector<1x512xf32>
      %104 = arith.subf %102, %103 : vector<1x512xf32>
      %105 = vector.broadcast %97 : vector<1x512xf32> to vector<8x512xf32>
      %106 = arith.subf %91, %105 : vector<8x512xf32>
      %cst_60 = arith.constant 8.000000e-01 : f32
      %107 = vector.broadcast %cst_60 : f32 to vector<1x512xf32>
      %108 = arith.addf %104, %107 : vector<1x512xf32>
      %109 = math.rsqrt %108 : vector<1x512xf32>
      %110 = vector.broadcast %109 : vector<1x512xf32> to vector<8x512xf32>
      %111 = arith.mulf %106, %110 : vector<8x512xf32>
      %112 = vector.broadcast %92 : vector<1x512xf32> to vector<8x512xf32>
      %113 = arith.mulf %111, %112 : vector<8x512xf32>
      %114 = vector.broadcast %93 : vector<1x512xf32> to vector<8x512xf32>
      %115 = arith.addf %113, %114 : vector<8x512xf32>
      %cst_61 = arith.constant 0.000000e+00 : f32
      %116 = vector.broadcast %cst_61 : f32 to vector<8x512xf32>
      %117 = arith.cmpf ogt, %115, %116 : vector<8x512xf32>
      %cst_62 = arith.constant 2.000000e-01 : f32
      %118 = vector.broadcast %cst_62 : f32 to vector<8x512xf32>
      %119 = arith.mulf %118, %115 : vector<8x512xf32>
      %120 = arith.select %117, %115, %119 : vector<8x512xi1>, vector<8x512xf32>
      %121 = arith.truncf %120 : vector<8x512xf32> to vector<8x512xbf16>
      %c0_63 = arith.constant 0 : index
      %c0_64 = arith.constant 0 : index
      %122 = vector.load %arg17[%c0_63, %c0_64] : memref<512x1024xbf16, #tpu.memory_space<vmem>>, vector<512x1024xbf16>
      %cst_65 = arith.constant dense<0.000000e+00> : vector<8x1024xf32>
      %123 = tpu.matmul %121, %122, %cst_65 {dimension_numbers = #tpu.dot_dimension_numbers<[1], [0], [0], [1], [0, 0, 1, 1], [], []>} : vector<8x512xbf16>, vector<512x1024xbf16>, vector<8x1024xf32> -> vector<8x1024xf32>
      %c0_66 = arith.constant 0 : index
      %c0_67 = arith.constant 0 : index
      %124 = vector.load %arg18[%c0_66, %c0_67] : memref<1x1024xf32, #tpu.memory_space<vmem>>, vector<1x1024xf32>
      %125 = vector.broadcast %124 : vector<1x1024xf32> to vector<8x1024xf32>
      %126 = arith.addf %123, %125 : vector<8x1024xf32>
      %c0_68 = arith.constant 0 : index
      %c0_69 = arith.constant 0 : index
      %127 = vector.load %arg19[%c0_68, %c0_69] : memref<1x1024xf32, #tpu.memory_space<vmem>>, vector<1x1024xf32>
      %c0_70 = arith.constant 0 : index
      %c0_71 = arith.constant 0 : index
      %128 = vector.load %arg20[%c0_70, %c0_71] : memref<1x1024xf32, #tpu.memory_space<vmem>>, vector<1x1024xf32>
      %cst_72 = arith.constant dense<0.000000e+00> : vector<1024xf32>
      %129 = vector.multi_reduction <add>, %126, %cst_72 [0] : vector<8x1024xf32> to vector<1024xf32>
      %130 = vector.shape_cast %129 : vector<1024xf32> to vector<1x1024xf32>
      %cst_73 = arith.constant 1.250000e-01 : f32
      %131 = vector.broadcast %cst_73 : f32 to vector<1x1024xf32>
      %132 = arith.mulf %130, %131 : vector<1x1024xf32>
      %133 = arith.mulf %126, %126 : vector<8x1024xf32>
      %cst_74 = arith.constant dense<0.000000e+00> : vector<1024xf32>
      %134 = vector.multi_reduction <add>, %133, %cst_74 [0] : vector<8x1024xf32> to vector<1024xf32>
      %135 = vector.shape_cast %134 : vector<1024xf32> to vector<1x1024xf32>
      %cst_75 = arith.constant 1.250000e-01 : f32
      %136 = vector.broadcast %cst_75 : f32 to vector<1x1024xf32>
      %137 = arith.mulf %135, %136 : vector<1x1024xf32>
      %138 = arith.mulf %132, %132 : vector<1x1024xf32>
      %139 = arith.subf %137, %138 : vector<1x1024xf32>
      %140 = vector.broadcast %132 : vector<1x1024xf32> to vector<8x1024xf32>
      %141 = arith.subf %126, %140 : vector<8x1024xf32>
      %cst_76 = arith.constant 8.000000e-01 : f32
      %142 = vector.broadcast %cst_76 : f32 to vector<1x1024xf32>
      %143 = arith.addf %139, %142 : vector<1x1024xf32>
      %144 = math.rsqrt %143 : vector<1x1024xf32>
      %145 = vector.broadcast %144 : vector<1x1024xf32> to vector<8x1024xf32>
      %146 = arith.mulf %141, %145 : vector<8x1024xf32>
      %147 = vector.broadcast %127 : vector<1x1024xf32> to vector<8x1024xf32>
      %148 = arith.mulf %146, %147 : vector<8x1024xf32>
      %149 = vector.broadcast %128 : vector<1x1024xf32> to vector<8x1024xf32>
      %150 = arith.addf %148, %149 : vector<8x1024xf32>
      %cst_77 = arith.constant 0.000000e+00 : f32
      %151 = vector.broadcast %cst_77 : f32 to vector<8x1024xf32>
      %152 = arith.cmpf ogt, %150, %151 : vector<8x1024xf32>
      %cst_78 = arith.constant 2.000000e-01 : f32
      %153 = vector.broadcast %cst_78 : f32 to vector<8x1024xf32>
      %154 = arith.mulf %153, %150 : vector<8x1024xf32>
      %155 = arith.select %152, %150, %154 : vector<8x1024xi1>, vector<8x1024xf32>
      %c0_79 = arith.constant 0 : index
      %c0_80 = arith.constant 0 : index
      %156 = vector.load %arg24[%c0_79, %c0_80] : memref<8x1024xf32, #tpu.memory_space<vmem>>, vector<8x1024xf32>
      tpu.vector_store %arg24[%c0_79, %c0_80], %155 {strides = array<i32>} : memref<8x1024xf32, #tpu.memory_space<vmem>>, vector<8x1024xf32>,
    } else {
    }
    %c0 = arith.constant 0 : index
    %c0_1 = arith.constant 0 : index
    %3 = vector.load %arg24[%c0, %c0_1] : memref<8x1024xf32, #tpu.memory_space<vmem>>, vector<8x1024xf32>
    %4 = arith.truncf %3 : vector<8x1024xf32> to vector<8x1024xbf16>
    %c0_2 = arith.constant 0 : index
    %c0_3 = arith.constant 0 : index
    %5 = vector.load %arg21[%c0_2, %c0_3] : memref<1024x128xbf16, #tpu.memory_space<vmem>>, vector<1024x128xbf16>
    %cst = arith.constant dense<0.000000e+00> : vector<8x128xf32>
    %6 = tpu.matmul %4, %5, %cst {dimension_numbers = #tpu.dot_dimension_numbers<[1], [0], [0], [1], [0, 0, 1, 1], [], []>} : vector<8x1024xbf16>, vector<1024x128xbf16>, vector<8x128xf32> -> vector<8x128xf32>
    %c0_4 = arith.constant 0 : index
    %c0_5 = arith.constant 0 : index
    %7 = vector.load %arg22[%c0_4, %c0_5] : memref<1x128xf32, #tpu.memory_space<vmem>>, vector<1x128xf32>
    %8 = vector.broadcast %7 : vector<1x128xf32> to vector<8x128xf32>
    %9 = arith.addf %6, %8 : vector<8x128xf32>
    %10 = math.tanh %9 : vector<8x128xf32>
    %c0_6 = arith.constant 0 : index
    %c0_7 = arith.constant 0 : index
    %11 = vector.load %arg23[%c0_6, %c0_7] : memref<8x128xf32, #tpu.memory_space<vmem>>, vector<8x128xf32>
    tpu.vector_store %arg23[%c0_6, %c0_7], %10 {strides = array<i32>} : memref<8x128xf32, #tpu.memory_space<vmem>>, vector<8x128xf32>,
    return
  }
  func.func @transform_0(%arg0: i32, %arg1: i32) -> (i32, i32) {
    %c0_i32 = arith.constant 0 : i32
    %c0_i32_0 = arith.constant 0 : i32
    %c0_i32_1 = arith.constant 0 : i32
    return %c0_i32, %c0_i32_0 : i32, i32
  }
  func.func @transform_1(%arg0: i32, %arg1: i32) -> (i32, i32) {
    %c0_i32 = arith.constant 0 : i32
    %c0_i32_0 = arith.constant 0 : i32
    %c0_i32_1 = arith.constant 0 : i32
    return %c0_i32, %c0_i32_0 : i32, i32
  }
  func.func @transform_2(%arg0: i32, %arg1: i32) -> (i32, i32) {
    %c0_i32 = arith.constant 0 : i32
    %c0_i32_0 = arith.constant 0 : i32
    %c0_i32_1 = arith.constant 0 : i32
    return %c0_i32, %c0_i32_0 : i32, i32
  }
  func.func @transform_3(%arg0: i32, %arg1: i32) -> (i32, i32) {
    %c0_i32 = arith.constant 0 : i32
    %c0_i32_0 = arith.constant 0 : i32
    %c0_i32_1 = arith.constant 0 : i32
    return %c0_i32, %c0_i32_0 : i32, i32
  }
  func.func @transform_4(%arg0: i32, %arg1: i32) -> (i32, i32) {
    %c0_i32 = arith.constant 0 : i32
    %c0_i32_0 = arith.constant 0 : i32
    %c0_i32_1 = arith.constant 0 : i32
    return %c0_i32, %c0_i32_0 : i32, i32
  }
  func.func @transform_5(%arg0: i32, %arg1: i32) -> (i32, i32) {
    %c0_i32 = arith.constant 0 : i32
    %c0_i32_0 = arith.constant 0 : i32
    %c0_i32_1 = arith.constant 0 : i32
    return %c0_i32, %c0_i32_0 : i32, i32
  }
  func.func @transform_6(%arg0: i32, %arg1: i32) -> (i32, i32) {
    %c0_i32 = arith.constant 0 : i32
    %c0_i32_0 = arith.constant 0 : i32
    %c0_i32_1 = arith.constant 0 : i32
    return %c0_i32, %c0_i32_0 : i32, i32
  }
  func.func @transform_7(%arg0: i32, %arg1: i32) -> (i32, i32) {
    %c0_i32 = arith.constant 0 : i32
    %c0_i32_0 = arith.constant 0 : i32
    %c0_i32_1 = arith.constant 0 : i32
    return %c0_i32, %c0_i32_0 : i32, i32
  }
  func.func @transform_8(%arg0: i32, %arg1: i32) -> (i32, i32) {
    %c0_i32 = arith.constant 0 : i32
    %c0_i32_0 = arith.constant 0 : i32
    %c0_i32_1 = arith.constant 0 : i32
    return %c0_i32, %c0_i32_0 : i32, i32
  }
  func.func @transform_9(%arg0: i32, %arg1: i32) -> (i32, i32) {
    %c0_i32 = arith.constant 0 : i32
    %c0_i32_0 = arith.constant 0 : i32
    %c0_i32_1 = arith.constant 0 : i32
    return %c0_i32, %c0_i32_0 : i32, i32
  }
  func.func @transform_10(%arg0: i32, %arg1: i32) -> (i32, i32) {
    %c0_i32 = arith.constant 0 : i32
    %c0_i32_0 = arith.constant 0 : i32
    %c0_i32_1 = arith.constant 0 : i32
    return %c0_i32, %c0_i32_0 : i32, i32
  }
  func.func @transform_11(%arg0: i32, %arg1: i32) -> (i32, i32) {
    %c0_i32 = arith.constant 0 : i32
    %c0_i32_0 = arith.constant 0 : i32
    %c0_i32_1 = arith.constant 0 : i32
    return %c0_i32, %c0_i32_0 : i32, i32
  }
  func.func @transform_12(%arg0: i32, %arg1: i32) -> (i32, i32) {
    %c0_i32 = arith.constant 0 : i32
    %c0_i32_0 = arith.constant 0 : i32
    %c0_i32_1 = arith.constant 0 : i32
    return %c0_i32, %c0_i32_0 : i32, i32
  }
  func.func @transform_13(%arg0: i32, %arg1: i32) -> (i32, i32) {
    %c0_i32 = arith.constant 0 : i32
    %c0_i32_0 = arith.constant 0 : i32
    %c0_i32_1 = arith.constant 0 : i32
    return %c0_i32, %c0_i32_0 : i32, i32
  }
  func.func @transform_14(%arg0: i32, %arg1: i32) -> (i32, i32) {
    %c0_i32 = arith.constant 0 : i32
    %c0_i32_0 = arith.constant 0 : i32
    %c0_i32_1 = arith.constant 0 : i32
    return %c0_i32, %c0_i32_0 : i32, i32
  }
  func.func @transform_15(%arg0: i32, %arg1: i32) -> (i32, i32) {
    %c0_i32 = arith.constant 0 : i32
    %c0_i32_0 = arith.constant 0 : i32
    %c0_i32_1 = arith.constant 0 : i32
    return %c0_i32, %c0_i32_0 : i32, i32
  }
  func.func @transform_16(%arg0: i32, %arg1: i32) -> (i32, i32) {
    %c0_i32 = arith.constant 0 : i32
    %c0_i32_0 = arith.constant 0 : i32
    %c0_i32_1 = arith.constant 0 : i32
    return %c0_i32, %c0_i32_0 : i32, i32
  }
  func.func @transform_17(%arg0: i32, %arg1: i32) -> (i32, i32) {
    %c0_i32 = arith.constant 0 : i32
    %c0_i32_0 = arith.constant 0 : i32
    %c0_i32_1 = arith.constant 0 : i32
    return %c0_i32, %c0_i32_0 : i32, i32
  }
  func.func @transform_18(%arg0: i32, %arg1: i32) -> (i32, i32) {
    %c0_i32 = arith.constant 0 : i32
    %c0_i32_0 = arith.constant 0 : i32
    %c0_i32_1 = arith.constant 0 : i32
    return %c0_i32, %c0_i32_0 : i32, i32
  }
  func.func @transform_19(%arg0: i32, %arg1: i32) -> (i32, i32) {
    %c2_i32 = arith.constant 2 : i32
    %0 = arith.muli %arg0, %c2_i32 : i32
    %1 = arith.addi %0, %arg1 : i32
    %c0_i32 = arith.constant 0 : i32
    %c0_i32_0 = arith.constant 0 : i32
    return %c0_i32, %1 : i32, i32
  }
  func.func @transform_20(%arg0: i32, %arg1: i32) -> (i32, i32) {
    %c2_i32 = arith.constant 2 : i32
    %0 = arith.muli %arg0, %c2_i32 : i32
    %1 = arith.addi %0, %arg1 : i32
    %c0_i32 = arith.constant 0 : i32
    %c0_i32_0 = arith.constant 0 : i32
    return %c0_i32, %1 : i32, i32
  }
  func.func @transform_21(%arg0: i32, %arg1: i32) -> (i32, i32) {
    %c2_i32 = arith.constant 2 : i32
    %0 = arith.muli %arg0, %c2_i32 : i32
    %1 = arith.addi %0, %arg1 : i32
    %c0_i32 = arith.constant 0 : i32
    %c0_i32_0 = arith.constant 0 : i32
    return %c0_i32, %1 : i32, i32
  }
}

</mosaic_0001>

<bundles_post_ra>
// kernel: generator_forward.1
= control target key start
LH: loop header
LB: loop body
LE: loop exit
PB: predicated region body
PF: predicated region fallthrough
CT: control target
= control target key end

     0   :  { %s7178_s0 = inlined_call_operand.vmem [shape: bf16[8,10], index: 0, kind: input, shape index: {}]   ;;  %s7179_s1 = inlined_call_operand.vmem [shape: bf16[8,32], index: 1, kind: input, shape index: {}]   ;;  %s7180_s2 = inlined_call_operand.hbm [shape: bf16[10,128], index: 2, kind: input, shape index: {}]   ;;  %s7181_s3 = inlined_call_operand.vmem [shape: bf16[32,128], index: 3, kind: input, shape index: {}]   ;;  %s7182_s4 = inlined_call_operand.hbm [shape: f32[1,128], index: 4, kind: input, shape index: {}]   ;;  %s7183_s5 = inlined_call_operand.hbm [shape: f32[1,128], index: 5, kind: input, shape index: {}]   ;;  %s7184_s6 = inlined_call_operand.hbm [shape: f32[1,128], index: 6, kind: input, shape index: {}]   ;;  %s7185_s7 = inlined_call_operand.hbm [shape: bf16[128,256], index: 7, kind: input, shape index: {}]   ;;  %s7186_s8 = inlined_call_operand.hbm [shape: f32[1,256], index: 8, kind: input, shape index: {}]   ;;  %s7187_s9 = inlined_call_operand.hbm [shape: f32[1,256], index: 9, kind: input, shape index: {}]   ;;  %s7188_s10 = inlined_call_operand.hbm [shape: f32[1,256], index: 10, kind: input, shape index: {}]   ;;  %s7189_s11 = inlined_call_operand.hbm [shape: bf16[256,512], index: 11, kind: input, shape index: {}]   ;;  %s7190_s12 = inlined_call_operand.hbm [shape: f32[1,512], index: 12, kind: input, shape index: {}]   ;;  %s7191_s13 = inlined_call_operand.hbm [shape: f32[1,512], index: 13, kind: input, shape index: {}]   ;;  %s7192_s14 = inlined_call_operand.hbm [shape: f32[1,512], index: 14, kind: input, shape index: {}]   ;;  %s7193_s15 = inlined_call_operand.hbm [shape: bf16[512,1024], index: 15, kind: input, shape index: {}]   ;;  %s7194_s16 = inlined_call_operand.vmem [shape: f32[1,1024], index: 16, kind: input, shape index: {}]   ;;  %s7195_s17 = inlined_call_operand.vmem [shape: f32[1,1024], index: 17, kind: input, shape index: {}]   ;;  %s7196_s18 = inlined_call_operand.vmem [shape: f32[1,1024], index: 18, kind: input, shape index: {}]   ;;  %s7197_s19 = inlined_call_operand.hbm [shape: bf16[1024,256], index: 19, kind: input, shape index: {}]   ;;  %s7198_s20 = inlined_call_operand.vmem [shape: f32[1,256], index: 20, kind: input, shape index: {}]   ;;  %s7199_s21 = inlined_call_operand.vmem [shape: f32[8,256], index: 21, kind: output, shape index: {}]  }
   0x1   :  { %7207 = sst [smem:[#allocation33_spill]] %s7178_s0 }
   0x2   :  { %7208 = sst [smem:[#allocation34_spill]] %s7179_s1 }
   0x3   :  { %7209 = sst [smem:[#allocation35_spill]] %s7180_s2 }
   0x4   :  { %7210 = sst [smem:[#allocation36_spill]] %s7181_s3 }
   0x5   :  { %7211 = sst [smem:[#allocation37_spill]] %s7182_s4 }
   0x6   :  { %7212 = sst [smem:[#allocation38_spill]] %s7183_s5 }
   0x7   :  { %7213 = sst [smem:[#allocation39_spill]] %s7184_s6 }
   0x8   :  { %7214 = sst [smem:[#allocation40_spill]] %s7185_s7 }
   0x9   :  { %7215 = sst [smem:[#allocation41_spill]] %s7186_s8 }
   0xa   :  { %7216 = sst [smem:[#allocation42_spill]] %s7187_s9 }
   0xb   :  { %7217 = sst [smem:[#allocation43_spill]] %s7194_s16 }
   0xc   :  { %7218 = sst [smem:[#allocation44_spill]] %s7195_s17 }
   0xd   :  { %7219 = sst [smem:[#allocation45_spill]] %s7196_s18 }
   0xe   :  { %7220 = sst [smem:[#allocation46_spill]] %s7198_s20 }
   0xf   :  { %7221 = sst [smem:[#allocation47_spill]] %s7199_s21 }
  0x10   :  { %26 = vsyncpa [#allocation4], 0 }
  0x11   :  { %27 = vsyncpa [#allocation6], 0 }
  0x12   :  { %28 = vsyncpa [#allocation9], 0 }
  0x13   :  { %29 = vsyncpa [#allocation12], 0 }
  0x14   :  { %30 = vsyncpa [#allocation15], 0 }
  0x15   :  { %31 = vsyncpa [#allocation18], 0 }
  0x16   :  { %32 = vsyncpa [#allocation21], 0 }
  0x17   :  { %33 = vsyncpa [#allocation24], 0 }
  0x18   :  { %35 = vsyncpa [#allocation24 + $0x1], 0  ;;  %s6611_s2 = smov 0   ;;  %s6613_s25 = smov 0  }
  0x19   :  { %s6615_s26 = smov 0   ;;  %s6617_s27 = smov 0  }
  0x1a   :  { %s6619_s3 = smov 0   ;;  %s6621_s28 = smov 0  }
  0x1b LB: > { %s6476_s29 = smov [#allocation5]   ;;  %s5060_s4 = sadd.s32 4294967295, %s6474_s28   ;;  %s6474_s28 = sphi %s6621_s28, %s41_s28   ;;  %s6470_s3 = sphi %s6619_s3, %s7255_s3   ;;  %s6466_s27 = sphi %s6617_s27, %s7254_s27   ;;  %s6462_s26 = sphi %s6615_s26, %s7253_s26   ;;  %s6458_s25 = sphi %s6613_s25, %s7252_s25   ;;  %s6454_s2 = sphi %s6611_s2, %s7251_s2  }
  0x1c   : > { %s582_s0 = sshll.u32 %s6476_s29, 4  ;;  %p5062_p0 = scmp.ge.s32.totalorder %s6474_s28, 1  ;;  %s583_s0 = int_to_ptr.vmem [resolvable:$true] %s582_s0 }
  0x1d   : > { %p6643_p1 = scmp.eq.s32.totalorder %s5060_s4, 0  ;;  %p547_p2 = scmp.lt.s32.totalorder %s6474_s28, 3 }
  0x1e   : > { %s6477_s22 = smov [#allocation8]   ;;  %s6478_s1 = smov [#allocation11]  }
  0x1f   : > { %s7222_s30 = scalar_select %p6643_p1, 1, 0 }
  0x20   : > { %p6648_p3 = pnand %p5062_p0, %p547_p2  ;;  %s604_s23 = sshll.u32 %s6477_s22, 4  ;;  %s6654_s23 = int_to_ptr.vmem [resolvable:$true] %s604_s23 }
  0x21   : > { %s628_s24 = sshll.u32 %s6478_s1, 4  ;;  %s6479_s4 = smov [#allocation14]   ;;  %s6662_s24 = int_to_ptr.vmem [resolvable:$true] %s628_s24 }
  0x22   : > { %s7223_s5 = scalar_select %p6648_p3, 1, 0 }
  0x23   : > { %p5668_p4 = pneg %p6648_p3  ;;  %s6664_s18 = sshll.u32 %s6479_s4, 4  ;;  %s651_s18 = int_to_ptr.vmem [resolvable:$true] %s6664_s18 }
  0x24   : > { %s6041_s22 = scalar_lea.vmem %s583_s0, 16  ;;  %s6048_s1 = scalar_lea.vmem %s583_s0, 32 }
  0x25   : > { %p6658_p5 = pnand %p5668_p4, %p6643_p1  ;;  %p6042_p7 = scmp.ne.s32.totalorder %s583_s0, %s6041_s22 }
  0x26   : > { %p6049_p10 = scmp.lt.s32.totalorder %s583_s0, %s583_s0  ;;  %p6050_p11 = scmp.lt.s32.totalorder %s6048_s1, %s6041_s22 }
  0x27   : > { %p6668_p6 = pneg %p6658_p5 }
  0x28   : > { %p6051_p12 = por %p6050_p11, %p6049_p10 }
  0x29   : > { %p6044_p8 = pnand %p6042_p7, %p6668_p6 }
  0x2b   : > { %p6045_p9 = pneg %p6044_p8 }
  0x2d   : > { %p6052_p13 = pnand %p6051_p12, %p6045_p9 }
  0x2f   : > { %6055 = shalt.err (!%p6052_p13)
}
  0x30   : > { %s7226_s21 = sld [smem:[#allocation37_spill]]  ;;  %s6067_s20 = scalar_lea.vmem %s6654_s23, 16 }
  0x31   : > { %p6068_p0 = scmp.ne.s32.totalorder %s6654_s23, %s6067_s20  ;;  %s6074_s22 = scalar_lea.vmem %s6654_s23, 32 }
  0x32   : > { %p6075_p7 = scmp.lt.s32.totalorder %s6654_s23, %s6654_s23  ;;  %p6076_p8 = scmp.lt.s32.totalorder %s6074_s22, %s6067_s20 }
  0x33   : > { %p6070_p2 = pnand %p6068_p0, %p6668_p6 }
  0x34   : > { %p6077_p9 = por %p6076_p8, %p6075_p7 }
  0x35   : > { %p6071_p4 = pneg %p6070_p2 }
  0x36   : > { %5674 = dma.hbm_to_vmem [thread:$0]  (!%p6658_p5), %s7226_s21, 16, %s583_s0, [#allocation6]  }
  0x37   : > { %p6078_p10 = pnand %p6077_p9, %p6071_p4 }
  0x39   : > { %6081 = shalt.err (!%p6078_p10)
}
  0x3a   : > { %s7227_s6 = sld [smem:[#allocation39_spill]]  ;;  %s6093_s21 = scalar_lea.vmem %s6662_s24, 32 }
  0x3b   : > { %p6094_p11 = scmp.ne.s32.totalorder %s6662_s24, %s6093_s21  ;;  %p6101_p0 = scmp.lt.s32.totalorder %s6662_s24, %s6662_s24 }
  0x3c   : > { %p6102_p2 = scmp.lt.s32.totalorder %s6093_s21, %s6093_s21 }
  0x3d   : > { %p6096_p12 = pnand %p6094_p11, %p6668_p6 }
  0x3e   : > { %p6103_p4 = por %p6102_p2, %p6101_p0 }
  0x3f   : > { %p6097_p13 = pneg %p6096_p12 }
  0x40   : > { %5680 = dma.hbm_to_vmem [thread:$0]  (!%p6658_p5), %s7227_s6, 16, %s6654_s23, [#allocation9]  }
  0x41   : > { %p6104_p7 = pnand %p6103_p4, %p6097_p13 }
  0x43   : > { %6107 = shalt.err (!%p6104_p7)
}
  0x44   : > { %s7228_s8 = sld [smem:[#allocation41_spill]]  ;;  %s6480_s23 = smov [#allocation17]  }
  0x45   : > { %s674_s4 = sshll.u32 %s6480_s23, 4  ;;  %s6119_s22 = scalar_lea.vmem %s651_s18, 32  ;;  %s675_s4 = int_to_ptr.vmem [resolvable:$true] %s674_s4 }
  0x46   : > { %p6120_p8 = scmp.ne.s32.totalorder %s651_s18, %s6119_s22  ;;  %p6127_p11 = scmp.lt.s32.totalorder %s651_s18, %s651_s18 }
  0x47   : > { %p6128_p12 = scmp.lt.s32.totalorder %s6119_s22, %s6119_s22 }
  0x48   : > { %p6122_p9 = pnand %p6120_p8, %p6668_p6 }
  0x49   : > { %p6129_p13 = por %p6128_p12, %p6127_p11 }
  0x4a   : > { %5686 = dma.hbm_to_vmem [thread:$0]  (!%p6658_p5), %s7228_s8, 32, %s6662_s24, [#allocation12]  }
  0x4b   : > { %p6123_p10 = pneg %p6122_p9 }
  0x4d   : > { %p6130_p0 = pnand %p6129_p13, %p6123_p10 }
  0x4f   : > { %6133 = shalt.err (!%p6130_p0)
}
  0x50   : > { %5692 = dma.hbm_to_vmem [thread:$0]  (!%p6658_p5), %s7188_s10, 32, %s651_s18, [#allocation15]  }
  0x51   : > { %s6145_s24 = scalar_lea.vmem %s675_s4, 64  ;;  %p6153_p8 = scmp.lt.s32.totalorder %s675_s4, %s675_s4 }
  0x52   : > { %p6146_p2 = scmp.ne.s32.totalorder %s675_s4, %s6145_s24  ;;  %p6154_p9 = scmp.lt.s32.totalorder %s6145_s24, %s6145_s24 }
  0x54   : > { %p6148_p4 = pnand %p6146_p2, %p6668_p6  ;;  %p6155_p3 = por %p6154_p9, %p6153_p8 }
  0x56   : > { %p6149_p7 = pneg %p6148_p4 }
  0x58   : > { %p6156_p1 = pnand %p6155_p3, %p6149_p7 }
  0x5a   : > { %6159 = shalt.err (!%p6156_p1)
}
  0x5b   : > { %5698 = dma.hbm_to_vmem [thread:$0]  (!%p6658_p5), %s7190_s12, 64, %s675_s4, [#allocation18]  }
  0x5c   : > { %s6481_s0 = smov [#allocation20]  }
  0x5d   : > { %s696_s18 = sshll.u32 %s6481_s0, 4  ;;  %s697_s18 = int_to_ptr.vmem [resolvable:$true] %s696_s18 }
  0x5e   : > { %s6171_s23 = scalar_lea.vmem %s697_s18, 64  ;;  %p6179_p13 = scmp.lt.s32.totalorder %s697_s18, %s697_s18 }
  0x5f   : > { %p6172_p10 = scmp.ne.s32.totalorder %s697_s18, %s6171_s23  ;;  %p6180_p0 = scmp.lt.s32.totalorder %s6171_s23, %s6171_s23 }
  0x61   : > { %p6174_p11 = pnand %p6172_p10, %p6668_p6  ;;  %p6181_p2 = por %p6180_p0, %p6179_p13 }
  0x63   : > { %p6175_p12 = pneg %p6174_p11 }
  0x65   : > { %p6182_p3 = pnand %p6181_p2, %p6175_p12 }
  0x67   : > { %6185 = shalt.err (!%p6182_p3)
}
  0x68   : > { %5704 = dma.hbm_to_vmem [thread:$0]  (!%p6658_p5), %s7192_s14, 64, %s697_s18, [#allocation21]  }
  0x69   : > { %s6482_s4 = smov [#allocation3]  }
  0x6a   : > { %s565_s1 = sshll.u32 %s6482_s4, 4  ;;  %s566_s1 = int_to_ptr.vmem [resolvable:$true] %s565_s1 }
  0x6b   : > { %s6197_s24 = scalar_lea.vmem %s566_s1, 128  ;;  %p6205_p8 = scmp.lt.s32.totalorder %s566_s1, %s566_s1 }
  0x6c   : > { %p6198_p1 = scmp.ne.s32.totalorder %s566_s1, %s6197_s24  ;;  %p6206_p9 = scmp.lt.s32.totalorder %s6197_s24, %s6197_s24 }
  0x6e   : > { %p6200_p4 = pnand %p6198_p1, %p6668_p6  ;;  %p6207_p10 = por %p6206_p9, %p6205_p8 }
  0x70   : > { %p6201_p7 = pneg %p6200_p4 }
  0x72   : > { %p6208_p11 = pnand %p6207_p10, %p6201_p7 }
  0x74   : > { %6211 = shalt.err (!%p6208_p11)
}
  0x75   : > { %s7204_s21 = smov 64   ;;  %s7206_s20 = smov 4  }
  0x76   : > { %s7229_s23 = sld [smem:[#allocation35_spill]]  ;;  %s6485_s22 = smov [#allocation7]  }
  0x77   : > { %s593_s16 = sshll.u32 %s6485_s22, 4  ;;  %s6486_s4 = smov [#allocation10]   ;;  %s594_s16 = int_to_ptr.vmem [resolvable:$true] %s593_s16 }
  0x78   : > { %s614_s24 = sshll.u32 %s6486_s4, 4  ;;  %s6223_s6 = scalar_lea.vmem %s594_s16, 16  ;;  %s615_s24 = int_to_ptr.vmem [resolvable:$true] %s614_s24 }
  0x79   : > { %p6224_p12 = scmp.ne.s32.totalorder %s594_s16, %s6223_s6  ;;  %s6230_s8 = scalar_lea.vmem %s594_s16, 32 }
  0x7a   : > { %p6231_p2 = scmp.lt.s32.totalorder %s594_s16, %s594_s16  ;;  %p6232_p3 = scmp.lt.s32.totalorder %s6230_s8, %s6223_s6 }
  0x7b   : > { %p6226_p13 = pnand %p6224_p12, %p6668_p6 }
  0x7c   : > { %5671 = dma.hbm_to_vmem [thread:$0]  (!%p6658_p5), %s7229_s23, 128, %s566_s1, [#allocation4], %s7204_s21, %s7204_s21, %s7206_s20  }
  0x7d   : > { %p6227_p0 = pneg %p6226_p13  ;;  %p6233_p1 = por %p6232_p3, %p6231_p2 }
  0x7f   : > { %p6234_p4 = pnand %p6233_p1, %p6227_p0 }
  0x81   : > { %6237 = shalt.err (!%p6234_p4)
}
  0x82   : > { %s7230_s18 = sld [smem:[#allocation38_spill]]  ;;  %s6249_s23 = scalar_lea.vmem %s615_s24, 2048 }
  0x83   : > { %p6250_p7 = scmp.ne.s32.totalorder %s615_s24, %s6249_s23  ;;  %p6257_p10 = scmp.lt.s32.totalorder %s615_s24, %s615_s24 }
  0x84   : > { %p6258_p11 = scmp.lt.s32.totalorder %s6249_s23, %s6249_s23 }
  0x85   : > { %p6252_p8 = pnand %p6250_p7, %p6668_p6 }
  0x86   : > { %p6259_p12 = por %p6258_p11, %p6257_p10 }
  0x87   : > { %p6253_p9 = pneg %p6252_p8 }
  0x88   : > { %5677 = dma.hbm_to_vmem [thread:$0]  (!%p6658_p5), %s7230_s18, 16, %s594_s16, [#allocation6]  }
  0x89   : > { %p6260_p13 = pnand %p6259_p12, %p6253_p9 }
  0x8b   : > { %6263 = shalt.err (!%p6260_p13)
}
  0x8c   : > { %s7205_s6 = smov 128   ;;  %s6488_s8 = smov 8  }
  0x8d   : > { %s7231_s7 = sld [smem:[#allocation40_spill]]  ;;  %s6489_s4 = smov [#allocation13]  }
  0x8e   : > { %s639_s0 = sshll.u32 %s6489_s4, 4  ;;  %s6490_s1 = smov [#allocation16]   ;;  %s640_s0 = int_to_ptr.vmem [resolvable:$true] %s639_s0 }
  0x8f   : > { %s660_s18 = sshll.u32 %s6490_s1, 4  ;;  %s6275_s23 = scalar_lea.vmem %s640_s0, 32  ;;  %s661_s18 = int_to_ptr.vmem [resolvable:$true] %s660_s18 }
  0x90   : > { %p6276_p0 = scmp.ne.s32.totalorder %s640_s0, %s6275_s23  ;;  %p6283_p1 = scmp.lt.s32.totalorder %s640_s0, %s640_s0 }
  0x91   : > { %p6284_p4 = scmp.lt.s32.totalorder %s6275_s23, %s6275_s23 }
  0x92   : > { %p6278_p2 = pnand %p6276_p0, %p6668_p6 }
  0x93   : > { %5683 = dma.hbm_to_vmem [thread:$0]  (!%p6658_p5), %s7231_s7, 2048, %s615_s24, [#allocation9], %s7205_s6, %s7205_s6, %s6488_s8  }
  0x94   : > { %p6279_p3 = pneg %p6278_p2  ;;  %p6285_p7 = por %p6284_p4, %p6283_p1 }
  0x96   : > { %p6286_p8 = pnand %p6285_p7, %p6279_p3 }
  0x98   : > { %6289 = shalt.err (!%p6286_p8)
}
  0x99   : > { %s7232_s9 = sld [smem:[#allocation42_spill]]  ;;  %s6301_s24 = scalar_lea.vmem %s661_s18, 8192 }
  0x9a   : > { %p6302_p9 = scmp.ne.s32.totalorder %s661_s18, %s6301_s24  ;;  %p6309_p12 = scmp.lt.s32.totalorder %s661_s18, %s661_s18 }
  0x9b   : > { %p6310_p13 = scmp.lt.s32.totalorder %s6301_s24, %s6301_s24 }
  0x9c   : > { %p6304_p10 = pnand %p6302_p9, %p6668_p6 }
  0x9d   : > { %p6311_p0 = por %p6310_p13, %p6309_p12 }
  0x9e   : > { %p6305_p11 = pneg %p6304_p10 }
  0x9f   : > { %5689 = dma.hbm_to_vmem [thread:$0]  (!%p6658_p5), %s7232_s9, 32, %s640_s0, [#allocation12]  }
  0xa0   : > { %p6312_p2 = pnand %p6311_p0, %p6305_p11 }
  0xa2   : > { %6315 = shalt.err (!%p6312_p2)
}
  0xa3   : > { %s6491_s8 = smov 256   ;;  %s6492_s16 = smov 16  }
  0xa4   : > { %5695 = dma.hbm_to_vmem [thread:$0]  (!%p6658_p5), %s7189_s11, 8192, %s661_s18, [#allocation15], %s6491_s8, %s6491_s8, %s6492_s16  }
  0xa5   : > { %s6493_s0 = smov [#allocation19]   ;;  %s6494_s23 = smov [#allocation22]  }
  0xa6   : > { %s685_s1 = sshll.u32 %s6493_s0, 4  ;;  %s706_s22 = sshll.u32 %s6494_s23, 4  ;;  %s686_s1 = int_to_ptr.vmem [resolvable:$true] %s685_s1  ;;  %s707_s22 = int_to_ptr.vmem [resolvable:$true] %s706_s22 }
  0xa7   : > { %s6327_s6 = scalar_lea.vmem %s686_s1, 64  ;;  %p6335_p7 = scmp.lt.s32.totalorder %s686_s1, %s686_s1 }
  0xa8   : > { %p6328_p3 = scmp.ne.s32.totalorder %s686_s1, %s6327_s6  ;;  %p6336_p8 = scmp.lt.s32.totalorder %s6327_s6, %s6327_s6 }
  0xaa   : > { %p6330_p1 = pnand %p6328_p3, %p6668_p6  ;;  %p6337_p9 = por %p6336_p8, %p6335_p7 }
  0xac   : > { %p6331_p4 = pneg %p6330_p1 }
  0xae   : > { %p6338_p10 = pnand %p6337_p9, %p6331_p4 }
  0xb0   : > { %6341 = shalt.err (!%p6338_p10)
}
  0xb1   : > { %5701 = dma.hbm_to_vmem [thread:$0]  (!%p6658_p5), %s7191_s13, 64, %s686_s1, [#allocation18]  }
  0xb2   : > { %s6353_s18 = scalar_lea.vmem %s707_s22, 32768  ;;  %p6361_p0 = scmp.lt.s32.totalorder %s707_s22, %s707_s22 }
  0xb3   : > { %p6354_p11 = scmp.ne.s32.totalorder %s707_s22, %s6353_s18  ;;  %p6362_p2 = scmp.lt.s32.totalorder %s6353_s18, %s6353_s18 }
  0xb5   : > { %p6356_p12 = pnand %p6354_p11, %p6668_p6  ;;  %p6363_p3 = por %p6362_p2, %p6361_p0 }
  0xb7   : > { %p6357_p13 = pneg %p6356_p12 }
  0xb9   : > { %p6364_p1 = pnand %p6363_p3, %p6357_p13 }
  0xbb   : > { %6367 = shalt.err (!%p6364_p1)
}
  0xbc   : > { %s6495_s6 = smov 512   ;;  %s6496_s17 = smov 32  }
  0xbd   : > { %5707 = dma.hbm_to_vmem [thread:$0]  (!%p6658_p5), %s7193_s15, 32768, %s707_s22, [#allocation21], %s6495_s6, %s6495_s6, %s6496_s17  }
  0xbe   : > { %s50_s21 = sadd.s32 1, %s6470_s3  ;;  %s463_s0 = sadd.s32 1, %s6462_s26 }
  0xbf   : > { %p51_p6 = scmp.ge.s32.totalorder %s50_s21, 2  ;;  %p470_p4 = scmp.ne.s32.totalorder %s6462_s26, %s6458_s25 }
  0xc0   : > { %p471_p7 = scmp.eq.s32.totalorder %s6474_s28, 0  ;;  %p476_p9 = scmp.ne.s32.totalorder %s6458_s25, %s6454_s2 }
  0xc1   : > { %s7257_s21 = smov (%p51_p6, %s50_s21), 0  ;;  %p5725_p10 = scmp.lt.s32.totalorder %s6474_s28, 2 }
  0xc2   : > { %p6787_p8 = por %p471_p7, %p470_p4  ;;  %s460_s29 = ssub.s32 %s6470_s3, %s7257_s21 }
  0xc3   : > { %p461_p11 = scmp.eq.s32.totalorder %s460_s29, 0  ;;  %p7234_p12 = scmp.ne.s32.totalorder %s7222_s30, 0 }
  0xc4   : > { %s729_s22 = sand.u32 1, %s6462_s26   ;;  %s5078_s24 = sshll.u32 %s6470_s3, 6 }
  0xc5   : > { %p6798_p13 = por %p7234_p12, %p476_p9  ;;  %s5077_s18 = sshll.u32 %s729_s22, 9 }
  0xc6   : > { %s6805_s4 = scalar_select %p461_p11, %s6462_s26, %s463_s0  }
  0xc7   : > { %s740_s8 = scalar_lea.hbm %s7197_s19, %s5078_s24  ;;  %s733_s16 = scalar_lea.vmem [#allocation23], %s5077_s18 }
  0xc8   : > { %s741_s20 = sshll.u32 %s733_s16, 4  ;;  %p6812_p5 = pnand %p5725_p10, %p6787_p8  ;;  %s742_s20 = int_to_ptr.vmem [resolvable:$true] %s741_s20 }
  0xc9   : > { %s730_s29 = scalar_lea.sflag [#allocation24], %s729_s22  ;;  %s6381_s7 = scalar_lea.vmem %s742_s20, 8192 }
  0xca   : > { %p6370_p0 = pneg %p6812_p5  ;;  %p6382_p2 = scmp.ne.s32.totalorder %s742_s20, %s6381_s7 }
  0xcb   : > { %s6497_s0 = smov [#allocation23]  }
  0xcc   : > { %p6384_p3 = pnand %p6382_p2, %p6370_p0  ;;  %s6386_s9 = sshll.u32 %s6497_s0, 4  ;;  %s6387_s9 = int_to_ptr.vmem [resolvable:$false] %s6386_s9 }
  0xcd   : > { %s6388_s24 = scalar_lea.vmem %s6387_s9, 16384  ;;  %p6389_p6 = scmp.lt.s32.totalorder %s742_s20, %s6387_s9 }
  0xce   : > { %p6385_p1 = pneg %p6384_p3  ;;  %p6390_p4 = scmp.lt.s32.totalorder %s6388_s24, %s6381_s7 }
  0xd0   : > { %p6391_p7 = por %p6390_p4, %p6389_p6 }
  0xd2   : > { %p6392_p8 = pnand %p6391_p7, %p6385_p1 }
  0xd4   : > { %6395 = shalt.err (!%p6392_p8)
}
  0xd5   : > { %s7237_s1 = smov 4   ;;  %s7238_s18 = smov 64  }
  0xd6   : > { %s7239_s22 = smov 128   ;;  %p7240_p9 = scmp.ne.s32.totalorder %s7223_s5, 0 }
  0xd7   : > { %5711 = dma.hbm_to_vmem [thread:$0]  (!%p6812_p5), %s740_s8, 8192, %s742_s20, %s730_s29, %s7239_s22, %s7238_s18, %s7237_s1  }
  0xd8   : > { %763 = sbr.rel (%p7240_p9) target bundleno = 1709 (0x6ad), region = 104  ;;  %p7241_p10 = scmp.ne.s32.totalorder (!%p7240_p9), %s7222_s30, 0 }
  0xdd   : > { %6421 = dma.done.wait (%p7241_p10), [#allocation4], 128  }
  0xde   : > { %6423 = vsyncadd (%p7241_p10), [#allocation4], 4294967168 }
  0xdf   : > { %6425 = dma.done.wait (%p7241_p10), [#allocation6], 32  }
  0xe0   : > { %6427 = vsyncadd (%p7241_p10), [#allocation6], 4294967264 }
  0xe1   : > { %6429 = dma.done.wait (%p7241_p10), [#allocation9], 2064  }
  0xe2   : > { %6431 = vsyncadd (%p7241_p10), [#allocation9], 4294965232 }
  0xe3   : > { %6433 = dma.done.wait (%p7241_p10), [#allocation12], 64  }
  0xe4   : > { %6435 = vsyncadd (%p7241_p10), [#allocation12], 4294967232 }
  0xe5   : > { %6437 = dma.done.wait (%p7241_p10), [#allocation15], 8224  }
  0xe6   : > { %6439 = vsyncadd (%p7241_p10), [#allocation15], 4294959072 }
  0xe7   : > { %6441 = dma.done.wait (%p7241_p10), [#allocation18], 128  }
  0xe8   : > { %6443 = vsyncadd (%p7241_p10), [#allocation18], 4294967168 }
  0xe9   : > { %6445 = dma.done.wait (%p7241_p10), [#allocation21], 32832  }
  0xea   : > { %6447 = vsyncadd (%p7241_p10), [#allocation21], 4294934464  ;;  %s817_s7 = sand.u32 1, %s6458_s25  }
  0xeb   : > { %s5093_s9 = sshll.u32 %s817_s7, 9  ;;  %s818_s5 = scalar_lea.sflag [#allocation24], %s817_s7 }
  0xec   : > { %s6854_s20 = scalar_lea.vmem [#allocation23], %s5093_s9 }
  0xed   : > { %6449 = dma.done.wait (%p6798_p13), %s818_s5, 8192  }
  0xee   : > { %6451 = vsyncadd (%p6798_p13), %s818_s5, 4294959104  ;;  %p890_p11 = scmp.lt.s32.totalorder %s6466_s27, 1  ;;  %s7242_s8 = sld [smem:[#allocation46_spill]] }
  0xef   : > { %s7243_s24 = sld [smem:[#allocation47_spill]]  ;;  %p5095_p12 = scmp.ne.s32.totalorder %s6466_s27, 0 }
  0xf0   : > { %s6862_s6 = scalar_select %p890_p11, %s6466_s27, 1 }
  0xf1   : > { %907 = sbr.rel (%p5095_p12) target bundleno = 1427 (0x593), region = 164  ;;  %s7244_s22 = sld [smem:[#allocation36_spill]] (!%p5095_p12) }
  0xf2   : > { %s5094_s2 = sshll.u32 %s6862_s6, 3  ;;  %s7245_s17 = sld [smem:[#allocation34_spill]] (!%p5095_p12) }
  0xf3   : > { %s7248_s7 = sld [smem:[#allocation44_spill]] (!%p5095_p12) }
  0xf4   : > { %s892_s16 = scalar_lea.vmem %s7242_s8, %s6862_s6  ;;  %s7249_s30 = sld [smem:[#allocation45_spill]] (!%p5095_p12) }
  0xf5   : > { %s6872_s1 = scalar_lea.vmem %s7243_s24, %s5094_s2  ;;  %s7246_s2 = sld [smem:[#allocation33_spill]] (!%p5095_p12) }
  0xf6   : > { %v6498_v1 = vmov 0.0   ;;  %vm6499_vm0 = vmmov 0   ;;  %v5813_v3 = vld [vmem:[#allocation3] sm:$0x1f]   ;;  %vm981_vm1 = vcmask 1044480   ;;  %vm928_vm2 = vcmask 261120  }
  0xf7   : > { %v5811_v0 = vld [vmem:[%s7244_s22 + $0x8] sm:$0xff]   ;;  %5600 = vmatprep.subr.bf16.mxu0 %v6498_v1  ;;  %v5812_v2 = vld [vmem:[%s7244_s22] sm:$0xff]   ;;  %5604 = vmatprep.mubr.msk.bf16.mxu0 %vm6499_vm0, %v6498_v1  ;;  %v983_v5 = vsel %vm981_vm1, %v5813_v3, 0  ;;  %vm977_vm3 = vcmask 80896   ;;  %v5817_v9 = vld [vmem:[#allocation10 + $0x64] ss:$8 sps:$4 sm:$0xff]  }
  0xf8   : > { %5601 = vmatpush3.bf16.msra.mxu0 %v5811_v0  ;;  %v911_v4 = vld [vmem:[%s7245_s17] sm:$0xf]  ;;  %v5819_v10 = vld [vmem:[#allocation10 + $0x60] ss:$8 sps:$4 sm:$0xff]   ;;  %v5823_v13 = vld [vmem:[#allocation10 + $0x44] ss:$8 sps:$4 sm:$0xff]  }
  0xf9   : > { %5602 = vmatprep.subr.bf16.mxu0 %v6498_v1  ;;  %v5814_v7 = vld [vmem:[#allocation10 + $0x74] ss:$8 sps:$4 sm:$0xff]   ;;  %v5816_v8 = vld [vmem:[#allocation10 + $0x70] ss:$8 sps:$4 sm:$0xff]   ;;  %v5825_v14 = vld [vmem:[#allocation10 + $0x40] ss:$8 sps:$4 sm:$0xff]  }
  0xfa   : > { %1182 = vmatprep.subr.bf16.mxu1 %v5814_v7  ;;  %v5820_v11 = vld [vmem:[#allocation10 + $0x54] ss:$8 sps:$4 sm:$0xff]   ;;  %v5822_v12 = vld [vmem:[#allocation10 + $0x50] ss:$8 sps:$4 sm:$0xff]   ;;  %v5829_v17 = vld [vmem:[#allocation10 + $0x24] ss:$8 sps:$4 sm:$0xff]  }
  0xfb   : > { %v908_v6 = vld [vmem:[%s7246_s2] sm:$0xf]  ;;  %1183 = vmatpush1.bf16.msra.mxu1 %v5816_v8  ;;  %v5831_v18 = vld [vmem:[#allocation10 + $0x20] ss:$8 sps:$4 sm:$0xff]   ;;  %v5835_v21 = vld [vmem:[#allocation10 + $0x4] ss:$8 sps:$4 sm:$0xff]  }
  0xfc   : > { %5603 = vmatpush3.bf16.msra.mxu0 %v5812_v2  ;;  %1184 = vmatprep.subr.bf16.mxu1 %v5817_v9  ;;  %v5826_v15 = vld [vmem:[#allocation10 + $0x34] ss:$8 sps:$4 sm:$0xff]   ;;  %v5828_v16 = vld [vmem:[#allocation10 + $0x30] ss:$8 sps:$4 sm:$0xff]   ;;  %v6500_v22 = vmov 0   ;;  %s7247_s24 = sld [smem:[#allocation43_spill]] }
  0xfd   : > { %5608 = vmatprep.subr.bf16.mxu0 %v6498_v1  ;;  %v5832_v19 = vld [vmem:[#allocation10 + $0x14] ss:$8 sps:$4 sm:$0xff]   ;;  %v5834_v20 = vld [vmem:[#allocation10 + $0x10] ss:$8 sps:$4 sm:$0xff]   ;;  %1214 = vmatprep.mubr.bf16.mxu1 %v6500_v22  ;;  %v5837_v23 = vld [vmem:[#allocation10] ss:$8 sps:$4 sm:$0xff]  }
  0xfe   : > { %v5838_v24 = vld [vmem:[#allocation16 + $0xe0] ss:$16 sps:$4 sm:$0xff]   ;;  %v5840_v25 = vld [vmem:[#allocation16 + $0xe4] ss:$16 sps:$4 sm:$0xff]   ;;  %v5843_v26 = vld [vmem:[#allocation16 + $0xec] ss:$16 sps:$4 sm:$0xff]  }
  0xff   : > { %5605 = vmatmul.mubr.msk.bf16.vlgmr.msra.gmra.mxu0 %vm928_vm2, %v911_v4  ;;  %1185 = vmatpush1.bf16.msra.mxu1 %v5819_v10  ;;  %v5846_v27 = vld [vmem:[#allocation16 + $0xc4] ss:$16 sps:$4 sm:$0xff]   ;;  %v5844_v28 = vld [vmem:[#allocation16 + $0xc0] ss:$16 sps:$4 sm:$0xff]   ;;  %v5103_v2 = vld [vmem:[#allocation8] ss:$0 sm:$0xff] }
 0x100   : > { %5609 = vmatpush3.bf16.msra.mxu0 %v983_v5  ;;  %5610 = vmatprep.mubr.msk.bf16.mxu0 %vm6499_vm0, %v6498_v1  ;;  %v5852_v29 = vld [vmem:[#allocation16 + $0xa4] ss:$16 sps:$4 sm:$0xff]   ;;  %v5850_v30 = vld [vmem:[#allocation16 + $0xa0] ss:$16 sps:$4 sm:$0xff]   ;;  %v5841_v7 = vld [vmem:[#allocation16 + $0xe8] ss:$16 sps:$4 sm:$0xff]  }
 0x101   : > { %1186 = vmatprep.subr.bf16.mxu1 %v5820_v11  ;;  %1707 = vmatprep.subr.bf16.mxu0 %v5840_v25  ;;  %v5858_v31 = vld [vmem:[#allocation16 + $0x84] ss:$16 sps:$4 sm:$0xff]   ;;  %v5856_v32 = vld [vmem:[#allocation16 + $0x80] ss:$16 sps:$4 sm:$0xff]   ;;  %v5849_v9 = vld [vmem:[#allocation16 + $0xcc] ss:$16 sps:$4 sm:$0xff]  }
 0x102   : > { %v5101_v38 = vld [vmem:[#allocation5] ss:$0 sm:$0xff]  ;;  %v5102_v0 = vld [vmem:[#allocation7] ss:$0 sm:$0xff]  ;;  %v5847_v10 = vld [vmem:[#allocation16 + $0xc8] ss:$16 sps:$4 sm:$0xff]  }
 0x103   : > { %1187 = vmatpush1.bf16.msra.mxu1 %v5822_v12  ;;  %v5855_v11 = vld [vmem:[#allocation16 + $0xac] ss:$16 sps:$4 sm:$0xff]   ;;  %v5853_v12 = vld [vmem:[#allocation16 + $0xa8] ss:$16 sps:$4 sm:$0xff]   ;;  %v5874_v25 = vld [vmem:[#allocation16 + $0x20] ss:$16 sps:$4 sm:$0xff]  }
 0x104   : > { %1188 = vmatprep.subr.bf16.mxu1 %v5823_v13  ;;  %v5861_v13 = vld [vmem:[#allocation16 + $0x8c] ss:$16 sps:$4 sm:$0xff]   ;;  %v5871_v22 = vld [vmem:[#allocation16 + $0x48] ss:$16 sps:$4 sm:$0xff]  }
 0x107   : > { %5611 = vmatmul.mubr.msk.bf16.vlgmr.msra.gmra.mxu0 %vm977_vm3, %v908_v6  ;;  %1189 = vmatpush1.bf16.msra.mxu1 %v5825_v14  ;;  %v5859_v14 = vld [vmem:[#allocation16 + $0x88] ss:$16 sps:$4 sm:$0xff]  }
 0x108   : > { %1190 = vmatprep.subr.bf16.mxu1 %v5826_v15  ;;  %1708 = vmatpush1.bf16.msra.mxu0 %v5838_v24  ;;  %v5864_v15 = vld [vmem:[#allocation16 + $0x64] ss:$16 sps:$4 sm:$0xff]   ;;  %v5879_v24 = vld [vmem:[#allocation16 + $0x2c] ss:$16 sps:$4 sm:$0xff]  }
 0x109   : > { %1709 = vmatprep.subr.bf16.mxu0 %v5846_v27  ;;  %v5882_v27 = vld [vmem:[#allocation16 + $0x4] ss:$16 sps:$4 sm:$0xff]  }
 0x10b   : > { %1191 = vmatpush1.bf16.msra.mxu1 %v5828_v16  ;;  %v5867_v16 = vld [vmem:[#allocation16 + $0x6c] ss:$16 sps:$4 sm:$0xff]  }
 0x10c   : > { %1192 = vmatprep.subr.bf16.mxu1 %v5829_v17  ;;  %1710 = vmatpush1.bf16.msra.mxu0 %v5844_v28  ;;  %v5862_v17 = vld [vmem:[#allocation16 + $0x60] ss:$16 sps:$4 sm:$0xff]   ;;  %v5885_v28 = vld [vmem:[#allocation16 + $0xc] ss:$16 sps:$4 sm:$0xff]  }
 0x10d   : > { %1711 = vmatprep.subr.bf16.mxu0 %v5852_v29  ;;  %v5880_v29 = vld [vmem:[#allocation16] ss:$16 sps:$4 sm:$0xff]  }
 0x10f   : > { %1193 = vmatpush1.bf16.msra.mxu1 %v5831_v18  ;;  %v5865_v18 = vld [vmem:[#allocation16 + $0x68] ss:$16 sps:$4 sm:$0xff]  }
 0x110   : > { %1194 = vmatprep.subr.bf16.mxu1 %v5832_v19  ;;  %1712 = vmatpush1.bf16.msra.mxu0 %v5850_v30  ;;  %v5870_v19 = vld [vmem:[#allocation16 + $0x44] ss:$16 sps:$4 sm:$0xff]   ;;  %v5883_v30 = vld [vmem:[#allocation16 + $0x8] ss:$16 sps:$4 sm:$0xff]  }
 0x111   : > { %1713 = vmatprep.subr.bf16.mxu0 %v5858_v31  ;;  %v5888_v31 = vld [vmem:[#allocation16 + $0x1e4] ss:$16 sps:$4 sm:$0xff]  }
 0x113   : > { %1195 = vmatpush1.bf16.msra.mxu1 %v5834_v20  ;;  %v5873_v20 = vld [vmem:[#allocation16 + $0x4c] ss:$16 sps:$4 sm:$0xff]  }
 0x114   : > { %1196 = vmatprep.subr.bf16.mxu1 %v5835_v21  ;;  %1714 = vmatpush1.bf16.msra.mxu0 %v5856_v32  ;;  %v5868_v21 = vld [vmem:[#allocation16 + $0x40] ss:$16 sps:$4 sm:$0xff]   ;;  %v5891_v32 = vld [vmem:[#allocation16 + $0x1ec] ss:$16 sps:$4 sm:$0xff]  }
 0x115   : > { %1715 = vmatprep.subr.bf16.mxu0 %v5864_v15 }
 0x117   : > { %1197 = vmatpush1.bf16.msra.mxu1 %v5837_v23  ;;  %v5876_v23 = vld [vmem:[#allocation16 + $0x24] ss:$16 sps:$4 sm:$0xff]  }
 0x118   : > { %1748 = vmatprep.subr.bf16.mxu1 %v5843_v26  ;;  %1716 = vmatpush1.bf16.msra.mxu0 %v5862_v17  ;;  %v5877_v26 = vld [vmem:[#allocation16 + $0x28] ss:$16 sps:$4 sm:$0xff]  }
 0x119   : > { %1717 = vmatprep.subr.bf16.mxu0 %v5870_v19 }
 0x11c   : > { %1718 = vmatpush1.bf16.msra.mxu0 %v5868_v21 }
 0x11d   : > { %1719 = vmatprep.subr.bf16.mxu0 %v5876_v23 }
 0x120   : > { %1720 = vmatpush1.bf16.msra.mxu0 %v5874_v25 }
 0x121   : > { %1721 = vmatprep.subr.bf16.mxu0 %v5882_v27 }
 0x124   : > { %1722 = vmatpush1.bf16.msra.mxu0 %v5880_v29 }
 0x125   : > { %1723 = vmatprep.subr.bf16.mxu0 %v5888_v31 }
 0x1bf   : > { %v966_v33 = vpop.f32.mrf.mxu0 }
 0x1c1   : > { %v5606_v34 = vpop.f32.mrf.mxu0 }
 0x1c2   : > { %v5889_v34 = vld [vmem:[#allocation16 + $0x1e8] ss:$16 sps:$4 sm:$0xff]  }
 0x1c3   : > { %v969_v35 = vpop.f32.mrf.mxu0 }
 0x1c4   : > { %v5894_v35 = vld [vmem:[#allocation16 + $0x1c4] ss:$16 sps:$4 sm:$0xff]  }
 0x1c5   : > { %v5607_v36 = vpop.f32.mrf.mxu0 }
 0x1c6   : > { %v5897_v36 = vld [vmem:[#allocation16 + $0x1cc] ss:$16 sps:$4 sm:$0xff]  }
 0x1c7   : > { %v1019_v37 = vpop.f32.mrf.mxu0 }
 0x1c8   : > { %v1020_v39 = vadd.f32 %v1019_v37, %v966_v33  ;;  %v5886_v33 = vld [vmem:[#allocation16 + $0x1e0] ss:$16 sps:$4 sm:$0xff]  }
 0x1c9   : > { %v5612_v40 = vpop.f32.mrf.mxu0  ;;  %1724 = vmatpush2.bf16.msra.mxu0 %v5886_v33  ;;  %v5892_v37 = vld [vmem:[#allocation16 + $0x1c0] ss:$16 sps:$4 sm:$0xff]  }
 0x1ca   : > { %v1032_v41 = vadd.f32 %v5101_v38, %v1020_v39  ;;  %v5895_v38 = vld [vmem:[#allocation16 + $0x1c8] ss:$16 sps:$4 sm:$0xff]   ;;  %1725 = vmatprep.subr.bf16.mxu0 %v5894_v35  ;;  %v5900_v39 = vld [vmem:[#allocation16 + $0x1a4] ss:$16 sps:$4 sm:$0xff]   ;;  %v5903_v40 = vld [vmem:[#allocation16 + $0x1ac] ss:$16 sps:$4 sm:$0xff]  }
 0x1cb   : > { %v1022_v42 = vpop.f32.mrf.mxu0 }
 0x1cc   : > { %v1035_v43 = vrot.slane %v1032_v41, 4  ;;  %v1042_v44 = vmul.f32 %v1032_v41, %v1032_v41  ;;  %v5901_v42 = vld [vmem:[#allocation16 + $0x1a8] ss:$16 sps:$4 sm:$0xff]  }
 0x1cd   : > { %v5613_v45 = vpop.f32.mrf.mxu0  ;;  %1726 = vmatpush2.bf16.msra.mxu0 %v5892_v37 }
 0x1ce   : > { %v1036_v46 = vadd.f32 %v1035_v43, %v1032_v41  ;;  %v1043_v47 = vrot.slane %v1042_v44, 4  ;;  %1727 = vmatprep.subr.bf16.mxu0 %v5900_v39  ;;  %v5906_v43 = vld [vmem:[#allocation16 + $0x184] ss:$16 sps:$4 sm:$0xff]   ;;  %v5904_v45 = vld [vmem:[#allocation16 + $0x180] ss:$16 sps:$4 sm:$0xff]  }
 0x1d0   : > { %v1037_v48 = vrot.slane %v1036_v46, 2  ;;  %v1044_v49 = vadd.f32 %v1043_v47, %v1042_v44  ;;  %v5909_v44 = vld [vmem:[#allocation16 + $0x18c] ss:$16 sps:$4 sm:$0xff]   ;;  %v5912_v47 = vld [vmem:[#allocation16 + $0x164] ss:$16 sps:$4 sm:$0xff]  }
 0x1d2   : > { %v1038_v50 = vadd.f32 %v1037_v48, %v1036_v46  ;;  %v1045_v51 = vrot.slane %v1044_v49, 2  ;;  %v5907_v46 = vld [vmem:[#allocation16 + $0x188] ss:$16 sps:$4 sm:$0xff]   ;;  %v5915_v48 = vld [vmem:[#allocation16 + $0x16c] ss:$16 sps:$4 sm:$0xff]  }
 0x1d4   : > { %v1039_v52 = vrot.slane %v1038_v50, 1  ;;  %v1046_v53 = vadd.f32 %v1045_v51, %v1044_v49  ;;  %v5910_v49 = vld [vmem:[#allocation16 + $0x160] ss:$16 sps:$4 sm:$0xff]   ;;  %v5918_v51 = vld [vmem:[#allocation16 + $0x144] ss:$16 sps:$4 sm:$0xff]  }
 0x1d6   : > { %v1040_v54 = vadd.f32 %v1039_v52, %v1038_v50  ;;  %v1047_v55 = vrot.slane %v1046_v53, 1  ;;  %v5913_v50 = vld [vmem:[#allocation16 + $0x168] ss:$16 sps:$4 sm:$0xff]   ;;  %v5921_v52 = vld [vmem:[#allocation16 + $0x14c] ss:$16 sps:$4 sm:$0xff]  }
 0x1d8   : > { %v1041_v56 = vmul.f32 0.125, %v1040_v54  ;;  %v1048_v57 = vadd.f32 %v1047_v55, %v1046_v53  ;;  %v5916_v53 = vld [vmem:[#allocation16 + $0x140] ss:$16 sps:$4 sm:$0xff]   ;;  %v5919_v54 = vld [vmem:[#allocation16 + $0x148] ss:$16 sps:$4 sm:$0xff]  }
 0x1d9   : > { %v5924_v55 = vld [vmem:[#allocation16 + $0x124] ss:$16 sps:$4 sm:$0xff]  }
 0x1da   : > { %v1049_v58 = vmul.f32 0.125, %v1048_v57  ;;  %v1050_v59 = vmul.f32 %v1041_v56, %v1041_v56  ;;  %v1052_v62 = vsub.f32 %v1032_v41, %v1041_v56  ;;  %v5898_v41 = vld [vmem:[#allocation16 + $0x1a0] ss:$16 sps:$4 sm:$0xff]   ;;  %v5925_v57 = vld [vmem:[#allocation16 + $0x128] ss:$16 sps:$4 sm:$0xff]  }
 0x1db   : > { %1728 = vmatpush2.bf16.msra.mxu0 %v5898_v41  ;;  %v5922_v56 = vld [vmem:[#allocation16 + $0x120] ss:$16 sps:$4 sm:$0xff]  }
 0x1dc   : > { %v1051_v60 = vsub.f32 %v1049_v58, %v1050_v59  ;;  %1729 = vmatprep.subr.bf16.mxu0 %v5906_v43  ;;  %v5927_v58 = vld [vmem:[#allocation16 + $0x12c] ss:$16 sps:$4 sm:$0xff]   ;;  %v5930_v59 = vld [vmem:[#allocation16 + $0x104] ss:$16 sps:$4 sm:$0xff]  }
 0x1de   : > { %v1053_v61 = vadd.f32 0.8, %v1051_v60  ;;  %v5933_v60 = vld [vmem:[#allocation16 + $0x10c] ss:$16 sps:$4 sm:$0xff]  }
 0x1df   : > { %1730 = vmatpush2.bf16.msra.mxu0 %v5904_v45 }
 0x1e0   : > { %5934 = vrsqrt.f32 %v1053_v61  ;;  %1731 = vmatprep.subr.bf16.mxu0 %v5912_v47  ;;  %v5928_v61 = vld [vmem:[#allocation16 + $0x100] ss:$16 sps:$4 sm:$0xff]  }
 0x1e3   : > { %1732 = vmatpush2.bf16.msra.mxu0 %v5910_v49 }
 0x1e4   : > { %1733 = vmatprep.subr.bf16.mxu0 %v5918_v51 }
 0x1e7   : > { %1734 = vmatpush2.bf16.msra.mxu0 %v5916_v53 }
 0x1e8   : > { %1735 = vmatprep.subr.bf16.mxu0 %v5924_v55 }
 0x1eb   : > { %1736 = vmatpush2.bf16.msra.mxu0 %v5922_v56  ;;  %v1223_v56 = vld [vmem:[#allocation13] sm:$0x3] }
 0x1ec   : > { %1737 = vmatprep.subr.bf16.mxu0 %v5930_v59 }
 0x1ed   : > { %v5935_v63 = vpop.eup %5934 }
 0x1ee   : > { %v1055_v1 = vmul.f32 %v5935_v63, %v1052_v62  ;;  %v5931_v62 = vld [vmem:[#allocation16 + $0x108] ss:$16 sps:$4 sm:$0xff]   ;;  %v6887_v63 = vld [vmem:[#allocation22 + $0x1c0] sm:$0xff] }
 0x1ef   : > { %1738 = vmatpush2.bf16.msra.mxu0 %v5928_v61 }
 0x1f0   : > { %v1062_v3 = vmul.f32 %v5102_v0, %v1055_v1  ;;  %v6889_v0 = vld [vmem:[#allocation22 + $0x1e0] sm:$0xff] }
 0x1f1   : > { %v6891_v1 = vld [vmem:[#allocation22 + $0x5c0] sm:$0xff] }
 0x1f2   : > { %v1069_v4 = vadd.f32 %v5103_v2, %v1062_v3  ;;  %v5240_v2 = vcombine.low %v6887_v63, %v6889_v0  ;;  %v5241_v3 = vcombine.high %v6887_v63, %v6889_v0 }
 0x1f4   : > { %vm1070_vm4 = vcmp.gt.f32.partialorder %v1069_v4, 0.0  ;;  %v1071_v5 = vmul.f32 0.2, %v1069_v4  ;;  %3519 = vmatprep.subr.bf16.mxu0 %v5241_v3 }
 0x1f6   : > { %v1072_v6 = vsel %vm1070_vm4, %v1069_v4, %v1071_v5  ;;  %v6897_v4 = vld [vmem:[#allocation22 + $0x5e0] sm:$0xff] }
 0x1f7   : > { %v1073_v8 = vpack.c.bf16 %v1072_v6, %v1072_v6  ;;  %v5368_v5 = vcombine.low %v6891_v1, %v6897_v4  ;;  %v5369_v6 = vcombine.high %v6891_v1, %v6897_v4  ;;  %v1965_v4 = vld [vmem:[#allocation22 + $0xc0] sm:$0xff] }
 0x1f9   : > { %1215 = vmatmul.mubr.bf16.vlgmr.msra.gmra.mxu1 %v1073_v8 }
 0x1fa   : > { %1749 = vmatpush1.bf16.msra.mxu1 %v5841_v7  ;;  %v1092_v7 = vlaneseq }
 0x1fb   : > { %1750 = vmatprep.subr.bf16.mxu1 %v5849_v9 }
 0x1fc   : > { %v6903_v8 = vshrl.u32 %v1092_v7, 7 }
 0x1fe   : > { %1751 = vmatpush1.bf16.msra.mxu1 %v5847_v10  ;;  %v6906_v9 = vsub.s32 0, %v6903_v8  ;;  %v1090_v10 = vld [vmem:[#allocation11] sm:$0x3] }
 0x1ff   : > { %1752 = vmatprep.subr.bf16.mxu1 %v5855_v11  ;;  %v6909_v11 = vsub.s32 1, %v6903_v8 }
 0x200   : > { %v1271_v59 = vrot.slane %v1223_v56, %v6906_v9 }
 0x202   : > { %1753 = vmatpush1.bf16.msra.mxu1 %v5853_v12  ;;  %v1095_v12 = vrot.slane %v1090_v10, %v6906_v9 }
 0x203   : > { %1754 = vmatprep.subr.bf16.mxu1 %v5861_v13  ;;  %v1099_v13 = vrot.slane %v1090_v10, %v6909_v11 }
 0x206   : > { %1755 = vmatpush1.bf16.msra.mxu1 %v5859_v14 }
 0x207   : > { %1756 = vmatprep.subr.bf16.mxu1 %v5867_v16 }
 0x20a   : > { %1757 = vmatpush1.bf16.msra.mxu1 %v5865_v18 }
 0x20b   : > { %1758 = vmatprep.subr.bf16.mxu1 %v5873_v20 }
 0x20e   : > { %1759 = vmatpush1.bf16.msra.mxu1 %v5871_v22 }
 0x20f   : > { %1760 = vmatprep.subr.bf16.mxu1 %v5879_v24 }
 0x212   : > { %1761 = vmatpush1.bf16.msra.mxu1 %v5877_v26 }
 0x213   : > { %1762 = vmatprep.subr.bf16.mxu1 %v5885_v28 }
 0x216   : > { %1763 = vmatpush1.bf16.msra.mxu1 %v5883_v30 }
 0x217   : > { %1764 = vmatprep.subr.bf16.mxu1 %v5891_v32 }
 0x21a   : > { %1765 = vmatpush2.bf16.msra.mxu1 %v5889_v34 }
 0x21b   : > { %1766 = vmatprep.subr.bf16.mxu1 %v5897_v36 }
 0x21e   : > { %1767 = vmatpush2.bf16.msra.mxu1 %v5895_v38 }
 0x21f   : > { %1768 = vmatprep.subr.bf16.mxu1 %v5903_v40 }
 0x222   : > { %1769 = vmatpush2.bf16.msra.mxu1 %v5901_v42 }
 0x223   : > { %1770 = vmatprep.subr.bf16.mxu1 %v5909_v44 }
 0x226   : > { %1771 = vmatpush2.bf16.msra.mxu1 %v5907_v46 }
 0x227   : > { %1772 = vmatprep.subr.bf16.mxu1 %v5915_v48 }
 0x22a   : > { %1773 = vmatpush2.bf16.msra.mxu1 %v5913_v50 }
 0x22b   : > { %1774 = vmatprep.subr.bf16.mxu1 %v5921_v52 }
 0x22e   : > { %1775 = vmatpush2.bf16.msra.mxu1 %v5919_v54 }
 0x22f   : > { %1776 = vmatprep.subr.bf16.mxu1 %v5927_v58 }
 0x232   : > { %1777 = vmatpush2.bf16.msra.mxu1 %v5925_v57  ;;  %v1224_v57 = vld [vmem:[#allocation14] sm:$0x3] }
 0x233   : > { %1778 = vmatprep.subr.bf16.mxu1 %v5933_v60 }
 0x236   : > { %1779 = vmatpush2.bf16.msra.mxu1 %v5931_v62  ;;  %v1284_v62 = vrot.slane %v1224_v57, %v6906_v9 }
 0x237   : > { %3560 = vmatprep.subr.bf16.mxu1 %v5369_v6  ;;  %v1275_v6 = vrot.slane %v1223_v56, %v6909_v11 }
 0x2b9   : > { %v1216_v14 = vpop.f32.mrf.mxu1 }
 0x2ba   : > { %v1217_v15 = vadd.f32 %v1216_v14, %v1095_v12 }
 0x2bb   : > { %v1218_v16 = vpop.f32.mrf.mxu1 }
 0x2bc   : > { %v1225_v17 = vrot.slane %v1217_v15, 4  ;;  %v1239_v18 = vmul.f32 %v1217_v15, %v1217_v15  ;;  %v1219_v19 = vadd.f32 %v1218_v16, %v1099_v13  ;;  %v1288_v13 = vrot.slane %v1224_v57, %v6909_v11  ;;  %v1949_v57 = vld [vmem:[#allocation22 + $0x40] sm:$0xff] }
 0x2bd   : > { %v1220_v20 = vpop.f32.mrf.mxu1 }
 0x2be   : > { %v1226_v21 = vadd.f32 %v1225_v17, %v1217_v15  ;;  %v1241_v22 = vrot.slane %v1239_v18, 4  ;;  %v1231_v23 = vrot.slane %v1219_v19, 4  ;;  %v1240_v24 = vmul.f32 %v1219_v19, %v1219_v19  ;;  %v1989_v20 = vld [vmem:[#allocation22 + $0x180] sm:$0xff] }
 0x2bf   : > { %v1221_v25 = vpop.f32.mrf.mxu1 }
 0x2c0   : > { %v1227_v26 = vrot.slane %v1226_v21, 2  ;;  %v1242_v27 = vadd.f32 %v1241_v22, %v1239_v18  ;;  %v1232_v28 = vadd.f32 %v1231_v23, %v1219_v19  ;;  %v1247_v29 = vrot.slane %v1240_v24, 4  ;;  %v1993_v22 = vld [vmem:[#allocation22 + $0x1a0] sm:$0xff] }
 0x2c1   : > { %v2117_v23 = vld [vmem:[#allocation22 + $0x580] sm:$0xff] }
 0x2c2   : > { %v1228_v30 = vadd.f32 %v1227_v26, %v1226_v21  ;;  %v1243_v31 = vrot.slane %v1242_v27, 2  ;;  %v1233_v32 = vrot.slane %v1232_v28, 2  ;;  %v1248_v33 = vadd.f32 %v1247_v29, %v1240_v24  ;;  %v2121_v24 = vld [vmem:[#allocation22 + $0x5a0] sm:$0xff] }
 0x2c3   : > { %v1981_v29 = vld [vmem:[#allocation22 + $0x140] sm:$0xff] }
 0x2c4   : > { %v1229_v34 = vrot.slane %v1228_v30, 1  ;;  %v1244_v35 = vadd.f32 %v1243_v31, %v1242_v27  ;;  %v1234_v36 = vadd.f32 %v1233_v32, %v1232_v28  ;;  %v1249_v37 = vrot.slane %v1248_v33, 2  ;;  %v2109_v31 = vld [vmem:[#allocation22 + $0x540] sm:$0xff] }
 0x2c5   : > { %v5233_v27 = vcombine.high %v1989_v20, %v1993_v22  ;;  %v5361_v28 = vcombine.high %v2117_v23, %v2121_v24  ;;  %v2113_v32 = vld [vmem:[#allocation22 + $0x560] sm:$0xff] }
 0x2c6   : > { %v1230_v38 = vadd.f32 %v1229_v34, %v1228_v30  ;;  %v1245_v39 = vrot.slane %v1244_v35, 1  ;;  %v1235_v40 = vrot.slane %v1234_v36, 1  ;;  %v1250_v41 = vadd.f32 %v1249_v37, %v1248_v33  ;;  %v1985_v30 = vld [vmem:[#allocation22 + $0x160] sm:$0xff] }
 0x2c7   : > { %v5232_v33 = vcombine.low %v1989_v20, %v1993_v22  ;;  %v5360_v34 = vcombine.low %v2117_v23, %v2121_v24  ;;  %v1973_v37 = vld [vmem:[#allocation22 + $0x100] sm:$0xff] }
 0x2c8   : > { %v1237_v42 = vmul.f32 0.125, %v1230_v38  ;;  %v1246_v43 = vadd.f32 %v1245_v39, %v1244_v35  ;;  %v1236_v44 = vadd.f32 %v1235_v40, %v1234_v36  ;;  %v1251_v45 = vrot.slane %v1250_v41, 1  ;;  %v1977_v38 = vld [vmem:[#allocation22 + $0x120] sm:$0xff] }
 0x2c9   : > { %v5225_v35 = vcombine.high %v1981_v29, %v1985_v30  ;;  %v5353_v36 = vcombine.high %v2109_v31, %v2113_v32  ;;  %v2101_v39 = vld [vmem:[#allocation22 + $0x500] sm:$0xff]  ;;  %v5217_v63 = vcombine.high %v1973_v37, %v1977_v38  ;;  %v5216_v1 = vcombine.low %v1973_v37, %v1977_v38 }
 0x2ca   : > { %v1253_v46 = vmul.f32 0.125, %v1246_v43  ;;  %v1255_v47 = vmul.f32 %v1237_v42, %v1237_v42  ;;  %v1238_v48 = vmul.f32 0.125, %v1236_v44  ;;  %v1252_v49 = vadd.f32 %v1251_v45, %v1250_v41  ;;  %v2105_v40 = vld [vmem:[#allocation22 + $0x520] sm:$0xff] }
 0x2cb   : > { %v1259_v58 = vsub.f32 %v1217_v15, %v1237_v42  ;;  %v5224_v41 = vcombine.low %v1981_v29, %v1985_v30  ;;  %v5352_v42 = vcombine.low %v2109_v31, %v2113_v32  ;;  %v5345_v0 = vcombine.high %v2101_v39, %v2105_v40  ;;  %v2093_v44 = vld [vmem:[#allocation22 + $0x4c0] sm:$0xff] }
 0x2cc   : > { %v1257_v50 = vsub.f32 %v1253_v46, %v1255_v47  ;;  %v1256_v51 = vmul.f32 %v1238_v48, %v1238_v48  ;;  %v1254_v52 = vmul.f32 0.125, %v1252_v49  ;;  %v1260_v3 = vsub.f32 %v1219_v19, %v1238_v48  ;;  %v2097_v45 = vld [vmem:[#allocation22 + $0x4e0] sm:$0xff] }
 0x2cd   : > { %v5336_v47 = vcombine.low %v2093_v44, %v2097_v45  ;;  %v5337_v48 = vcombine.high %v2093_v44, %v2097_v45  ;;  %v1957_v49 = vld [vmem:[#allocation22 + $0x80] sm:$0xff] }
 0x2ce   : > { %v1261_v53 = vadd.f32 0.8, %v1257_v50  ;;  %v1258_v54 = vsub.f32 %v1254_v52, %v1256_v51  ;;  %v1961_v50 = vld [vmem:[#allocation22 + $0xa0] sm:$0xff] }
 0x2cf   : > { %v2085_v51 = vld [vmem:[#allocation22 + $0x480] sm:$0xff]  ;;  %v5201_v52 = vcombine.high %v1957_v49, %v1961_v50 }
 0x2d0   : > { %5936 = vrsqrt.f32 %v1261_v53  ;;  %v1262_v55 = vadd.f32 0.8, %v1258_v54  ;;  %v2089_v53 = vld [vmem:[#allocation22 + $0x4a0] sm:$0xff]  ;;  %v5200_v54 = vcombine.low %v1957_v49, %v1961_v50 }
 0x2d1   : > { %v5329_v56 = vcombine.high %v2085_v51, %v2089_v53  ;;  %v2065_v20 = vld [vmem:[#allocation22 + $0x3e0] sm:$0xff] }
 0x2d2   : > { %5938 = vrsqrt.f32 %v1262_v55  ;;  %v5328_v55 = vcombine.low %v2085_v51, %v2089_v53  ;;  %v2193_v23 = vld [vmem:[#allocation22 + $0x7e0] sm:$0xff] }
 0x2d3   : > { %v2185_v30 = vld [vmem:[#allocation22 + $0x7a0] sm:$0xff] }
 0x2d4   : > { %v2177_v38 = vld [vmem:[#allocation22 + $0x760] sm:$0xff] }
 0x2d5   : > { %v2029_v44 = vld [vmem:[#allocation22 + $0x2c0] sm:$0xff] }
 0x2d6   : > { %v2033_v45 = vld [vmem:[#allocation22 + $0x2e0] sm:$0xff] }
 0x2d7   : > { %v5272_v49 = vcombine.low %v2029_v44, %v2033_v45  ;;  %v2025_v53 = vld [vmem:[#allocation22 + $0x2a0] sm:$0xff] }
 0x2dd   : > { %v5937_v60 = vpop.eup %5936 }
 0x2de   : > { %v1265_v61 = vmul.f32 %v5937_v60, %v1259_v58  ;;  %v1953_v58 = vld [vmem:[#allocation22 + $0x60] sm:$0xff] }
 0x2df   : > { %v5939_v7 = vpop.eup %5938  ;;  %v5193_v60 = vcombine.high %v1949_v57, %v1953_v58 }
 0x2e0   : > { %v1278_v10 = vmul.f32 %v1271_v59, %v1265_v61  ;;  %v1266_v12 = vmul.f32 %v5939_v7, %v1260_v3  ;;  %v2077_v59 = vld [vmem:[#allocation22 + $0x440] sm:$0xff] }
 0x2e1   : > { %v2081_v61 = vld [vmem:[#allocation22 + $0x460] sm:$0xff] }
 0x2e2   : > { %v1291_v14 = vadd.f32 %v1284_v62, %v1278_v10  ;;  %v1279_v16 = vmul.f32 %v1275_v6, %v1266_v12  ;;  %v5192_v62 = vcombine.low %v1949_v57, %v1953_v58  ;;  %v5320_v3 = vcombine.low %v2077_v59, %v2081_v61  ;;  %v1941_v7 = vld [vmem:[#allocation22] sm:$0xff] }
 0x2e3   : > { %v5321_v6 = vcombine.high %v2077_v59, %v2081_v61  ;;  %v1945_v10 = vld [vmem:[#allocation22 + $0x20] sm:$0xff] }
 0x2e4   : > { %v1295_v17 = vmul.f32 0.2, %v1291_v14  ;;  %v1292_v18 = vadd.f32 %v1288_v13, %v1279_v16  ;;  %vm1293_vm5 = vcmp.gt.f32.partialorder %v1291_v14, 0.0  ;;  %v2069_v12 = vld [vmem:[#allocation22 + $0x400] sm:$0xff]  ;;  %v5185_v13 = vcombine.high %v1941_v7, %v1945_v10 }
 0x2e5   : > { %v5184_v16 = vcombine.low %v1941_v7, %v1945_v10  ;;  %v2017_v61 = vld [vmem:[#allocation22 + $0x260] sm:$0xff] }
 0x2e6   : > { %vm1294_vm6 = vcmp.gt.f32.partialorder %v1292_v18, 0.0  ;;  %v1296_v15 = vmul.f32 0.2, %v1292_v18  ;;  %v1297_v21 = vsel %vm1293_vm5, %v1291_v14, %v1295_v17  ;;  %v2073_v14 = vld [vmem:[#allocation22 + $0x420] sm:$0xff] }
 0x2e7   : > { %v1299_v26 = vpack.c.bf16 %v1297_v21, %v1297_v21  ;;  %v5312_v17 = vcombine.low %v2069_v12, %v2073_v14  ;;  %v2189_v21 = vld [vmem:[#allocation22 + $0x7c0] sm:$0xff] }
 0x2e8   : > { %v1298_v19 = vsel %vm1294_vm6, %v1292_v18, %v1296_v15  ;;  %v5313_v18 = vcombine.high %v2069_v12, %v2073_v14  ;;  %v2061_v15 = vld [vmem:[#allocation22 + $0x3c0] sm:$0xff] }
 0x2e9   : > { %v1300_v25 = vpack.c.bf16 %v1298_v19, %v1298_v19  ;;  %v5305_v22 = vcombine.high %v2061_v15, %v2065_v20  ;;  %v5304_v24 = vcombine.low %v2061_v15, %v2065_v20  ;;  %v5432_v19 = vcombine.low %v2189_v21, %v2193_v23  ;;  %v2009_v14 = vld [vmem:[#allocation22 + $0x220] sm:$0xff] }
 0x2eb   : > { %1739 = vmatprep.mubr.bf16.mxu0 %v1300_v25  ;;  %1780 = vmatprep.mubr.bf16.mxu1 %v1300_v25  ;;  %v5433_v25 = vcombine.high %v2189_v21, %v2193_v23  ;;  %v6925_v23 = vld [vmem:[#allocation22 + $0x1e8] sm:$0xff] }
 0x2ec   : > { %1740 = vmatmul.mubr.bf16.vlgmr.msra.gmra.mxu0 %v1299_v26  ;;  %1781 = vmatmul.mubr.bf16.vlgmr.msra.gmra.mxu1 %v1299_v26  ;;  %v2053_v26 = vld [vmem:[#allocation22 + $0x380] sm:$0xff] }
 0x2ed   : > { %3520 = vmatpush1.bf16.msra.mxu0 %v5240_v2  ;;  %3561 = vmatpush1.bf16.msra.mxu1 %v5368_v5  ;;  %v5344_v2 = vcombine.low %v2101_v39, %v2105_v40  ;;  %v1969_v5 = vld [vmem:[#allocation22 + $0xe0] sm:$0xff] }
 0x2ee   : > { %3521 = vmatprep.subr.bf16.mxu0 %v5233_v27  ;;  %3562 = vmatprep.subr.bf16.mxu1 %v5361_v28  ;;  %v5209_v43 = vcombine.high %v1965_v4, %v1969_v5  ;;  %v5208_v46 = vcombine.low %v1965_v4, %v1969_v5  ;;  %v2057_v27 = vld [vmem:[#allocation22 + $0x3a0] sm:$0xff] }
 0x2ef   : > { %v2181_v28 = vld [vmem:[#allocation22 + $0x780] sm:$0xff]  ;;  %v5297_v29 = vcombine.high %v2053_v26, %v2057_v27  ;;  %v5296_v31 = vcombine.low %v2053_v26, %v2057_v27 }
 0x2f0   : > { %v5424_v32 = vcombine.low %v2181_v28, %v2185_v30 }
 0x2f1   : > { %3522 = vmatpush1.bf16.msra.mxu0 %v5232_v33  ;;  %3563 = vmatpush1.bf16.msra.mxu1 %v5360_v34  ;;  %v5425_v33 = vcombine.high %v2181_v28, %v2185_v30  ;;  %v2045_v34 = vld [vmem:[#allocation22 + $0x340] sm:$0xff]  ;;  %v1365_v30 = vld [vmem:[#allocation17] sm:$0xf] }
 0x2f2   : > { %3523 = vmatprep.subr.bf16.mxu0 %v5225_v35  ;;  %3564 = vmatprep.subr.bf16.mxu1 %v5353_v36  ;;  %v2049_v35 = vld [vmem:[#allocation22 + $0x360] sm:$0xff] }
 0x2f3   : > { %v2173_v36 = vld [vmem:[#allocation22 + $0x740] sm:$0xff]  ;;  %v5289_v37 = vcombine.high %v2045_v34, %v2049_v35  ;;  %v5288_v39 = vcombine.low %v2045_v34, %v2049_v35 }
 0x2f4   : > { %v5416_v40 = vcombine.low %v2173_v36, %v2177_v38 }
 0x2f5   : > { %3524 = vmatpush1.bf16.msra.mxu0 %v5224_v41  ;;  %3565 = vmatpush1.bf16.msra.mxu1 %v5352_v42  ;;  %v5417_v41 = vcombine.high %v2173_v36, %v2177_v38  ;;  %v2037_v42 = vld [vmem:[#allocation22 + $0x300] sm:$0xff]  ;;  %v1374_v36 = vrot.slane %v1365_v30, %v6909_v11 }
 0x2f6   : > { %3525 = vmatprep.subr.bf16.mxu0 %v5217_v63  ;;  %3566 = vmatprep.subr.bf16.mxu1 %v5345_v0  ;;  %v2041_v63 = vld [vmem:[#allocation22 + $0x320] sm:$0xff] }
 0x2f7   : > { %v2165_v0 = vld [vmem:[#allocation22 + $0x700] sm:$0xff]  ;;  %v5280_v4 = vcombine.low %v2037_v42, %v2041_v63 }
 0x2f9   : > { %3526 = vmatpush1.bf16.msra.mxu0 %v5216_v1  ;;  %3567 = vmatpush1.bf16.msra.mxu1 %v5344_v2  ;;  %v5281_v1 = vcombine.high %v2037_v42, %v2041_v63  ;;  %v2169_v2 = vld [vmem:[#allocation22 + $0x720] sm:$0xff] }
 0x2fa   : > { %3527 = vmatprep.subr.bf16.mxu0 %v5209_v43  ;;  %3568 = vmatprep.subr.bf16.mxu1 %v5337_v48  ;;  %v5408_v5 = vcombine.low %v2165_v0, %v2169_v2  ;;  %v5409_v43 = vcombine.high %v2165_v0, %v2169_v2  ;;  %v2161_v48 = vld [vmem:[#allocation22 + $0x6e0] sm:$0xff] }
 0x2fd   : > { %3528 = vmatpush1.bf16.msra.mxu0 %v5208_v46  ;;  %3569 = vmatpush1.bf16.msra.mxu1 %v5336_v47  ;;  %v2157_v46 = vld [vmem:[#allocation22 + $0x6c0] sm:$0xff]  ;;  %v5273_v47 = vcombine.high %v2029_v44, %v2033_v45 }
 0x2fe   : > { %3529 = vmatprep.subr.bf16.mxu0 %v5201_v52  ;;  %3570 = vmatprep.subr.bf16.mxu1 %v5329_v56  ;;  %v5400_v50 = vcombine.low %v2157_v46, %v2161_v48  ;;  %v5401_v51 = vcombine.high %v2157_v46, %v2161_v48  ;;  %v2021_v52 = vld [vmem:[#allocation22 + $0x280] sm:$0xff] }
 0x2ff   : > { %v2153_v56 = vld [vmem:[#allocation22 + $0x6a0] sm:$0xff]  ;;  %v5264_v57 = vcombine.low %v2021_v52, %v2025_v53 }
 0x301   : > { %3530 = vmatpush1.bf16.msra.mxu0 %v5200_v54  ;;  %3571 = vmatpush1.bf16.msra.mxu1 %v5328_v55  ;;  %v2149_v54 = vld [vmem:[#allocation22 + $0x680] sm:$0xff]  ;;  %v5265_v55 = vcombine.high %v2021_v52, %v2025_v53 }
 0x302   : > { %3531 = vmatprep.subr.bf16.mxu0 %v5193_v60  ;;  %3572 = vmatprep.subr.bf16.mxu1 %v5321_v6  ;;  %v5392_v58 = vcombine.low %v2149_v54, %v2153_v56  ;;  %v5393_v59 = vcombine.high %v2149_v54, %v2153_v56  ;;  %v2013_v60 = vld [vmem:[#allocation22 + $0x240] sm:$0xff] }
 0x303   : > { %v2145_v6 = vld [vmem:[#allocation22 + $0x660] sm:$0xff]  ;;  %v5256_v7 = vcombine.low %v2013_v60, %v2017_v61 }
 0x305   : > { %3532 = vmatpush1.bf16.msra.mxu0 %v5192_v62  ;;  %3573 = vmatpush1.bf16.msra.mxu1 %v5320_v3  ;;  %v2141_v62 = vld [vmem:[#allocation22 + $0x640] sm:$0xff]  ;;  %v5257_v3 = vcombine.high %v2013_v60, %v2017_v61 }
 0x306   : > { %3533 = vmatprep.subr.bf16.mxu0 %v5185_v13  ;;  %3574 = vmatprep.subr.bf16.mxu1 %v5313_v18  ;;  %v5384_v10 = vcombine.low %v2141_v62, %v2145_v6  ;;  %v5385_v12 = vcombine.high %v2141_v62, %v2145_v6  ;;  %v2005_v13 = vld [vmem:[#allocation22 + $0x200] sm:$0xff] }
 0x307   : > { %v2137_v18 = vld [vmem:[#allocation22 + $0x620] sm:$0xff]  ;;  %v5248_v15 = vcombine.low %v2005_v13, %v2009_v14 }
 0x309   : > { %3534 = vmatpush1.bf16.msra.mxu0 %v5184_v16  ;;  %3575 = vmatpush1.bf16.msra.mxu1 %v5312_v17  ;;  %v2133_v16 = vld [vmem:[#allocation22 + $0x600] sm:$0xff]  ;;  %v5249_v17 = vcombine.high %v2005_v13, %v2009_v14 }
 0x30a   : > { %3535 = vmatprep.subr.bf16.mxu0 %v5305_v22  ;;  %3576 = vmatprep.subr.bf16.mxu1 %v5433_v25  ;;  %v5377_v20 = vcombine.high %v2133_v16, %v2137_v18  ;;  %v5376_v21 = vcombine.low %v2133_v16, %v2137_v18  ;;  %v6923_v22 = vld [vmem:[#allocation22 + $0x1c8] sm:$0xff] }
 0x30b   : > { %v6931_v25 = vld [vmem:[#allocation22 + $0x5e8] sm:$0xff]  ;;  %v5242_v26 = vcombine.low %v6923_v22, %v6925_v23 }
 0x30d   : > { %3536 = vmatpush2.bf16.msra.mxu0 %v5304_v24  ;;  %3577 = vmatpush2.bf16.msra.mxu1 %v5432_v19  ;;  %v6927_v24 = vld [vmem:[#allocation22 + $0x5c8] sm:$0xff]  ;;  %v5243_v19 = vcombine.high %v6923_v22, %v6925_v23 }
 0x30e   : > { %3537 = vmatprep.subr.bf16.mxu0 %v5297_v29  ;;  %3578 = vmatprep.subr.bf16.mxu1 %v5425_v33  ;;  %v5370_v27 = vcombine.low %v6927_v24, %v6931_v25  ;;  %v5371_v28 = vcombine.high %v6927_v24, %v6931_v25  ;;  %v6940_v29 = vsub.s32 2, %v6903_v8 }
 0x310   : > { %v1378_v33 = vrot.slane %v1365_v30, %v6940_v29 }
 0x311   : > { %3538 = vmatpush2.bf16.msra.mxu0 %v5296_v31  ;;  %3579 = vmatpush2.bf16.msra.mxu1 %v5424_v32  ;;  %v6943_v31 = vsub.s32 3, %v6903_v8  ;;  %v1370_v32 = vrot.slane %v1365_v30, %v6906_v9 }
 0x312   : > { %3539 = vmatprep.subr.bf16.mxu0 %v5289_v37  ;;  %3580 = vmatprep.subr.bf16.mxu1 %v5417_v41 }
 0x313   : > { %v1382_v37 = vrot.slane %v1365_v30, %v6943_v31 }
 0x315   : > { %3540 = vmatpush2.bf16.msra.mxu0 %v5288_v39  ;;  %3581 = vmatpush2.bf16.msra.mxu1 %v5416_v40 }
 0x316   : > { %3541 = vmatprep.subr.bf16.mxu0 %v5281_v1  ;;  %3582 = vmatprep.subr.bf16.mxu1 %v5409_v43 }
 0x319   : > { %3542 = vmatpush2.bf16.msra.mxu0 %v5280_v4  ;;  %3583 = vmatpush2.bf16.msra.mxu1 %v5408_v5 }
 0x31a   : > { %3543 = vmatprep.subr.bf16.mxu0 %v5273_v47  ;;  %3584 = vmatprep.subr.bf16.mxu1 %v5401_v51 }
 0x31d   : > { %3544 = vmatpush2.bf16.msra.mxu0 %v5272_v49  ;;  %3585 = vmatpush2.bf16.msra.mxu1 %v5400_v50 }
 0x31e   : > { %3545 = vmatprep.subr.bf16.mxu0 %v5265_v55  ;;  %3586 = vmatprep.subr.bf16.mxu1 %v5393_v59 }
 0x321   : > { %3546 = vmatpush2.bf16.msra.mxu0 %v5264_v57  ;;  %3587 = vmatpush2.bf16.msra.mxu1 %v5392_v58 }
 0x322   : > { %3547 = vmatprep.subr.bf16.mxu0 %v5257_v3  ;;  %3588 = vmatprep.subr.bf16.mxu1 %v5385_v12 }
 0x325   : > { %3548 = vmatpush2.bf16.msra.mxu0 %v5256_v7  ;;  %3589 = vmatpush2.bf16.msra.mxu1 %v5384_v10 }
 0x326   : > { %3549 = vmatprep.subr.bf16.mxu0 %v5249_v17  ;;  %3590 = vmatprep.subr.bf16.mxu1 %v5377_v20 }
 0x329   : > { %3550 = vmatpush2.bf16.msra.mxu0 %v5248_v15  ;;  %3591 = vmatpush2.bf16.msra.mxu1 %v5376_v21 }
 0x32a   : > { %3601 = vmatprep.subr.bf16.mxu0 %v5243_v19  ;;  %3642 = vmatprep.subr.bf16.mxu1 %v5371_v28 }
 0x3ac   : > { %v1741_v34 = vpop.f32.mrf.mxu0  ;;  %v1782_v35 = vpop.f32.mrf.mxu1 }
 0x3ad   : > { %v6949_v38 = vadd.f32 %v1741_v34, %v1370_v32  ;;  %v6951_v39 = vadd.f32 %v1782_v35, %v1378_v33 }
 0x3ae   : > { %v1743_v40 = vpop.f32.mrf.mxu0  ;;  %v1784_v41 = vpop.f32.mrf.mxu1 }
 0x3af   : > { %v1791_v42 = vrot.slane %v6949_v38, 4  ;;  %v1819_v63 = vmul.f32 %v6949_v38, %v6949_v38  ;;  %v1803_v0 = vrot.slane %v6951_v39, 4  ;;  %v1821_v1 = vmul.f32 %v6951_v39, %v6951_v39 }
 0x3b0   : > { %v6959_v2 = vadd.f32 %v1743_v40, %v1374_v36  ;;  %v6961_v4 = vadd.f32 %v1784_v41, %v1382_v37  ;;  %v1745_v5 = vpop.f32.mrf.mxu0  ;;  %v1786_v43 = vpop.f32.mrf.mxu1 }
 0x3b1   : > { %v1792_v44 = vadd.f32 %v1791_v42, %v6949_v38  ;;  %v1823_v45 = vrot.slane %v1819_v63, 4  ;;  %v1804_v46 = vadd.f32 %v1803_v0, %v6951_v39  ;;  %v1835_v47 = vrot.slane %v1821_v1, 4 }
 0x3b2   : > { %v1797_v48 = vrot.slane %v6959_v2, 4  ;;  %v1820_v49 = vmul.f32 %v6959_v2, %v6959_v2  ;;  %v1809_v50 = vrot.slane %v6961_v4, 4  ;;  %v1822_v51 = vmul.f32 %v6961_v4, %v6961_v4  ;;  %v1746_v52 = vpop.f32.mrf.mxu0  ;;  %v1787_v53 = vpop.f32.mrf.mxu1 }
 0x3b3   : > { %v1793_v54 = vrot.slane %v1792_v44, 2  ;;  %v1824_v55 = vadd.f32 %v1823_v45, %v1819_v63  ;;  %v1805_v56 = vrot.slane %v1804_v46, 2  ;;  %v1836_v57 = vadd.f32 %v1835_v47, %v1821_v1 }
 0x3b4   : > { %v1798_v58 = vadd.f32 %v1797_v48, %v6959_v2  ;;  %v1829_v59 = vrot.slane %v1820_v49, 4  ;;  %v1810_v60 = vadd.f32 %v1809_v50, %v6961_v4  ;;  %v1841_v61 = vrot.slane %v1822_v51, 4 }
 0x3b5   : > { %v1794_v62 = vadd.f32 %v1793_v54, %v1792_v44  ;;  %v1825_v3 = vrot.slane %v1824_v55, 2  ;;  %v1806_v6 = vadd.f32 %v1805_v56, %v1804_v46  ;;  %v1837_v7 = vrot.slane %v1836_v57, 2 }
 0x3b6   : > { %v1799_v10 = vrot.slane %v1798_v58, 2  ;;  %v1830_v12 = vadd.f32 %v1829_v59, %v1820_v49  ;;  %v1811_v13 = vrot.slane %v1810_v60, 2  ;;  %v1842_v14 = vadd.f32 %v1841_v61, %v1822_v51 }
 0x3b7   : > { %v1795_v16 = vrot.slane %v1794_v62, 1  ;;  %v1826_v17 = vadd.f32 %v1825_v3, %v1824_v55  ;;  %v1807_v18 = vrot.slane %v1806_v6, 1  ;;  %v1838_v15 = vadd.f32 %v1837_v7, %v1836_v57  ;;  %v1789_v7 = vld [vmem:[#allocation19] sm:$0xf] }
 0x3b8   : > { %v1800_v20 = vadd.f32 %v1799_v10, %v1798_v58  ;;  %v1831_v21 = vrot.slane %v1830_v12, 2  ;;  %v1812_v19 = vadd.f32 %v1811_v13, %v1810_v60  ;;  %v1843_v28 = vrot.slane %v1842_v14, 2  ;;  %v1790_v10 = vld [vmem:[#allocation20] sm:$0xf] }
 0x3b9   : > { %v1796_v30 = vadd.f32 %v1795_v16, %v1794_v62  ;;  %v1827_v32 = vrot.slane %v1826_v17, 1  ;;  %v1808_v33 = vadd.f32 %v1807_v18, %v1806_v6  ;;  %v1839_v34 = vrot.slane %v1838_v15, 1 }
 0x3ba   : > { %v1801_v35 = vrot.slane %v1800_v20, 1  ;;  %v1832_v36 = vadd.f32 %v1831_v21, %v1830_v12  ;;  %v1813_v37 = vrot.slane %v1812_v19, 1  ;;  %v1844_v40 = vadd.f32 %v1843_v28, %v1842_v14 }
 0x3bb   : > { %v1815_v41 = vmul.f32 0.125, %v1796_v30  ;;  %v1828_v42 = vadd.f32 %v1827_v32, %v1826_v17  ;;  %v1817_v63 = vmul.f32 0.125, %v1808_v33  ;;  %v1840_v0 = vadd.f32 %v1839_v34, %v1838_v15 }
 0x3bc   : > { %v1802_v1 = vadd.f32 %v1801_v35, %v1800_v20  ;;  %v1833_v5 = vrot.slane %v1832_v36, 1  ;;  %v1814_v43 = vadd.f32 %v1813_v37, %v1812_v19  ;;  %v1845_v44 = vrot.slane %v1844_v40, 1 }
 0x3bd   : > { %v1847_v45 = vmul.f32 0.125, %v1828_v42  ;;  %v1851_v46 = vmul.f32 %v1815_v41, %v1815_v41  ;;  %v1849_v47 = vmul.f32 0.125, %v1840_v0  ;;  %v1853_v48 = vmul.f32 %v1817_v63, %v1817_v63 }
 0x3be   : > { %v1816_v49 = vmul.f32 0.125, %v1802_v1  ;;  %v1834_v50 = vadd.f32 %v1833_v5, %v1832_v36  ;;  %v1818_v52 = vmul.f32 0.125, %v1814_v43  ;;  %v1846_v53 = vadd.f32 %v1845_v44, %v1844_v40 }
 0x3bf   : > { %v1855_v51 = vsub.f32 %v1847_v45, %v1851_v46  ;;  %v1857_v54 = vsub.f32 %v1849_v47, %v1853_v48  ;;  %v1859_v12 = vsub.f32 %v6949_v38, %v1815_v41  ;;  %v1879_v13 = vrot.slane %v1789_v7, %v6906_v9 }
 0x3c0   : > { %v1848_v55 = vmul.f32 0.125, %v1834_v50  ;;  %v1852_v56 = vmul.f32 %v1816_v49, %v1816_v49  ;;  %v1850_v58 = vmul.f32 0.125, %v1846_v53  ;;  %v1854_v59 = vmul.f32 %v1818_v52, %v1818_v52  ;;  %v1994_v50 = vld [vmem:[#allocation22 + $0x1a8] sm:$0xff] }
 0x3c1   : > { %v1863_v57 = vadd.f32 0.8, %v1855_v51  ;;  %v1865_v60 = vadd.f32 0.8, %v1857_v54  ;;  %v1861_v16 = vsub.f32 %v6951_v39, %v1817_v63  ;;  %v1887_v17 = vrot.slane %v1789_v7, %v6940_v29  ;;  %v2118_v53 = vld [vmem:[#allocation22 + $0x588] sm:$0xff] }
 0x3c2   : > { %v1856_v61 = vsub.f32 %v1848_v55, %v1852_v56  ;;  %v1858_v62 = vsub.f32 %v1850_v58, %v1854_v59  ;;  %v1904_v20 = vrot.slane %v1790_v10, %v6906_v9  ;;  %v1860_v19 = vsub.f32 %v6959_v2, %v1816_v49  ;;  %v1990_v49 = vld [vmem:[#allocation22 + $0x188] sm:$0xff] }
 0x3c3   : > { %5940 = vrsqrt.f32 %v1863_v57  ;;  %v1883_v28 = vrot.slane %v1789_v7, %v6909_v11  ;;  %v1912_v30 = vrot.slane %v1790_v10, %v6940_v29  ;;  %v1862_v33 = vsub.f32 %v6961_v4, %v1818_v52  ;;  %v2122_v54 = vld [vmem:[#allocation22 + $0x5a8] sm:$0xff] }
 0x3c4   : > { %5942 = vrsqrt.f32 %v1865_v60  ;;  %v1864_v3 = vadd.f32 0.8, %v1856_v61  ;;  %v1866_v6 = vadd.f32 0.8, %v1858_v62  ;;  %v1891_v34 = vrot.slane %v1789_v7, %v6943_v31  ;;  %v1982_v59 = vld [vmem:[#allocation22 + $0x148] sm:$0xff] }
 0x3c5   : > { %v1908_v37 = vrot.slane %v1790_v10, %v6909_v11  ;;  %v1916_v41 = vrot.slane %v1790_v10, %v6943_v31  ;;  %v5235_v58 = vcombine.high %v1990_v49, %v1994_v50  ;;  %v1986_v60 = vld [vmem:[#allocation22 + $0x168] sm:$0xff]  ;;  %v5363_v61 = vcombine.high %v2118_v53, %v2122_v54 }
 0x3c6   : > { %5944 = vrsqrt.f32 %v1864_v3  ;;  %v2110_v62 = vld [vmem:[#allocation22 + $0x548] sm:$0xff]  ;;  %v5362_v7 = vcombine.low %v2118_v53, %v2122_v54  ;;  %v5227_v10 = vcombine.high %v1982_v59, %v1986_v60  ;;  %v5226_v22 = vcombine.low %v1982_v59, %v1986_v60 }
 0x3c7   : > { %5946 = vrsqrt.f32 %v1866_v6  ;;  %v2114_v3 = vld [vmem:[#allocation22 + $0x568] sm:$0xff]  ;;  %v5234_v6 = vcombine.low %v1990_v49, %v1994_v50 }
 0x3c8   : > { %v5354_v23 = vcombine.low %v2110_v62, %v2114_v3  ;;  %v2062_v49 = vld [vmem:[#allocation22 + $0x3c8] sm:$0xff] }
 0x3c9   : > { %v2066_v50 = vld [vmem:[#allocation22 + $0x3e8] sm:$0xff] }
 0x3ca   : > { %v2194_v53 = vld [vmem:[#allocation22 + $0x7e8] sm:$0xff]  ;;  %v5307_v59 = vcombine.high %v2062_v49, %v2066_v50 }
 0x3d0   : > { %v5941_v14 = vpop.eup %5940 }
 0x3d1   : > { %v5943_v18 = vpop.eup %5942  ;;  %v1871_v15 = vmul.f32 %v5941_v14, %v1859_v12  ;;  %v5355_v12 = vcombine.high %v2110_v62, %v2114_v3  ;;  %v1978_v14 = vld [vmem:[#allocation22 + $0x128] sm:$0xff] }
 0x3d2   : > { %v1873_v21 = vmul.f32 %v5943_v18, %v1861_v16  ;;  %v2102_v16 = vld [vmem:[#allocation22 + $0x508] sm:$0xff] }
 0x3d3   : > { %v5945_v32 = vpop.eup %5944  ;;  %v1896_v38 = vmul.f32 %v1879_v13, %v1871_v15  ;;  %v1974_v13 = vld [vmem:[#allocation22 + $0x108] sm:$0xff] }
 0x3d4   : > { %v5947_v39 = vpop.eup %5946  ;;  %v1898_v35 = vmul.f32 %v1887_v17, %v1873_v21  ;;  %v1872_v36 = vmul.f32 %v5945_v32, %v1860_v19  ;;  %v2106_v17 = vld [vmem:[#allocation22 + $0x528] sm:$0xff]  ;;  %v5219_v24 = vcombine.high %v1974_v13, %v1978_v14 }
 0x3d5   : > { %v1874_v40 = vmul.f32 %v5947_v39, %v1862_v33  ;;  %v1921_v42 = vadd.f32 %v1904_v20, %v1896_v38  ;;  %v5347_v25 = vcombine.high %v2102_v16, %v2106_v17  ;;  %v2094_v18 = vld [vmem:[#allocation22 + $0x4c8] sm:$0xff]  ;;  %v5218_v20 = vcombine.low %v1974_v13, %v1978_v14 }
 0x3d6   : > { %v1897_v2 = vmul.f32 %v1883_v28, %v1872_v36  ;;  %v1923_v63 = vadd.f32 %v1912_v30, %v1898_v35  ;;  %v2098_v15 = vld [vmem:[#allocation22 + $0x4e8] sm:$0xff]  ;;  %v5346_v21 = vcombine.low %v2102_v16, %v2106_v17 }
 0x3d7   : > { %v1899_v0 = vmul.f32 %v1891_v34, %v1874_v40  ;;  %v1929_v1 = vmul.f32 0.2, %v1921_v42  ;;  %vm1925_vm7 = vcmp.gt.f32.partialorder %v1921_v42, 0.0  ;;  %v5339_v28 = vcombine.high %v2094_v18, %v2098_v15  ;;  %v1958_v30 = vld [vmem:[#allocation22 + $0x88] sm:$0xff] }
 0x3d8   : > { %v1922_v5 = vadd.f32 %v1908_v37, %v1897_v2  ;;  %v1931_v43 = vmul.f32 0.2, %v1923_v63  ;;  %vm1927_vm8 = vcmp.gt.f32.partialorder %v1923_v63, 0.0  ;;  %v1962_v32 = vld [vmem:[#allocation22 + $0xa8] sm:$0xff]  ;;  %v5338_v39 = vcombine.low %v2094_v18, %v2098_v15 }
 0x3d9   : > { %v1924_v44 = vadd.f32 %v1916_v41, %v1899_v0  ;;  %v1933_v46 = vsel %vm1925_vm7, %v1921_v42, %v1929_v1  ;;  %v2086_v38 = vld [vmem:[#allocation22 + $0x488] sm:$0xff]  ;;  %v5203_v35 = vcombine.high %v1958_v30, %v1962_v32  ;;  %v5202_v2 = vcombine.low %v1958_v30, %v1962_v32 }
 0x3da   : > { %vm1926_vm9 = vcmp.gt.f32.partialorder %v1922_v5, 0.0  ;;  %v1930_v4 = vmul.f32 0.2, %v1922_v5  ;;  %v1935_v48 = vsel %vm1927_vm8, %v1923_v63, %v1931_v43  ;;  %v6989_v56 = vpack.c.bf16 %v1933_v46, %v1933_v46  ;;  %v2090_v33 = vld [vmem:[#allocation22 + $0x4a8] sm:$0xff] }
 0x3db   : > { %vm1928_vm10 = vcmp.gt.f32.partialorder %v1924_v44, 0.0  ;;  %v1932_v45 = vmul.f32 0.2, %v1924_v44  ;;  %v6992_v57 = vpack.c.bf16 %v1935_v48, %v1935_v48  ;;  %v5331_v36 = vcombine.high %v2086_v38, %v2090_v33  ;;  %v1950_v37 = vld [vmem:[#allocation22 + $0x48] sm:$0xff] }
 0x3dc   : > { %v1934_v47 = vsel %vm1926_vm9, %v1922_v5, %v1930_v4  ;;  %v1954_v40 = vld [vmem:[#allocation22 + $0x68] sm:$0xff]  ;;  %v5330_v63 = vcombine.low %v2086_v38, %v2090_v33 }
 0x3dd   : > { %v6985_v51 = vpack.c.bf16 %v1934_v47, %v1934_v47  ;;  %v1936_v52 = vsel %vm1928_vm10, %v1924_v44, %v1932_v45  ;;  %v2078_v41 = vld [vmem:[#allocation22 + $0x448] sm:$0xff]  ;;  %v5195_v0 = vcombine.high %v1950_v37, %v1954_v40  ;;  %v5194_v45 = vcombine.low %v1950_v37, %v1954_v40 }
 0x3de   : > { %v6987_v55 = vpack.c.bf16 %v1936_v52, %v1936_v52  ;;  %v2082_v42 = vld [vmem:[#allocation22 + $0x468] sm:$0xff] }
 0x3df   : > { %3551 = vmatprep.mubr.bf16.mxu0 %v6985_v51  ;;  %v5323_v1 = vcombine.high %v2078_v41, %v2082_v42  ;;  %v1942_v5 = vld [vmem:[#allocation22 + $0x8] sm:$0xff]  ;;  %v5322_v46 = vcombine.low %v2078_v41, %v2082_v42 }
 0x3e0   : > { %3592 = vmatprep.mubr.bf16.mxu1 %v6987_v55  ;;  %3552 = vmatmul.mubr.bf16.vlgmr.msra.gmra.mxu0 %v6989_v56  ;;  %v1946_v43 = vld [vmem:[#allocation22 + $0x28] sm:$0xff] }
 0x3e1   : > { %3593 = vmatmul.mubr.bf16.vlgmr.msra.gmra.mxu1 %v6992_v57  ;;  %3602 = vmatpush1.bf16.msra.mxu0 %v5242_v26  ;;  %v1966_v26 = vld [vmem:[#allocation22 + $0xc8] sm:$0xff]  ;;  %v5187_v47 = vcombine.high %v1942_v5, %v1946_v43  ;;  %v5186_v54 = vcombine.low %v1942_v5, %v1946_v43 }
 0x3e2   : > { %3643 = vmatpush1.bf16.msra.mxu1 %v5370_v27  ;;  %3633 = vmatprep.mubr.bf16.mxu0 %v6985_v51  ;;  %v1970_v27 = vld [vmem:[#allocation22 + $0xe8] sm:$0xff] }
 0x3e3   : > { %3674 = vmatprep.mubr.bf16.mxu1 %v6987_v55  ;;  %3603 = vmatprep.subr.bf16.mxu0 %v5235_v58  ;;  %v5211_v19 = vcombine.high %v1966_v26, %v1970_v27  ;;  %v5210_v34 = vcombine.low %v1966_v26, %v1970_v27  ;;  %v2070_v44 = vld [vmem:[#allocation22 + $0x408] sm:$0xff] }
 0x3e4   : > { %3644 = vmatprep.subr.bf16.mxu1 %v5363_v61  ;;  %v2074_v4 = vld [vmem:[#allocation22 + $0x428] sm:$0xff] }
 0x3e5   : > { %3604 = vmatpush1.bf16.msra.mxu0 %v5234_v6  ;;  %v5315_v48 = vcombine.high %v2070_v44, %v2074_v4  ;;  %v2190_v52 = vld [vmem:[#allocation22 + $0x7c8] sm:$0xff]  ;;  %v5314_v58 = vcombine.low %v2070_v44, %v2074_v4 }
 0x3e6   : > { %3645 = vmatpush1.bf16.msra.mxu1 %v5362_v7  ;;  %3605 = vmatprep.subr.bf16.mxu0 %v5227_v10  ;;  %v5435_v60 = vcombine.high %v2190_v52, %v2194_v53  ;;  %v2054_v61 = vld [vmem:[#allocation22 + $0x388] sm:$0xff]  ;;  %v5306_v7 = vcombine.low %v2062_v49, %v2066_v50  ;;  %v5434_v10 = vcombine.low %v2190_v52, %v2194_v53 }
 0x3e7   : > { %3646 = vmatprep.subr.bf16.mxu1 %v5355_v12  ;;  %v2058_v62 = vld [vmem:[#allocation22 + $0x3a8] sm:$0xff] }
 0x3e8   : > { %v2182_v3 = vld [vmem:[#allocation22 + $0x788] sm:$0xff]  ;;  %v5299_v12 = vcombine.high %v2054_v61, %v2058_v62 }
 0x3e9   : > { %3606 = vmatpush1.bf16.msra.mxu0 %v5226_v22  ;;  %v2186_v6 = vld [vmem:[#allocation22 + $0x7a8] sm:$0xff] }
 0x3ea   : > { %3647 = vmatpush1.bf16.msra.mxu1 %v5354_v23  ;;  %3607 = vmatprep.subr.bf16.mxu0 %v5219_v24  ;;  %v5427_v13 = vcombine.high %v2182_v3, %v2186_v6  ;;  %v2046_v14 = vld [vmem:[#allocation22 + $0x348] sm:$0xff]  ;;  %v5298_v23 = vcombine.low %v2054_v61, %v2058_v62  ;;  %v5426_v24 = vcombine.low %v2182_v3, %v2186_v6  ;;  %v1999_v62 = vld [vmem:[#allocation22 + $0x1d0] sm:$0xff] }
 0x3eb   : > { %3648 = vmatprep.subr.bf16.mxu1 %v5347_v25  ;;  %v2050_v16 = vld [vmem:[#allocation22 + $0x368] sm:$0xff]  ;;  %v2003_v3 = vld [vmem:[#allocation22 + $0x1f0] sm:$0xff] }
 0x3ec   : > { %v2174_v17 = vld [vmem:[#allocation22 + $0x748] sm:$0xff]  ;;  %v5291_v25 = vcombine.high %v2046_v14, %v2050_v16  ;;  %v2127_v6 = vld [vmem:[#allocation22 + $0x5d0] sm:$0xff] }
 0x3ed   : > { %3608 = vmatpush1.bf16.msra.mxu0 %v5218_v20  ;;  %v2178_v22 = vld [vmem:[#allocation22 + $0x768] sm:$0xff] }
 0x3ee   : > { %3649 = vmatpush1.bf16.msra.mxu1 %v5346_v21  ;;  %3609 = vmatprep.subr.bf16.mxu0 %v5211_v19  ;;  %v5419_v26 = vcombine.high %v2174_v17, %v2178_v22  ;;  %v2038_v27 = vld [vmem:[#allocation22 + $0x308] sm:$0xff]  ;;  %v5290_v21 = vcombine.low %v2046_v14, %v2050_v16  ;;  %v5418_v19 = vcombine.low %v2174_v17, %v2178_v22  ;;  %v1991_v16 = vld [vmem:[#allocation22 + $0x190] sm:$0xff] }
 0x3ef   : > { %3650 = vmatprep.subr.bf16.mxu1 %v5339_v28  ;;  %v2042_v18 = vld [vmem:[#allocation22 + $0x328] sm:$0xff]  ;;  %v1995_v17 = vld [vmem:[#allocation22 + $0x1b0] sm:$0xff]  ;;  %v5244_v22 = vcombine.low %v1999_v62, %v2003_v3 }
 0x3f0   : > { %v2166_v15 = vld [vmem:[#allocation22 + $0x708] sm:$0xff]  ;;  %v5283_v28 = vcombine.high %v2038_v27, %v2042_v18 }
 0x3f1   : > { %3610 = vmatpush1.bf16.msra.mxu0 %v5210_v34  ;;  %v2170_v20 = vld [vmem:[#allocation22 + $0x728] sm:$0xff] }
 0x3f2   : > { %3651 = vmatpush1.bf16.msra.mxu1 %v5338_v39  ;;  %3611 = vmatprep.subr.bf16.mxu0 %v5203_v35  ;;  %v5411_v30 = vcombine.high %v2166_v15, %v2170_v20  ;;  %v2030_v32 = vld [vmem:[#allocation22 + $0x2c8] sm:$0xff]  ;;  %v5282_v39 = vcombine.low %v2038_v27, %v2042_v18  ;;  %v5410_v35 = vcombine.low %v2166_v15, %v2170_v20  ;;  %v1983_v27 = vld [vmem:[#allocation22 + $0x150] sm:$0xff] }
 0x3f3   : > { %3652 = vmatprep.subr.bf16.mxu1 %v5331_v36  ;;  %v2034_v38 = vld [vmem:[#allocation22 + $0x2e8] sm:$0xff]  ;;  %v1987_v18 = vld [vmem:[#allocation22 + $0x170] sm:$0xff] }
 0x3f4   : > { %v2158_v33 = vld [vmem:[#allocation22 + $0x6c8] sm:$0xff]  ;;  %v5275_v36 = vcombine.high %v2030_v32, %v2034_v38  ;;  %v2111_v20 = vld [vmem:[#allocation22 + $0x550] sm:$0xff] }
 0x3f5   : > { %3612 = vmatpush1.bf16.msra.mxu0 %v5202_v2  ;;  %v2162_v34 = vld [vmem:[#allocation22 + $0x6e8] sm:$0xff] }
 0x3f6   : > { %3653 = vmatpush1.bf16.msra.mxu1 %v5330_v63  ;;  %3613 = vmatprep.subr.bf16.mxu0 %v5195_v0  ;;  %v5403_v37 = vcombine.high %v2158_v33, %v2162_v34  ;;  %v2022_v40 = vld [vmem:[#allocation22 + $0x288] sm:$0xff]  ;;  %v5274_v63 = vcombine.low %v2030_v32, %v2034_v38  ;;  %v5402_v0 = vcombine.low %v2158_v33, %v2162_v34  ;;  %v1975_v38 = vld [vmem:[#allocation22 + $0x110] sm:$0xff] }
 0x3f7   : > { %3654 = vmatprep.subr.bf16.mxu1 %v5323_v1  ;;  %v2026_v41 = vld [vmem:[#allocation22 + $0x2a8] sm:$0xff]  ;;  %v1979_v33 = vld [vmem:[#allocation22 + $0x130] sm:$0xff] }
 0x3f8   : > { %v2150_v42 = vld [vmem:[#allocation22 + $0x688] sm:$0xff]  ;;  %v5267_v1 = vcombine.high %v2022_v40, %v2026_v41  ;;  %v2103_v34 = vld [vmem:[#allocation22 + $0x510] sm:$0xff] }
 0x3f9   : > { %3614 = vmatpush1.bf16.msra.mxu0 %v5194_v45  ;;  %v2154_v2 = vld [vmem:[#allocation22 + $0x6a8] sm:$0xff] }
 0x3fa   : > { %3655 = vmatpush1.bf16.msra.mxu1 %v5322_v46  ;;  %3615 = vmatprep.subr.bf16.mxu0 %v5187_v47  ;;  %v5395_v5 = vcombine.high %v2150_v42, %v2154_v2  ;;  %v2014_v43 = vld [vmem:[#allocation22 + $0x248] sm:$0xff]  ;;  %v5266_v46 = vcombine.low %v2022_v40, %v2026_v41  ;;  %v5394_v47 = vcombine.low %v2150_v42, %v2154_v2  ;;  %v1967_v41 = vld [vmem:[#allocation22 + $0xd0] sm:$0xff] }
 0x3fb   : > { %3656 = vmatprep.subr.bf16.mxu1 %v5315_v48  ;;  %v2018_v44 = vld [vmem:[#allocation22 + $0x268] sm:$0xff]  ;;  %v1971_v42 = vld [vmem:[#allocation22 + $0xf0] sm:$0xff] }
 0x3fc   : > { %v2142_v4 = vld [vmem:[#allocation22 + $0x648] sm:$0xff]  ;;  %v5259_v48 = vcombine.high %v2014_v43, %v2018_v44  ;;  %v2095_v2 = vld [vmem:[#allocation22 + $0x4d0] sm:$0xff] }
 0x3fd   : > { %3616 = vmatpush1.bf16.msra.mxu0 %v5186_v54  ;;  %v2146_v45 = vld [vmem:[#allocation22 + $0x668] sm:$0xff] }
 0x3fe   : > { %3657 = vmatpush1.bf16.msra.mxu1 %v5314_v58  ;;  %3617 = vmatprep.subr.bf16.mxu0 %v5307_v59  ;;  %v5387_v49 = vcombine.high %v2142_v4, %v2146_v45  ;;  %v2006_v50 = vld [vmem:[#allocation22 + $0x208] sm:$0xff]  ;;  %v5258_v58 = vcombine.low %v2014_v43, %v2018_v44  ;;  %v5386_v59 = vcombine.low %v2142_v4, %v2146_v45  ;;  %v1959_v44 = vld [vmem:[#allocation22 + $0x90] sm:$0xff] }
 0x3ff   : > { %3658 = vmatprep.subr.bf16.mxu1 %v5435_v60  ;;  %v2010_v52 = vld [vmem:[#allocation22 + $0x228] sm:$0xff]  ;;  %v1963_v4 = vld [vmem:[#allocation22 + $0xb0] sm:$0xff] }
 0x400   : > { %v2134_v53 = vld [vmem:[#allocation22 + $0x608] sm:$0xff]  ;;  %v5251_v60 = vcombine.high %v2006_v50, %v2010_v52  ;;  %v2087_v45 = vld [vmem:[#allocation22 + $0x490] sm:$0xff] }
 0x401   : > { %3618 = vmatpush2.bf16.msra.mxu0 %v5306_v7  ;;  %v2138_v54 = vld [vmem:[#allocation22 + $0x628] sm:$0xff]  ;;  %v2131_v7 = vld [vmem:[#allocation22 + $0x5f0] sm:$0xff] }
 0x402   : > { %3659 = vmatpush2.bf16.msra.mxu1 %v5434_v10  ;;  %3619 = vmatprep.subr.bf16.mxu0 %v5299_v12  ;;  %v5379_v61 = vcombine.high %v2134_v53, %v2138_v54  ;;  %v5250_v10 = vcombine.low %v2006_v50, %v2010_v52  ;;  %v5378_v12 = vcombine.low %v2134_v53, %v2138_v54  ;;  %v1951_v52 = vld [vmem:[#allocation22 + $0x50] sm:$0xff] }
 0x403   : > { %3660 = vmatprep.subr.bf16.mxu1 %v5427_v13  ;;  %v5245_v13 = vcombine.high %v1999_v62, %v2003_v3  ;;  %v5373_v14 = vcombine.high %v2127_v6, %v2131_v7  ;;  %v1955_v53 = vld [vmem:[#allocation22 + $0x70] sm:$0xff] }
 0x404   : > { %v2079_v54 = vld [vmem:[#allocation22 + $0x450] sm:$0xff] }
 0x405   : > { %3620 = vmatpush2.bf16.msra.mxu0 %v5298_v23  ;;  %v2119_v23 = vld [vmem:[#allocation22 + $0x590] sm:$0xff] }
 0x406   : > { %3661 = vmatpush2.bf16.msra.mxu1 %v5426_v24  ;;  %3621 = vmatprep.subr.bf16.mxu0 %v5291_v25  ;;  %v2123_v24 = vld [vmem:[#allocation22 + $0x5b0] sm:$0xff]  ;;  %v5372_v25 = vcombine.low %v2127_v6, %v2131_v7 }
 0x407   : > { %3662 = vmatprep.subr.bf16.mxu1 %v5419_v26  ;;  %v5237_v26 = vcombine.high %v1991_v16, %v1995_v17  ;;  %v5365_v15 = vcombine.high %v2119_v23, %v2123_v24  ;;  %v1943_v3 = vld [vmem:[#allocation22 + $0x10] sm:$0xff] }
 0x408   : > { %v1947_v6 = vld [vmem:[#allocation22 + $0x30] sm:$0xff] }
 0x409   : > { %3622 = vmatpush2.bf16.msra.mxu0 %v5290_v21  ;;  %v2115_v21 = vld [vmem:[#allocation22 + $0x570] sm:$0xff] }
 0x40a   : > { %3663 = vmatpush2.bf16.msra.mxu1 %v5418_v19  ;;  %3623 = vmatprep.subr.bf16.mxu0 %v5283_v28  ;;  %v5236_v19 = vcombine.low %v1991_v16, %v1995_v17  ;;  %v5364_v28 = vcombine.low %v2119_v23, %v2123_v24  ;;  %v5357_v32 = vcombine.high %v2111_v20, %v2115_v21  ;;  %v2071_v7 = vld [vmem:[#allocation22 + $0x410] sm:$0xff] }
 0x40b   : > { %3664 = vmatprep.subr.bf16.mxu1 %v5411_v30  ;;  %v5229_v30 = vcombine.high %v1983_v27, %v1987_v18  ;;  %v2063_v17 = vld [vmem:[#allocation22 + $0x3d0] sm:$0xff] }
 0x40c   : > { %v2191_v23 = vld [vmem:[#allocation22 + $0x7d0] sm:$0xff] }
 0x40d   : > { %3624 = vmatpush2.bf16.msra.mxu0 %v5282_v39  ;;  %v2107_v39 = vld [vmem:[#allocation22 + $0x530] sm:$0xff] }
 0x40e   : > { %3665 = vmatpush2.bf16.msra.mxu1 %v5410_v35  ;;  %3625 = vmatprep.subr.bf16.mxu0 %v5275_v36  ;;  %v5228_v35 = vcombine.low %v1983_v27, %v1987_v18  ;;  %v5356_v36 = vcombine.low %v2111_v20, %v2115_v21  ;;  %v5349_v40 = vcombine.high %v2103_v34, %v2107_v39  ;;  %v2195_v24 = vld [vmem:[#allocation22 + $0x7f0] sm:$0xff] }
 0x40f   : > { %3666 = vmatprep.subr.bf16.mxu1 %v5403_v37  ;;  %v5221_v37 = vcombine.high %v1975_v38, %v1979_v33  ;;  %v5437_v18 = vcombine.high %v2191_v23, %v2195_v24  ;;  %v2059_v20 = vld [vmem:[#allocation22 + $0x3b0] sm:$0xff] }
 0x410   : > { %v2183_v21 = vld [vmem:[#allocation22 + $0x790] sm:$0xff] }
 0x411   : > { %3626 = vmatpush2.bf16.msra.mxu0 %v5274_v63  ;;  %v2099_v63 = vld [vmem:[#allocation22 + $0x4f0] sm:$0xff] }
 0x412   : > { %3667 = vmatpush2.bf16.msra.mxu1 %v5402_v0  ;;  %3627 = vmatprep.subr.bf16.mxu0 %v5267_v1  ;;  %v5220_v0 = vcombine.low %v1975_v38, %v1979_v33  ;;  %v5348_v1 = vcombine.low %v2103_v34, %v2107_v39  ;;  %v5341_v43 = vcombine.high %v2095_v2, %v2099_v63  ;;  %v2047_v33 = vld [vmem:[#allocation22 + $0x350] sm:$0xff] }
 0x413   : > { %3668 = vmatprep.subr.bf16.mxu1 %v5395_v5  ;;  %v5213_v5 = vcombine.high %v1967_v41, %v1971_v42  ;;  %v2051_v34 = vld [vmem:[#allocation22 + $0x370] sm:$0xff] }
 0x414   : > { %v2175_v39 = vld [vmem:[#allocation22 + $0x750] sm:$0xff] }
 0x415   : > { %3628 = vmatpush2.bf16.msra.mxu0 %v5266_v46  ;;  %v2091_v46 = vld [vmem:[#allocation22 + $0x4b0] sm:$0xff] }
 0x416   : > { %3669 = vmatpush2.bf16.msra.mxu1 %v5394_v47  ;;  %3629 = vmatprep.subr.bf16.mxu0 %v5259_v48  ;;  %v5212_v47 = vcombine.low %v1967_v41, %v1971_v42  ;;  %v5340_v48 = vcombine.low %v2095_v2, %v2099_v63  ;;  %v5333_v50 = vcombine.high %v2087_v45, %v2091_v46  ;;  %v2039_v42 = vld [vmem:[#allocation22 + $0x310] sm:$0xff] }
 0x417   : > { %3670 = vmatprep.subr.bf16.mxu1 %v5387_v49  ;;  %v5205_v49 = vcombine.high %v1959_v44, %v1963_v4  ;;  %v2043_v2 = vld [vmem:[#allocation22 + $0x330] sm:$0xff] }
 0x418   : > { %v2167_v63 = vld [vmem:[#allocation22 + $0x710] sm:$0xff] }
 0x419   : > { %3630 = vmatpush2.bf16.msra.mxu0 %v5258_v58  ;;  %v2083_v58 = vld [vmem:[#allocation22 + $0x470] sm:$0xff] }
 0x41a   : > { %3671 = vmatpush2.bf16.msra.mxu1 %v5386_v59  ;;  %3631 = vmatprep.subr.bf16.mxu0 %v5251_v60  ;;  %v5204_v59 = vcombine.low %v1959_v44, %v1963_v4  ;;  %v5332_v60 = vcombine.low %v2087_v45, %v2091_v46  ;;  %v5325_v62 = vcombine.high %v2079_v54, %v2083_v58  ;;  %v2031_v4 = vld [vmem:[#allocation22 + $0x2d0] sm:$0xff] }
 0x41b   : > { %3672 = vmatprep.subr.bf16.mxu1 %v5379_v61  ;;  %v5197_v61 = vcombine.high %v1951_v52, %v1955_v53  ;;  %v2035_v45 = vld [vmem:[#allocation22 + $0x2f0] sm:$0xff] }
 0x41c   : > { %v2159_v46 = vld [vmem:[#allocation22 + $0x6d0] sm:$0xff] }
 0x41d   : > { %3632 = vmatpush2.bf16.msra.mxu0 %v5250_v10  ;;  %v2075_v10 = vld [vmem:[#allocation22 + $0x430] sm:$0xff] }
 0x41e   : > { %3673 = vmatpush2.bf16.msra.mxu1 %v5378_v12  ;;  %3683 = vmatprep.subr.bf16.mxu0 %v5245_v13  ;;  %v5196_v12 = vcombine.low %v1951_v52, %v1955_v53  ;;  %v5324_v13 = vcombine.low %v2079_v54, %v2083_v58  ;;  %v5317_v16 = vcombine.high %v2071_v7, %v2075_v10  ;;  %v2023_v53 = vld [vmem:[#allocation22 + $0x290] sm:$0xff] }
 0x41f   : > { %3724 = vmatprep.subr.bf16.mxu1 %v5373_v14  ;;  %v5189_v14 = vcombine.high %v1943_v3, %v1947_v6  ;;  %v2027_v54 = vld [vmem:[#allocation22 + $0x2b0] sm:$0xff] }
 0x420   : > { %3634 = vmatmul.mubr.bf16.vlgmr.msra.gmra.mxu0 %v6989_v56  ;;  %v2151_v58 = vld [vmem:[#allocation22 + $0x690] sm:$0xff] }
 0x421   : > { %3675 = vmatmul.mubr.bf16.vlgmr.msra.gmra.mxu1 %v6992_v57  ;;  %3684 = vmatpush1.bf16.msra.mxu0 %v5244_v22  ;;  %v2067_v22 = vld [vmem:[#allocation22 + $0x3f0] sm:$0xff] }
 0x422   : > { %3715 = vmatprep.mubr.bf16.mxu0 %v6985_v51  ;;  %3725 = vmatpush1.bf16.msra.mxu1 %v5372_v25  ;;  %v5188_v25 = vcombine.low %v1943_v3, %v1947_v6  ;;  %v5309_v27 = vcombine.high %v2063_v17, %v2067_v22  ;;  %v2015_v6 = vld [vmem:[#allocation22 + $0x250] sm:$0xff] }
 0x423   : > { %3756 = vmatprep.mubr.bf16.mxu1 %v6987_v55  ;;  %3685 = vmatprep.subr.bf16.mxu0 %v5237_v26  ;;  %v5316_v26 = vcombine.low %v2071_v7, %v2075_v10  ;;  %v2019_v7 = vld [vmem:[#allocation22 + $0x270] sm:$0xff] }
 0x424   : > { %3726 = vmatprep.subr.bf16.mxu1 %v5365_v15  ;;  %v2055_v15 = vld [vmem:[#allocation22 + $0x390] sm:$0xff] }
 0x425   : > { %3686 = vmatpush1.bf16.msra.mxu0 %v5236_v19  ;;  %v2187_v19 = vld [vmem:[#allocation22 + $0x7b0] sm:$0xff] }
 0x426   : > { %3727 = vmatpush1.bf16.msra.mxu1 %v5364_v28  ;;  %3687 = vmatprep.subr.bf16.mxu0 %v5229_v30  ;;  %v5308_v28 = vcombine.low %v2063_v17, %v2067_v22  ;;  %v5436_v30 = vcombine.low %v2191_v23, %v2195_v24  ;;  %v5429_v38 = vcombine.high %v2183_v21, %v2187_v19  ;;  %v2143_v10 = vld [vmem:[#allocation22 + $0x650] sm:$0xff] }
 0x427   : > { %3728 = vmatprep.subr.bf16.mxu1 %v5357_v32  ;;  %v5301_v32 = vcombine.high %v2055_v15, %v2059_v20  ;;  %v2007_v22 = vld [vmem:[#allocation22 + $0x210] sm:$0xff] }
 0x428   : > { %v2011_v23 = vld [vmem:[#allocation22 + $0x230] sm:$0xff] }
 0x429   : > { %3688 = vmatpush1.bf16.msra.mxu0 %v5228_v35  ;;  %v2179_v35 = vld [vmem:[#allocation22 + $0x770] sm:$0xff] }
 0x42a   : > { %3729 = vmatpush1.bf16.msra.mxu1 %v5356_v36  ;;  %3689 = vmatprep.subr.bf16.mxu0 %v5221_v37  ;;  %v5300_v36 = vcombine.low %v2055_v15, %v2059_v20  ;;  %v5428_v37 = vcombine.low %v2183_v21, %v2187_v19  ;;  %v5421_v41 = vcombine.high %v2175_v39, %v2179_v35  ;;  %v2135_v24 = vld [vmem:[#allocation22 + $0x610] sm:$0xff]  ;;  %v2000_v20 = vld [vmem:[#allocation22 + $0x1d8] sm:$0xff] }
 0x42b   : > { %3730 = vmatprep.subr.bf16.mxu1 %v5349_v40  ;;  %v5293_v40 = vcombine.high %v2047_v33, %v2051_v34  ;;  %v2004_v21 = vld [vmem:[#allocation22 + $0x1f8] sm:$0xff] }
 0x42c   : > { %v2128_v19 = vld [vmem:[#allocation22 + $0x5d8] sm:$0xff] }
 0x42d   : > { %3690 = vmatpush1.bf16.msra.mxu0 %v5220_v0  ;;  %v2171_v0 = vld [vmem:[#allocation22 + $0x730] sm:$0xff] }
 0x42e   : > { %3731 = vmatpush1.bf16.msra.mxu1 %v5348_v1  ;;  %3691 = vmatprep.subr.bf16.mxu0 %v5213_v5  ;;  %v5292_v1 = vcombine.low %v2047_v33, %v2051_v34  ;;  %v5420_v5 = vcombine.low %v2175_v39, %v2179_v35  ;;  %v5413_v44 = vcombine.high %v2167_v63, %v2171_v0  ;;  %v1992_v34 = vld [vmem:[#allocation22 + $0x198] sm:$0xff] }
 0x42f   : > { %3732 = vmatprep.subr.bf16.mxu1 %v5341_v43  ;;  %v5285_v43 = vcombine.high %v2039_v42, %v2043_v2  ;;  %v1996_v39 = vld [vmem:[#allocation22 + $0x1b8] sm:$0xff]  ;;  %v5246_v35 = vcombine.low %v2000_v20, %v2004_v21 }
 0x431   : > { %3692 = vmatpush1.bf16.msra.mxu0 %v5212_v47  ;;  %v2163_v47 = vld [vmem:[#allocation22 + $0x6f0] sm:$0xff] }
 0x432   : > { %3733 = vmatpush1.bf16.msra.mxu1 %v5340_v48  ;;  %3693 = vmatprep.subr.bf16.mxu0 %v5205_v49  ;;  %v5284_v48 = vcombine.low %v2039_v42, %v2043_v2  ;;  %v5412_v49 = vcombine.low %v2167_v63, %v2171_v0  ;;  %v5405_v52 = vcombine.high %v2159_v46, %v2163_v47  ;;  %v1984_v42 = vld [vmem:[#allocation22 + $0x158] sm:$0xff] }
 0x433   : > { %3734 = vmatprep.subr.bf16.mxu1 %v5333_v50  ;;  %v5277_v50 = vcombine.high %v2031_v4, %v2035_v45  ;;  %v1988_v2 = vld [vmem:[#allocation22 + $0x178] sm:$0xff] }
 0x434   : > { %v2112_v0 = vld [vmem:[#allocation22 + $0x558] sm:$0xff] }
 0x435   : > { %3694 = vmatpush1.bf16.msra.mxu0 %v5204_v59  ;;  %v2155_v59 = vld [vmem:[#allocation22 + $0x6b0] sm:$0xff] }
 0x436   : > { %3735 = vmatpush1.bf16.msra.mxu1 %v5332_v60  ;;  %3695 = vmatprep.subr.bf16.mxu0 %v5197_v61  ;;  %v5276_v60 = vcombine.low %v2031_v4, %v2035_v45  ;;  %v5404_v61 = vcombine.low %v2159_v46, %v2163_v47  ;;  %v5397_v3 = vcombine.high %v2151_v58, %v2155_v59  ;;  %v1976_v45 = vld [vmem:[#allocation22 + $0x118] sm:$0xff] }
 0x437   : > { %3736 = vmatprep.subr.bf16.mxu1 %v5325_v62  ;;  %v5269_v62 = vcombine.high %v2023_v53, %v2027_v54  ;;  %v1980_v46 = vld [vmem:[#allocation22 + $0x138] sm:$0xff] }
 0x438   : > { %v2104_v47 = vld [vmem:[#allocation22 + $0x518] sm:$0xff] }
 0x439   : > { %3696 = vmatpush1.bf16.msra.mxu0 %v5196_v12  ;;  %v2147_v12 = vld [vmem:[#allocation22 + $0x670] sm:$0xff] }
 0x43a   : > { %3737 = vmatpush1.bf16.msra.mxu1 %v5324_v13  ;;  %3697 = vmatprep.subr.bf16.mxu0 %v5189_v14  ;;  %v5268_v13 = vcombine.low %v2023_v53, %v2027_v54  ;;  %v5396_v14 = vcombine.low %v2151_v58, %v2155_v59  ;;  %v5389_v17 = vcombine.high %v2143_v10, %v2147_v12  ;;  %v1968_v53 = vld [vmem:[#allocation22 + $0xd8] sm:$0xff] }
 0x43b   : > { %3738 = vmatprep.subr.bf16.mxu1 %v5317_v16  ;;  %v5261_v16 = vcombine.high %v2015_v6, %v2019_v7  ;;  %v1972_v54 = vld [vmem:[#allocation22 + $0xf8] sm:$0xff] }
 0x43c   : > { %v2096_v58 = vld [vmem:[#allocation22 + $0x4d8] sm:$0xff] }
 0x43d   : > { %3698 = vmatpush1.bf16.msra.mxu0 %v5188_v25  ;;  %v2139_v25 = vld [vmem:[#allocation22 + $0x630] sm:$0xff]  ;;  %v2100_v59 = vld [vmem:[#allocation22 + $0x4f8] sm:$0xff] }
 0x43e   : > { %3739 = vmatpush1.bf16.msra.mxu1 %v5316_v26  ;;  %3699 = vmatprep.subr.bf16.mxu0 %v5309_v27  ;;  %v5260_v26 = vcombine.low %v2015_v6, %v2019_v7  ;;  %v5388_v27 = vcombine.low %v2143_v10, %v2147_v12  ;;  %v5381_v15 = vcombine.high %v2135_v24, %v2139_v25  ;;  %v1964_v6 = vld [vmem:[#allocation22 + $0xb8] sm:$0xff] }
 0x43f   : > { %3740 = vmatprep.subr.bf16.mxu1 %v5437_v18  ;;  %v5253_v18 = vcombine.high %v2007_v22, %v2011_v23  ;;  %v2088_v7 = vld [vmem:[#allocation22 + $0x498] sm:$0xff]  ;;  %v5214_v12 = vcombine.low %v1968_v53, %v1972_v54 }
 0x440   : > { %v2092_v10 = vld [vmem:[#allocation22 + $0x4b8] sm:$0xff] }
 0x441   : > { %3700 = vmatpush2.bf16.msra.mxu0 %v5308_v28  ;;  %v2132_v28 = vld [vmem:[#allocation22 + $0x5f8] sm:$0xff] }
 0x442   : > { %3741 = vmatpush2.bf16.msra.mxu1 %v5436_v30  ;;  %3701 = vmatprep.subr.bf16.mxu0 %v5301_v32  ;;  %v5252_v30 = vcombine.low %v2007_v22, %v2011_v23  ;;  %v5380_v32 = vcombine.low %v2135_v24, %v2139_v25  ;;  %v5375_v33 = vcombine.high %v2128_v19, %v2132_v28  ;;  %v1956_v22 = vld [vmem:[#allocation22 + $0x78] sm:$0xff] }
 0x443   : > { %3742 = vmatprep.subr.bf16.mxu1 %v5429_v38  ;;  %v5247_v38 = vcombine.high %v2000_v20, %v2004_v21  ;;  %v2080_v23 = vld [vmem:[#allocation22 + $0x458] sm:$0xff] }
 0x444   : > { %v2084_v24 = vld [vmem:[#allocation22 + $0x478] sm:$0xff] }
 0x445   : > { %3702 = vmatpush2.bf16.msra.mxu0 %v5300_v36  ;;  %v2120_v36 = vld [vmem:[#allocation22 + $0x598] sm:$0xff] }
 0x446   : > { %3743 = vmatpush2.bf16.msra.mxu1 %v5428_v37  ;;  %3703 = vmatprep.subr.bf16.mxu0 %v5293_v40  ;;  %v2124_v37 = vld [vmem:[#allocation22 + $0x5b8] sm:$0xff]  ;;  %v5374_v40 = vcombine.low %v2128_v19, %v2132_v28 }
 0x447   : > { %3744 = vmatprep.subr.bf16.mxu1 %v5421_v41  ;;  %v5239_v41 = vcombine.high %v1992_v34, %v1996_v39  ;;  %v5367_v63 = vcombine.high %v2120_v36, %v2124_v37  ;;  %v1948_v20 = vld [vmem:[#allocation22 + $0x38] sm:$0xff] }
 0x448   : > { %v2072_v21 = vld [vmem:[#allocation22 + $0x418] sm:$0xff] }
 0x449   : > { %3704 = vmatpush2.bf16.msra.mxu0 %v5292_v1  ;;  %v2116_v1 = vld [vmem:[#allocation22 + $0x578] sm:$0xff] }
 0x44a   : > { %3745 = vmatpush2.bf16.msra.mxu1 %v5420_v5  ;;  %3705 = vmatprep.subr.bf16.mxu0 %v5285_v43  ;;  %v5238_v5 = vcombine.low %v1992_v34, %v1996_v39  ;;  %v5366_v43 = vcombine.low %v2120_v36, %v2124_v37  ;;  %v5359_v4 = vcombine.high %v2112_v0, %v2116_v1  ;;  %v2076_v19 = vld [vmem:[#allocation22 + $0x438] sm:$0xff] }
 0x44b   : > { %3746 = vmatprep.subr.bf16.mxu1 %v5413_v44  ;;  %v5231_v44 = vcombine.high %v1984_v42, %v1988_v2  ;;  %v2068_v34 = vld [vmem:[#allocation22 + $0x3f8] sm:$0xff]  ;;  %v5318_v37 = vcombine.low %v2072_v21, %v2076_v19 }
 0x44c   : > { %v2192_v39 = vld [vmem:[#allocation22 + $0x7d8] sm:$0xff] }
 0x44d   : > { %3706 = vmatpush2.bf16.msra.mxu0 %v5284_v48  ;;  %v2108_v48 = vld [vmem:[#allocation22 + $0x538] sm:$0xff] }
 0x44e   : > { %3747 = vmatpush2.bf16.msra.mxu1 %v5412_v49  ;;  %3707 = vmatprep.subr.bf16.mxu0 %v5277_v50  ;;  %v5230_v49 = vcombine.low %v1984_v42, %v1988_v2  ;;  %v5358_v50 = vcombine.low %v2112_v0, %v2116_v1  ;;  %v2056_v42 = vld [vmem:[#allocation22 + $0x398] sm:$0xff] }
 0x44f   : > { %3748 = vmatprep.subr.bf16.mxu1 %v5405_v52  ;;  %v5223_v52 = vcombine.high %v1976_v45, %v1980_v46  ;;  %v2060_v2 = vld [vmem:[#allocation22 + $0x3b8] sm:$0xff] }
 0x450   : > { %v2188_v0 = vld [vmem:[#allocation22 + $0x7b8] sm:$0xff] }
 0x451   : > { %3708 = vmatpush2.bf16.msra.mxu0 %v5276_v60  ;;  %v5350_v60 = vcombine.low %v2104_v47, %v2108_v48 }
 0x452   : > { %3749 = vmatpush2.bf16.msra.mxu1 %v5404_v61  ;;  %3709 = vmatprep.subr.bf16.mxu0 %v5269_v62  ;;  %v5215_v61 = vcombine.high %v1968_v53, %v1972_v54  ;;  %v5343_v62 = vcombine.high %v2096_v58, %v2100_v59  ;;  %v2044_v53 = vld [vmem:[#allocation22 + $0x338] sm:$0xff] }
 0x453   : > { %3750 = vmatprep.subr.bf16.mxu1 %v5397_v3  ;;  %v1960_v3 = vld [vmem:[#allocation22 + $0x98] sm:$0xff] }
 0x454   : > { %v5206_v25 = vcombine.low %v1960_v3, %v1964_v6  ;;  %v2168_v54 = vld [vmem:[#allocation22 + $0x718] sm:$0xff] }
 0x455   : > { %3710 = vmatpush2.bf16.msra.mxu0 %v5268_v13  ;;  %v5342_v13 = vcombine.low %v2096_v58, %v2100_v59  ;;  %v2172_v58 = vld [vmem:[#allocation22 + $0x738] sm:$0xff] }
 0x456   : > { %3751 = vmatpush2.bf16.msra.mxu1 %v5396_v14  ;;  %3711 = vmatprep.subr.bf16.mxu0 %v5261_v16  ;;  %v5207_v14 = vcombine.high %v1960_v3, %v1964_v6  ;;  %v5335_v16 = vcombine.high %v2088_v7, %v2092_v10  ;;  %v2036_v3 = vld [vmem:[#allocation22 + $0x2f8] sm:$0xff] }
 0x457   : > { %3752 = vmatprep.subr.bf16.mxu1 %v5389_v17  ;;  %v1952_v17 = vld [vmem:[#allocation22 + $0x58] sm:$0xff] }
 0x458   : > { %v5198_v28 = vcombine.low %v1952_v17, %v1956_v22  ;;  %v2160_v6 = vld [vmem:[#allocation22 + $0x6d8] sm:$0xff] }
 0x459   : > { %3712 = vmatpush2.bf16.msra.mxu0 %v5260_v26  ;;  %v5334_v26 = vcombine.low %v2088_v7, %v2092_v10  ;;  %v2164_v7 = vld [vmem:[#allocation22 + $0x6f8] sm:$0xff] }
 0x45a   : > { %3753 = vmatpush2.bf16.msra.mxu1 %v5388_v27  ;;  %3713 = vmatprep.subr.bf16.mxu0 %v5253_v18  ;;  %v5199_v27 = vcombine.high %v1952_v17, %v1956_v22  ;;  %v5327_v18 = vcombine.high %v2080_v23, %v2084_v24  ;;  %v2028_v17 = vld [vmem:[#allocation22 + $0x2b8] sm:$0xff] }
 0x45b   : > { %3754 = vmatprep.subr.bf16.mxu1 %v5381_v15  ;;  %v1944_v15 = vld [vmem:[#allocation22 + $0x18] sm:$0xff] }
 0x45c   : > { %v5190_v36 = vcombine.low %v1944_v15, %v1948_v20  ;;  %v2152_v22 = vld [vmem:[#allocation22 + $0x698] sm:$0xff] }
 0x45d   : > { %3714 = vmatpush2.bf16.msra.mxu0 %v5252_v30  ;;  %v5326_v30 = vcombine.low %v2080_v23, %v2084_v24  ;;  %v2156_v23 = vld [vmem:[#allocation22 + $0x6b8] sm:$0xff] }
 0x45e   : > { %3755 = vmatpush2.bf16.msra.mxu1 %v5380_v32  ;;  %3765 = vmatprep.subr.bf16.mxu0 %v5247_v38  ;;  %v5191_v32 = vcombine.high %v1944_v15, %v1948_v20  ;;  %v5319_v38 = vcombine.high %v2072_v21, %v2076_v19  ;;  %v2020_v15 = vld [vmem:[#allocation22 + $0x278] sm:$0xff] }
 0x45f   : > { %3806 = vmatprep.subr.bf16.mxu1 %v5375_v33  ;;  %v2064_v33 = vld [vmem:[#allocation22 + $0x3d8] sm:$0xff] }
 0x460   : > { %3716 = vmatmul.mubr.bf16.vlgmr.msra.gmra.mxu0 %v6989_v56  ;;  %v5310_v1 = vcombine.low %v2064_v33, %v2068_v34  ;;  %v2144_v20 = vld [vmem:[#allocation22 + $0x658] sm:$0xff] }
 0x461   : > { %3757 = vmatmul.mubr.bf16.vlgmr.msra.gmra.mxu1 %v6992_v57  ;;  %3766 = vmatpush1.bf16.msra.mxu0 %v5246_v35  ;;  %v2196_v35 = vld [vmem:[#allocation22 + $0x7f8] sm:$0xff] }
 0x462   : > { %3797 = vmatprep.mubr.bf16.mxu0 %v6985_v51  ;;  %3807 = vmatpush1.bf16.msra.mxu1 %v5374_v40  ;;  %v5351_v51 = vcombine.high %v2104_v47, %v2108_v48  ;;  %v5311_v40 = vcombine.high %v2064_v33, %v2068_v34  ;;  %v2180_v47 = vld [vmem:[#allocation22 + $0x778] sm:$0xff]  ;;  %v5302_v48 = vcombine.low %v2056_v42, %v2060_v2 }
 0x463   : > { %3838 = vmatprep.mubr.bf16.mxu1 %v6987_v55  ;;  %3767 = vmatprep.subr.bf16.mxu0 %v5239_v41  ;;  %v5222_v55 = vcombine.low %v1976_v45, %v1980_v46  ;;  %v5439_v41 = vcombine.high %v2192_v39, %v2196_v35  ;;  %v2052_v45 = vld [vmem:[#allocation22 + $0x378] sm:$0xff] }
 0x464   : > { %3808 = vmatprep.subr.bf16.mxu1 %v5367_v63  ;;  %v2184_v63 = vld [vmem:[#allocation22 + $0x798] sm:$0xff] }
 0x465   : > { %3768 = vmatpush1.bf16.msra.mxu0 %v5238_v5  ;;  %v5438_v5 = vcombine.low %v2192_v39, %v2196_v35  ;;  %v2176_v46 = vld [vmem:[#allocation22 + $0x758] sm:$0xff] }
 0x466   : > { %3809 = vmatpush1.bf16.msra.mxu1 %v5366_v43  ;;  %3769 = vmatprep.subr.bf16.mxu0 %v5231_v44  ;;  %v5303_v43 = vcombine.high %v2056_v42, %v2060_v2  ;;  %v5431_v44 = vcombine.high %v2184_v63, %v2188_v0  ;;  %v2148_v21 = vld [vmem:[#allocation22 + $0x678] sm:$0xff]  ;;  %v7016_v2 = vld [vmem:[%s7247_s24] sm:$0xff] }
 0x467   : > { %3810 = vmatprep.subr.bf16.mxu1 %v5359_v4  ;;  %v2048_v4 = vld [vmem:[#allocation22 + $0x358] sm:$0xff] }
 0x468   : > { %v5294_v59 = vcombine.low %v2048_v4, %v2052_v45  ;;  %v2012_v33 = vld [vmem:[#allocation22 + $0x238] sm:$0xff] }
 0x469   : > { %3770 = vmatpush1.bf16.msra.mxu0 %v5230_v49  ;;  %v5430_v49 = vcombine.low %v2184_v63, %v2188_v0  ;;  %v2136_v34 = vld [vmem:[#allocation22 + $0x618] sm:$0xff]  ;;  %v2202_v63 = vrot.slane %v7016_v2, %v6906_v9  ;;  %v2206_v0 = vrot.slane %v7016_v2, %v6909_v11 }
 0x46a   : > { %3811 = vmatpush1.bf16.msra.mxu1 %v5358_v50  ;;  %3771 = vmatprep.subr.bf16.mxu0 %v5223_v52  ;;  %v5295_v50 = vcombine.high %v2048_v4, %v2052_v45  ;;  %v5423_v52 = vcombine.high %v2176_v46, %v2180_v47  ;;  %v2140_v39 = vld [vmem:[#allocation22 + $0x638] sm:$0xff] }
 0x46b   : > { %3812 = vmatprep.subr.bf16.mxu1 %v5351_v51  ;;  %v2040_v51 = vld [vmem:[#allocation22 + $0x318] sm:$0xff]  ;;  %v5382_v42 = vcombine.low %v2136_v34, %v2140_v39 }
 0x46c   : > { %v5286_v10 = vcombine.low %v2040_v51, %v2044_v53 }
 0x46d   : > { %3772 = vmatpush1.bf16.msra.mxu0 %v5222_v55  ;;  %v5422_v55 = vcombine.low %v2176_v46, %v2180_v47 }
 0x46e   : > { %3813 = vmatpush1.bf16.msra.mxu1 %v5350_v60  ;;  %3773 = vmatprep.subr.bf16.mxu0 %v5215_v61  ;;  %v5287_v60 = vcombine.high %v2040_v51, %v2044_v53  ;;  %v5415_v61 = vcombine.high %v2168_v54, %v2172_v58 }
 0x46f   : > { %3814 = vmatprep.subr.bf16.mxu1 %v5343_v62  ;;  %v2032_v62 = vld [vmem:[#allocation22 + $0x2d8] sm:$0xff] }
 0x470   : > { %v5278_v24 = vcombine.low %v2032_v62, %v2036_v3 }
 0x471   : > { %3774 = vmatpush1.bf16.msra.mxu0 %v5214_v12  ;;  %v5414_v12 = vcombine.low %v2168_v54, %v2172_v58 }
 0x472   : > { %3815 = vmatpush1.bf16.msra.mxu1 %v5342_v13  ;;  %3775 = vmatprep.subr.bf16.mxu0 %v5207_v14  ;;  %v5279_v13 = vcombine.high %v2032_v62, %v2036_v3  ;;  %v5407_v14 = vcombine.high %v2160_v6, %v2164_v7 }
 0x473   : > { %3816 = vmatprep.subr.bf16.mxu1 %v5335_v16  ;;  %v2024_v16 = vld [vmem:[#allocation22 + $0x298] sm:$0xff] }
 0x474   : > { %v5270_v19 = vcombine.low %v2024_v16, %v2028_v17 }
 0x475   : > { %3776 = vmatpush1.bf16.msra.mxu0 %v5206_v25  ;;  %v5406_v25 = vcombine.low %v2160_v6, %v2164_v7 }
 0x476   : > { %3817 = vmatpush1.bf16.msra.mxu1 %v5334_v26  ;;  %3777 = vmatprep.subr.bf16.mxu0 %v5199_v27  ;;  %v5271_v26 = vcombine.high %v2024_v16, %v2028_v17  ;;  %v5399_v27 = vcombine.high %v2152_v22, %v2156_v23 }
 0x477   : > { %3818 = vmatprep.subr.bf16.mxu1 %v5327_v18  ;;  %v2016_v18 = vld [vmem:[#allocation22 + $0x258] sm:$0xff] }
 0x478   : > { %v5262_v35 = vcombine.low %v2016_v18, %v2020_v15 }
 0x479   : > { %3778 = vmatpush1.bf16.msra.mxu0 %v5198_v28  ;;  %v5398_v28 = vcombine.low %v2152_v22, %v2156_v23 }
 0x47a   : > { %3819 = vmatpush1.bf16.msra.mxu1 %v5326_v30  ;;  %3779 = vmatprep.subr.bf16.mxu0 %v5191_v32  ;;  %v5263_v30 = vcombine.high %v2016_v18, %v2020_v15  ;;  %v5391_v32 = vcombine.high %v2144_v20, %v2148_v21 }
 0x47b   : > { %3820 = vmatprep.subr.bf16.mxu1 %v5319_v38  ;;  %v2008_v38 = vld [vmem:[#allocation22 + $0x218] sm:$0xff] }
 0x47d   : > { %3780 = vmatpush1.bf16.msra.mxu0 %v5190_v36  ;;  %v5390_v36 = vcombine.low %v2144_v20, %v2148_v21 }
 0x47e   : > { %3821 = vmatpush1.bf16.msra.mxu1 %v5318_v37  ;;  %3781 = vmatprep.subr.bf16.mxu0 %v5311_v40  ;;  %v5255_v37 = vcombine.high %v2008_v38, %v2012_v33  ;;  %v5383_v40 = vcombine.high %v2136_v34, %v2140_v39  ;;  %v7027_v34 = vld [vmem:[%s7248_s7] sm:$0xff] }
 0x47f   : > { %3822 = vmatprep.subr.bf16.mxu1 %v5439_v41  ;;  %v5254_v41 = vcombine.low %v2008_v38, %v2012_v33  ;;  %v7032_v39 = vld [vmem:[%s7249_s30] sm:$0xff] }
 0x481   : > { %3782 = vmatpush2.bf16.msra.mxu0 %v5310_v1 }
 0x482   : > { %3823 = vmatpush2.bf16.msra.mxu1 %v5438_v5  ;;  %3783 = vmatprep.subr.bf16.mxu0 %v5303_v43 }
 0x483   : > { %3824 = vmatprep.subr.bf16.mxu1 %v5431_v44 }
 0x485   : > { %3784 = vmatpush2.bf16.msra.mxu0 %v5302_v48 }
 0x486   : > { %3825 = vmatpush2.bf16.msra.mxu1 %v5430_v49  ;;  %3785 = vmatprep.subr.bf16.mxu0 %v5295_v50 }
 0x487   : > { %3826 = vmatprep.subr.bf16.mxu1 %v5423_v52 }
 0x489   : > { %3786 = vmatpush2.bf16.msra.mxu0 %v5294_v59 }
 0x48a   : > { %3827 = vmatpush2.bf16.msra.mxu1 %v5422_v55  ;;  %3787 = vmatprep.subr.bf16.mxu0 %v5287_v60 }
 0x48b   : > { %3828 = vmatprep.subr.bf16.mxu1 %v5415_v61 }
 0x48d   : > { %3788 = vmatpush2.bf16.msra.mxu0 %v5286_v10 }
 0x48e   : > { %3829 = vmatpush2.bf16.msra.mxu1 %v5414_v12  ;;  %3789 = vmatprep.subr.bf16.mxu0 %v5279_v13 }
 0x48f   : > { %3830 = vmatprep.subr.bf16.mxu1 %v5407_v14 }
 0x491   : > { %3790 = vmatpush2.bf16.msra.mxu0 %v5278_v24 }
 0x492   : > { %3831 = vmatpush2.bf16.msra.mxu1 %v5406_v25  ;;  %3791 = vmatprep.subr.bf16.mxu0 %v5271_v26 }
 0x493   : > { %3832 = vmatprep.subr.bf16.mxu1 %v5399_v27 }
 0x495   : > { %3792 = vmatpush2.bf16.msra.mxu0 %v5270_v19 }
 0x496   : > { %3833 = vmatpush2.bf16.msra.mxu1 %v5398_v28  ;;  %3793 = vmatprep.subr.bf16.mxu0 %v5263_v30 }
 0x497   : > { %3834 = vmatprep.subr.bf16.mxu1 %v5391_v32 }
 0x499   : > { %3794 = vmatpush2.bf16.msra.mxu0 %v5262_v35 }
 0x49a   : > { %3835 = vmatpush2.bf16.msra.mxu1 %v5390_v36  ;;  %3795 = vmatprep.subr.bf16.mxu0 %v5255_v37  ;;  %v4021_v36 = vrot.slane %v7027_v34, %v6906_v9 }
 0x49b   : > { %3836 = vmatprep.subr.bf16.mxu1 %v5383_v40 }
 0x49d   : > { %3796 = vmatpush2.bf16.msra.mxu0 %v5254_v41  ;;  %v4070_v41 = vrot.slane %v7032_v39, %v6906_v9 }
 0x49e   : > { %3837 = vmatpush2.bf16.msra.mxu1 %v5382_v42 }
 0x4a0   : > { %3798 = vmatmul.mubr.bf16.vlgmr.msra.gmra.mxu0 %v6989_v56  ;;  %v3553_v1 = vpop.f32.mrf.mxu0 }
 0x4a1   : > { %3839 = vmatmul.mubr.bf16.vlgmr.msra.gmra.mxu1 %v6992_v57  ;;  %v3554_v5 = vadd.f32 %v3553_v1, %v2202_v63  ;;  %v3594_v43 = vpop.f32.mrf.mxu1  ;;  %v4025_v63 = vrot.slane %v7027_v34, %v6909_v11 }
 0x4a2   : > { %v3555_v44 = vpop.f32.mrf.mxu0 }
 0x4a3   : > { %v3595_v4 = vadd.f32 %v3594_v43, %v3554_v5  ;;  %v3556_v45 = vadd.f32 %v3555_v44, %v2206_v0  ;;  %v3596_v46 = vpop.f32.mrf.mxu1  ;;  %v4074_v43 = vrot.slane %v7032_v39, %v6909_v11 }
 0x4a4   : > { %v3557_v47 = vpop.f32.mrf.mxu0 }
 0x4a5   : > { %v3849_v48 = vrot.slane %v3595_v4, 4  ;;  %v3905_v49 = vmul.f32 %v3595_v4, %v3595_v4  ;;  %v3597_v50 = vadd.f32 %v3596_v46, %v3556_v45  ;;  %v3598_v52 = vpop.f32.mrf.mxu1 }
 0x4a6   : > { %v3558_v51 = vpop.f32.mrf.mxu0 }
 0x4a7   : > { %v3850_v53 = vadd.f32 %v3849_v48, %v3595_v4  ;;  %v3913_v54 = vrot.slane %v3905_v49, 4  ;;  %v3855_v58 = vrot.slane %v3597_v50, 4  ;;  %v3906_v59 = vmul.f32 %v3597_v50, %v3597_v50  ;;  %v3599_v56 = vpop.f32.mrf.mxu1 }
 0x4a9   : > { %v3851_v55 = vrot.slane %v3850_v53, 2  ;;  %v3914_v60 = vadd.f32 %v3913_v54, %v3905_v49  ;;  %v3856_v57 = vadd.f32 %v3855_v58, %v3597_v50  ;;  %v3919_v61 = vrot.slane %v3906_v59, 4 }
 0x4aa   : > { %v2210_v49 = vrot.slane %v7016_v2, %v6940_v29 }
 0x4ab   : > { %v3852_v62 = vadd.f32 %v3851_v55, %v3850_v53  ;;  %v3915_v3 = vrot.slane %v3914_v60, 2  ;;  %v3857_v6 = vrot.slane %v3856_v57, 2  ;;  %v3920_v7 = vadd.f32 %v3919_v61, %v3906_v59 }
 0x4ad   : > { %v3853_v10 = vrot.slane %v3852_v62, 1  ;;  %v3916_v12 = vadd.f32 %v3915_v3, %v3914_v60  ;;  %v3858_v13 = vadd.f32 %v3857_v6, %v3856_v57  ;;  %v3921_v14 = vrot.slane %v3920_v7, 2 }
 0x4af   : > { %v3854_v16 = vadd.f32 %v3853_v10, %v3852_v62  ;;  %v3917_v17 = vrot.slane %v3916_v12, 1  ;;  %v3859_v22 = vrot.slane %v3858_v13, 1  ;;  %v3922_v23 = vadd.f32 %v3921_v14, %v3920_v7 }
 0x4b1   : > { %v3897_v24 = vmul.f32 0.125, %v3854_v16  ;;  %v3918_v25 = vadd.f32 %v3917_v17, %v3916_v12  ;;  %v3860_v26 = vadd.f32 %v3859_v22, %v3858_v13  ;;  %v3923_v27 = vrot.slane %v3922_v23, 1 }
 0x4b3   : > { %v3961_v18 = vmul.f32 0.125, %v3918_v25  ;;  %v3969_v15 = vmul.f32 %v3897_v24, %v3897_v24  ;;  %v3898_v20 = vmul.f32 0.125, %v3860_v26  ;;  %v3924_v21 = vadd.f32 %v3923_v27, %v3922_v23 }
 0x4b4   : > { %v3985_v35 = vsub.f32 %v3595_v4, %v3897_v24 }
 0x4b5   : > { %v3977_v19 = vsub.f32 %v3961_v18, %v3969_v15  ;;  %v3970_v28 = vmul.f32 %v3898_v20, %v3898_v20  ;;  %v3962_v30 = vmul.f32 0.125, %v3924_v21  ;;  %v3986_v42 = vsub.f32 %v3597_v50, %v3898_v20 }
 0x4b6   : > { %v2214_v50 = vrot.slane %v7016_v2, %v6943_v31 }
 0x4b7   : > { %v3993_v32 = vadd.f32 0.8, %v3977_v19  ;;  %v3978_v38 = vsub.f32 %v3962_v30, %v3970_v28 }
 0x4b9   : > { %5948 = vrsqrt.f32 %v3993_v32  ;;  %v3994_v33 = vadd.f32 0.8, %v3978_v38 }
 0x4bb   : > { %5950 = vrsqrt.f32 %v3994_v33 }
 0x4c6   : > { %v5949_v37 = vpop.eup %5948 }
 0x4c7   : > { %v4009_v40 = vmul.f32 %v5949_v37, %v3985_v35 }
 0x4c8   : > { %v5951_v0 = vpop.eup %5950 }
 0x4c9   : > { %v4058_v1 = vmul.f32 %v4021_v36, %v4009_v40  ;;  %v4010_v5 = vmul.f32 %v5951_v0, %v3986_v42 }
 0x4cb   : > { %v4107_v44 = vadd.f32 %v4070_v41, %v4058_v1  ;;  %v4059_v4 = vmul.f32 %v4025_v63, %v4010_v5 }
 0x4cd   : > { %vm4115_vm11 = vcmp.gt.f32.partialorder %v4107_v44, 0.0  ;;  %v4123_v45 = vmul.f32 0.2, %v4107_v44  ;;  %v4108_v46 = vadd.f32 %v4074_v43, %v4059_v4 }
 0x4cf   : > { %v4131_v47 = vsel %vm4115_vm11, %v4107_v44, %v4123_v45  ;;  %vm4116_vm12 = vcmp.gt.f32.partialorder %v4108_v46, 0.0  ;;  %v4124_v48 = vmul.f32 0.2, %v4108_v46  ;;  %v4029_v44 = vrot.slane %v7027_v34, %v6940_v29 }
 0x4d0   : > { %4139 = vst [vmem:[#allocation2 + $0x30] sm:$0xff] %v4131_v47 }
 0x4d1   : > { %v4132_v9 = vsel %vm4116_vm12, %v4108_v46, %v4124_v48  ;;  %v4078_v46 = vrot.slane %v7032_v39, %v6940_v29  ;;  %v4033_v48 = vrot.slane %v7027_v34, %v6943_v31 }
 0x4d2   : > { %4140 = vst [vmem:[#allocation2] sm:$0xff] %v4132_v9 }
 0x4e0   : > { %v3635_v52 = vpop.f32.mrf.mxu0 }
 0x4e1   : > { %v3636_v51 = vadd.f32 %v3635_v52, %v2210_v49  ;;  %v3676_v11 = vpop.f32.mrf.mxu1  ;;  %v4082_v52 = vrot.slane %v7032_v39, %v6943_v31 }
 0x4e2   : > { %v3637_v53 = vpop.f32.mrf.mxu0 }
 0x4e3   : > { %v3677_v54 = vadd.f32 %v3676_v11, %v3636_v51  ;;  %v3638_v58 = vadd.f32 %v3637_v53, %v2214_v50  ;;  %v3678_v59 = vpop.f32.mrf.mxu1 }
 0x4e4   : > { %v3639_v56 = vpop.f32.mrf.mxu0 }
 0x4e5   : > { %v3861_v55 = vrot.slane %v3677_v54, 4  ;;  %v3907_v60 = vmul.f32 %v3677_v54, %v3677_v54  ;;  %v3679_v57 = vadd.f32 %v3678_v59, %v3638_v58  ;;  %v3680_v61 = vpop.f32.mrf.mxu1  ;;  %v7055_v56 = vsub.s32 4, %v6903_v8 }
 0x4e6   : > { %v3640_v62 = vpop.f32.mrf.mxu0 }
 0x4e7   : > { %v3862_v3 = vadd.f32 %v3861_v55, %v3677_v54  ;;  %v3925_v6 = vrot.slane %v3907_v60, 4  ;;  %v3867_v7 = vrot.slane %v3679_v57, 4  ;;  %v3908_v10 = vmul.f32 %v3679_v57, %v3679_v57  ;;  %v3681_v12 = vpop.f32.mrf.mxu1 }
 0x4e8   : > { %v7058_v55 = vsub.s32 5, %v6903_v8  ;;  %v2218_v31 = vrot.slane %v7016_v2, %v7055_v56 }
 0x4e9   : > { %v3863_v13 = vrot.slane %v3862_v3, 2  ;;  %v3926_v14 = vadd.f32 %v3925_v6, %v3907_v60  ;;  %v3868_v16 = vadd.f32 %v3867_v7, %v3679_v57  ;;  %v3931_v17 = vrot.slane %v3908_v10, 4 }
 0x4ea   : > { %v2222_v60 = vrot.slane %v7016_v2, %v7058_v55 }
 0x4eb   : > { %v3864_v22 = vadd.f32 %v3863_v13, %v3862_v3  ;;  %v3927_v23 = vrot.slane %v3926_v14, 2  ;;  %v3869_v24 = vrot.slane %v3868_v16, 2  ;;  %v3932_v25 = vadd.f32 %v3931_v17, %v3908_v10 }
 0x4ed   : > { %v3865_v26 = vrot.slane %v3864_v22, 1  ;;  %v3928_v27 = vadd.f32 %v3927_v23, %v3926_v14  ;;  %v3870_v18 = vadd.f32 %v3869_v24, %v3868_v16  ;;  %v3933_v15 = vrot.slane %v3932_v25, 2 }
 0x4ef   : > { %v3866_v20 = vadd.f32 %v3865_v26, %v3864_v22  ;;  %v3929_v21 = vrot.slane %v3928_v27, 1  ;;  %v3871_v19 = vrot.slane %v3870_v18, 1  ;;  %v3934_v28 = vadd.f32 %v3933_v15, %v3932_v25 }
 0x4f1   : > { %v3899_v30 = vmul.f32 0.125, %v3866_v20  ;;  %v3930_v32 = vadd.f32 %v3929_v21, %v3928_v27  ;;  %v3872_v38 = vadd.f32 %v3871_v19, %v3870_v18  ;;  %v3935_v33 = vrot.slane %v3934_v28, 1 }
 0x4f3   : > { %v3963_v35 = vmul.f32 0.125, %v3930_v32  ;;  %v3971_v36 = vmul.f32 %v3899_v30, %v3899_v30  ;;  %v3900_v37 = vmul.f32 0.125, %v3872_v38  ;;  %v3936_v40 = vadd.f32 %v3935_v33, %v3934_v28 }
 0x4f4   : > { %v3987_v43 = vsub.f32 %v3677_v54, %v3899_v30 }
 0x4f5   : > { %v3979_v41 = vsub.f32 %v3963_v35, %v3971_v36  ;;  %v3972_v42 = vmul.f32 %v3900_v37, %v3900_v37  ;;  %v3964_v63 = vmul.f32 0.125, %v3936_v40  ;;  %v3988_v47 = vsub.f32 %v3679_v57, %v3900_v37 }
 0x4f7   : > { %v3995_v0 = vadd.f32 0.8, %v3979_v41  ;;  %v3980_v1 = vsub.f32 %v3964_v63, %v3972_v42 }
 0x4f9   : > { %5952 = vrsqrt.f32 %v3995_v0  ;;  %v3996_v5 = vadd.f32 0.8, %v3980_v1 }
 0x4fb   : > { %5954 = vrsqrt.f32 %v3996_v5 }
 0x506   : > { %v5953_v4 = vpop.eup %5952 }
 0x507   : > { %v4011_v45 = vmul.f32 %v5953_v4, %v3987_v43 }
 0x508   : > { %v5955_v9 = vpop.eup %5954 }
 0x509   : > { %v4060_v49 = vmul.f32 %v4029_v44, %v4011_v45  ;;  %v4012_v50 = vmul.f32 %v5955_v9, %v3988_v47 }
 0x50b   : > { %v4109_v51 = vadd.f32 %v4078_v46, %v4060_v49  ;;  %v4061_v11 = vmul.f32 %v4033_v48, %v4012_v50 }
 0x50d   : > { %vm4117_vm13 = vcmp.gt.f32.partialorder %v4109_v51, 0.0  ;;  %v4125_v53 = vmul.f32 0.2, %v4109_v51  ;;  %v4110_v54 = vadd.f32 %v4082_v52, %v4061_v11  ;;  %v4037_v52 = vrot.slane %v7027_v34, %v7055_v56 }
 0x50f   : > { %v4133_v58 = vsel %vm4117_vm13, %v4109_v51, %v4125_v53  ;;  %vm4118_vm14 = vcmp.gt.f32.partialorder %v4110_v54, 0.0  ;;  %v4126_v59 = vmul.f32 0.2, %v4110_v54  ;;  %v4086_v53 = vrot.slane %v7032_v39, %v7055_v56 }
 0x510   : > { %4141 = vst [vmem:[#allocation2 + $0x18] sm:$0xff] %v4133_v58  ;;  %v4041_v58 = vrot.slane %v7027_v34, %v7058_v55 }
 0x511   : > { %v4134_v29 = vsel %vm4118_vm14, %v4110_v54, %v4126_v59 }
 0x512   : > { %4142 = vst [vmem:[#allocation2 + $0x10] sm:$0xff] %v4134_v29 }
 0x520   : > { %v3717_v57 = vpop.f32.mrf.mxu0 }
 0x521   : > { %v3718_v61 = vadd.f32 %v3717_v57, %v2218_v31  ;;  %v3758_v62 = vpop.f32.mrf.mxu1 }
 0x522   : > { %v3719_v3 = vpop.f32.mrf.mxu0 }
 0x523   : > { %v3759_v6 = vadd.f32 %v3758_v62, %v3718_v61  ;;  %v3720_v7 = vadd.f32 %v3719_v3, %v2222_v60  ;;  %v3760_v10 = vpop.f32.mrf.mxu1  ;;  %v4090_v60 = vrot.slane %v7032_v39, %v7058_v55 }
 0x524   : > { %v3721_v12 = vpop.f32.mrf.mxu0 }
 0x525   : > { %v3873_v13 = vrot.slane %v3759_v6, 4  ;;  %v3909_v14 = vmul.f32 %v3759_v6, %v3759_v6  ;;  %v3761_v16 = vadd.f32 %v3760_v10, %v3720_v7  ;;  %v3762_v17 = vpop.f32.mrf.mxu1  ;;  %v7073_v12 = vsub.s32 6, %v6903_v8 }
 0x526   : > { %v3722_v22 = vpop.f32.mrf.mxu0 }
 0x527   : > { %v3874_v23 = vadd.f32 %v3873_v13, %v3759_v6  ;;  %v3937_v24 = vrot.slane %v3909_v14, 4  ;;  %v3879_v25 = vrot.slane %v3761_v16, 4  ;;  %v3910_v26 = vmul.f32 %v3761_v16, %v3761_v16  ;;  %v3763_v27 = vpop.f32.mrf.mxu1 }
 0x528   : > { %v7076_v13 = vsub.s32 7, %v6903_v8  ;;  %v2226_v55 = vrot.slane %v7016_v2, %v7073_v12 }
 0x529   : > { %v3875_v18 = vrot.slane %v3874_v23, 2  ;;  %v3938_v15 = vadd.f32 %v3937_v24, %v3909_v14  ;;  %v3880_v20 = vadd.f32 %v3879_v25, %v3761_v16  ;;  %v3943_v21 = vrot.slane %v3910_v26, 4 }
 0x52a   : > { %v2230_v14 = vrot.slane %v7016_v2, %v7076_v13 }
 0x52b   : > { %v3876_v19 = vadd.f32 %v3875_v18, %v3874_v23  ;;  %v3939_v28 = vrot.slane %v3938_v15, 2  ;;  %v3881_v30 = vrot.slane %v3880_v20, 2  ;;  %v3944_v32 = vadd.f32 %v3943_v21, %v3910_v26 }
 0x52d   : > { %v3877_v38 = vrot.slane %v3876_v19, 1  ;;  %v3940_v33 = vadd.f32 %v3939_v28, %v3938_v15  ;;  %v3882_v35 = vadd.f32 %v3881_v30, %v3880_v20  ;;  %v3945_v36 = vrot.slane %v3944_v32, 2 }
 0x52f   : > { %v3878_v37 = vadd.f32 %v3877_v38, %v3876_v19  ;;  %v3941_v40 = vrot.slane %v3940_v33, 1  ;;  %v3883_v41 = vrot.slane %v3882_v35, 1  ;;  %v3946_v42 = vadd.f32 %v3945_v36, %v3944_v32 }
 0x531   : > { %v3901_v63 = vmul.f32 0.125, %v3878_v37  ;;  %v3942_v0 = vadd.f32 %v3941_v40, %v3940_v33  ;;  %v3884_v1 = vadd.f32 %v3883_v41, %v3882_v35  ;;  %v3947_v5 = vrot.slane %v3946_v42, 1 }
 0x533   : > { %v3965_v43 = vmul.f32 0.125, %v3942_v0  ;;  %v3973_v44 = vmul.f32 %v3901_v63, %v3901_v63  ;;  %v3902_v4 = vmul.f32 0.125, %v3884_v1  ;;  %v3948_v45 = vadd.f32 %v3947_v5, %v3946_v42 }
 0x534   : > { %v3989_v51 = vsub.f32 %v3759_v6, %v3901_v63 }
 0x535   : > { %v3981_v46 = vsub.f32 %v3965_v43, %v3973_v44  ;;  %v3974_v47 = vmul.f32 %v3902_v4, %v3902_v4  ;;  %v3966_v48 = vmul.f32 0.125, %v3948_v45  ;;  %v3990_v59 = vsub.f32 %v3761_v16, %v3902_v4 }
 0x537   : > { %v3997_v9 = vadd.f32 0.8, %v3981_v46  ;;  %v3982_v49 = vsub.f32 %v3966_v48, %v3974_v47 }
 0x539   : > { %5956 = vrsqrt.f32 %v3997_v9  ;;  %v3998_v50 = vadd.f32 0.8, %v3982_v49 }
 0x53b   : > { %5958 = vrsqrt.f32 %v3998_v50 }
 0x546   : > { %v5957_v11 = vpop.eup %5956 }
 0x547   : > { %v4013_v54 = vmul.f32 %v5957_v11, %v3989_v51 }
 0x548   : > { %v5959_v29 = vpop.eup %5958 }
 0x549   : > { %v4062_v31 = vmul.f32 %v4037_v52, %v4013_v54  ;;  %v4014_v57 = vmul.f32 %v5959_v29, %v3990_v59 }
 0x54b   : > { %v4111_v61 = vadd.f32 %v4086_v53, %v4062_v31  ;;  %v4063_v62 = vmul.f32 %v4041_v58, %v4014_v57  ;;  %v4045_v31 = vrot.slane %v7027_v34, %v7073_v12 }
 0x54d   : > { %vm4119_vm15 = vcmp.gt.f32.partialorder %v4111_v61, 0.0  ;;  %v4127_v3 = vmul.f32 0.2, %v4111_v61  ;;  %v4112_v6 = vadd.f32 %v4090_v60, %v4063_v62 }
 0x54f   : > { %v4135_v7 = vsel %vm4119_vm15, %v4111_v61, %v4127_v3  ;;  %vm4120_vm0 = vcmp.gt.f32.partialorder %v4112_v6, 0.0  ;;  %v4128_v56 = vmul.f32 0.2, %v4112_v6  ;;  %v4094_v61 = vrot.slane %v7032_v39, %v7073_v12 }
 0x550   : > { %4143 = vst [vmem:[#allocation2 + $0x8] sm:$0xff] %v4135_v7  ;;  %v4049_v3 = vrot.slane %v7027_v34, %v7076_v13 }
 0x551   : > { %v4136_v10 = vsel %vm4120_vm0, %v4112_v6, %v4128_v56 }
 0x552   : > { %4144 = vst [vmem:[#allocation2 + $0x20] sm:$0xff] %v4136_v10  ;;  %v4098_v10 = vrot.slane %v7032_v39, %v7076_v13 }
 0x560   : > { %v3799_v16 = vpop.f32.mrf.mxu0 }
 0x561   : > { %v3800_v17 = vadd.f32 %v3799_v16, %v2226_v55  ;;  %v3840_v22 = vpop.f32.mrf.mxu1 }
 0x562   : > { %v3801_v23 = vpop.f32.mrf.mxu0 }
 0x563   : > { %v3841_v24 = vadd.f32 %v3840_v22, %v3800_v17  ;;  %v3802_v25 = vadd.f32 %v3801_v23, %v2230_v14  ;;  %v3842_v26 = vpop.f32.mrf.mxu1 }
 0x564   : > { %v3803_v27 = vpop.f32.mrf.mxu0 }
 0x565   : > { %v3885_v18 = vrot.slane %v3841_v24, 4  ;;  %v3911_v15 = vmul.f32 %v3841_v24, %v3841_v24  ;;  %v3843_v20 = vadd.f32 %v3842_v26, %v3802_v25  ;;  %v3844_v21 = vpop.f32.mrf.mxu1 }
 0x566   : > { %v3804_v8 = vpop.f32.mrf.mxu0 }
 0x567   : > { %v3886_v19 = vadd.f32 %v3885_v18, %v3841_v24  ;;  %v3949_v28 = vrot.slane %v3911_v15, 4  ;;  %v3891_v30 = vrot.slane %v3843_v20, 4  ;;  %v3912_v32 = vmul.f32 %v3843_v20, %v3843_v20  ;;  %v3845_v38 = vpop.f32.mrf.mxu1 }
 0x569   : > { %v3887_v33 = vrot.slane %v3886_v19, 2  ;;  %v3950_v2 = vadd.f32 %v3949_v28, %v3911_v15  ;;  %v3892_v35 = vadd.f32 %v3891_v30, %v3843_v20  ;;  %v3955_v36 = vrot.slane %v3912_v32, 4 }
 0x56b   : > { %v3888_v37 = vadd.f32 %v3887_v33, %v3886_v19  ;;  %v3951_v40 = vrot.slane %v3950_v2, 2  ;;  %v3893_v41 = vrot.slane %v3892_v35, 2  ;;  %v3956_v42 = vadd.f32 %v3955_v36, %v3912_v32 }
 0x56d   : > { %v3889_v63 = vrot.slane %v3888_v37, 1  ;;  %v3952_v0 = vadd.f32 %v3951_v40, %v3950_v2  ;;  %v3894_v1 = vadd.f32 %v3893_v41, %v3892_v35  ;;  %v3957_v5 = vrot.slane %v3956_v42, 2 }
 0x56f   : > { %v3890_v43 = vadd.f32 %v3889_v63, %v3888_v37  ;;  %v3953_v44 = vrot.slane %v3952_v0, 1  ;;  %v3895_v4 = vrot.slane %v3894_v1, 1  ;;  %v3958_v45 = vadd.f32 %v3957_v5, %v3956_v42 }
 0x571   : > { %v3903_v46 = vmul.f32 0.125, %v3890_v43  ;;  %v3954_v47 = vadd.f32 %v3953_v44, %v3952_v0  ;;  %v3896_v48 = vadd.f32 %v3895_v4, %v3894_v1  ;;  %v3959_v9 = vrot.slane %v3958_v45, 1 }
 0x573   : > { %v3967_v49 = vmul.f32 0.125, %v3954_v47  ;;  %v3975_v50 = vmul.f32 %v3903_v46, %v3903_v46  ;;  %v3904_v52 = vmul.f32 0.125, %v3896_v48  ;;  %v3960_v51 = vadd.f32 %v3959_v9, %v3958_v45 }
 0x574   : > { %v3991_v60 = vsub.f32 %v3841_v24, %v3903_v46 }
 0x575   : > { %v3983_v11 = vsub.f32 %v3967_v49, %v3975_v50  ;;  %v3976_v53 = vmul.f32 %v3904_v52, %v3904_v52  ;;  %v3968_v54 = vmul.f32 0.125, %v3960_v51  ;;  %v3992_v6 = vsub.f32 %v3843_v20, %v3904_v52 }
 0x577   : > { %v3999_v58 = vadd.f32 0.8, %v3983_v11  ;;  %v3984_v59 = vsub.f32 %v3968_v54, %v3976_v53 }
 0x579   : > { %5960 = vrsqrt.f32 %v3999_v58  ;;  %v4000_v29 = vadd.f32 0.8, %v3984_v59 }
 0x57b   : > { %5962 = vrsqrt.f32 %v4000_v29 }
 0x586   : > { %v5961_v57 = vpop.eup %5960 }
 0x587   : > { %v4015_v62 = vmul.f32 %v5961_v57, %v3991_v60 }
 0x588   : > { %v5963_v7 = vpop.eup %5962 }
 0x589   : > { %v4064_v56 = vmul.f32 %v4045_v31, %v4015_v62  ;;  %v4016_v55 = vmul.f32 %v5963_v7, %v3992_v6 }
 0x58b   : > { %v4113_v14 = vadd.f32 %v4094_v61, %v4064_v56  ;;  %v4065_v16 = vmul.f32 %v4049_v3, %v4016_v55 }
 0x58d   : > { %vm4121_vm1 = vcmp.gt.f32.partialorder %v4113_v14, 0.0  ;;  %v4129_v17 = vmul.f32 0.2, %v4113_v14  ;;  %v4114_v22 = vadd.f32 %v4098_v10, %v4065_v16 }
 0x58f   : > { %v4137_v23 = vsel %vm4121_vm1, %v4113_v14, %v4129_v17  ;;  %vm4122_vm2 = vcmp.gt.f32.partialorder %v4114_v22, 0.0  ;;  %v4130_v12 = vmul.f32 0.2, %v4114_v22 }
 0x590   : > { %4145 = vst [vmem:[#allocation2 + $0x28] sm:$0xff] %v4137_v23 }
 0x591   : > { %v4138_v24 = vsel %vm4122_vm2, %v4114_v22, %v4130_v12 }
 0x592   : > { %4146 = vst [vmem:[#allocation2 + $0x38] sm:$0xff] %v4138_v24 }
 0x593 PF: > { %v5964_v34 = vld [vmem:[%s6854_s20 + $0x78] sm:$0xff]   ;;  %v5968_v26 = vld [vmem:[%s6854_s20 + $0x70] sm:$0xff]   ;;  %v5972_v20 = vld [vmem:[%s6854_s20 + $0x68] sm:$0xff]  }
 0x594   : > { %v5965_v39 = vld [vmem:[%s6854_s20 + $0xf8] sm:$0xff]   ;;  %5512 = vmatprep.subr.bf16.mxu0 %v5964_v34  ;;  %v5969_v27 = vld [vmem:[%s6854_s20 + $0xf0] sm:$0xff]   ;;  %v5973_v21 = vld [vmem:[%s6854_s20 + $0xe8] sm:$0xff]  }
 0x595   : > { %v5966_v13 = vld [vmem:[%s6854_s20 + $0x38] sm:$0xff]   ;;  %5534 = vmatprep.subr.bf16.mxu1 %v5965_v39  ;;  %v5970_v18 = vld [vmem:[%s6854_s20 + $0x30] sm:$0xff]   ;;  %v5974_v8 = vld [vmem:[%s6854_s20 + $0x28] sm:$0xff]  }
 0x596   : > { %v5967_v25 = vld [vmem:[%s6854_s20 + $0xb8] sm:$0xff]   ;;  %5513 = vmatpush3.bf16.msra.mxu0 %v5966_v13  ;;  %v5971_v15 = vld [vmem:[%s6854_s20 + $0xb0] sm:$0xff]   ;;  %v5975_v19 = vld [vmem:[%s6854_s20 + $0xa8] sm:$0xff]  }
 0x597   : > { %5535 = vmatpush3.bf16.msra.mxu1 %v5967_v25  ;;  %5514 = vmatprep.subr.bf16.mxu0 %v5968_v26  ;;  %v5976_v28 = vld [vmem:[%s6854_s20 + $0x60] sm:$0xff]   ;;  %v5980_v33 = vld [vmem:[%s6854_s20 + $0x58] sm:$0xff]   ;;  %v5984_v37 = vld [vmem:[%s6854_s20 + $0x50] sm:$0xff]  }
 0x598   : > { %5536 = vmatprep.subr.bf16.mxu1 %v5969_v27  ;;  %v5977_v30 = vld [vmem:[%s6854_s20 + $0xe0] sm:$0xff]   ;;  %v5981_v2 = vld [vmem:[%s6854_s20 + $0xd8] sm:$0xff]   ;;  %v5985_v40 = vld [vmem:[%s6854_s20 + $0xd0] sm:$0xff]  }
 0x599   : > { %v5978_v32 = vld [vmem:[%s6854_s20 + $0x20] sm:$0xff]   ;;  %v5982_v35 = vld [vmem:[%s6854_s20 + $0x18] sm:$0xff]   ;;  %v5986_v41 = vld [vmem:[%s6854_s20 + $0x10] sm:$0xff]  }
 0x59a   : > { %5515 = vmatpush3.bf16.msra.mxu0 %v5970_v18  ;;  %v5979_v38 = vld [vmem:[%s6854_s20 + $0xa0] sm:$0xff]   ;;  %v5983_v36 = vld [vmem:[%s6854_s20 + $0x98] sm:$0xff]   ;;  %v5987_v42 = vld [vmem:[%s6854_s20 + $0x90] sm:$0xff]  }
 0x59b   : > { %5537 = vmatpush3.bf16.msra.mxu1 %v5971_v15  ;;  %5516 = vmatprep.subr.bf16.mxu0 %v5972_v20  ;;  %v5988_v63 = vld [vmem:[%s6854_s20 + $0x48] sm:$0xff]   ;;  %v5992_v43 = vld [vmem:[%s6854_s20 + $0x40] sm:$0xff]   ;;  %v4150_v47 = vld [vmem:[#allocation2 + $0x10] sm:$0xff] }
 0x59c   : > { %5538 = vmatprep.subr.bf16.mxu1 %v5973_v21  ;;  %v5989_v0 = vld [vmem:[%s6854_s20 + $0xc8] sm:$0xff]   ;;  %v5993_v44 = vld [vmem:[%s6854_s20 + $0xc0] sm:$0xff]   ;;  %v4147_v48 = vld [vmem:[#allocation2 + $0x30] sm:$0xff]  ;;  %v4158_v49 = vpack.c.bf16 %v4150_v47, %v4150_v47 }
 0x59d   : > { %v5990_v1 = vld [vmem:[%s6854_s20 + $0x8] sm:$0xff]   ;;  %v5994_v4 = vld [vmem:[%s6854_s20] sm:$0xff]   ;;  %v4155_v50 = vpack.c.bf16 %v4147_v48, %v4147_v48  ;;  %v4149_v52 = vld [vmem:[#allocation2 + $0x18] sm:$0xff] }
 0x59e   : > { %5517 = vmatpush3.bf16.msra.mxu0 %v5974_v8  ;;  %v5991_v5 = vld [vmem:[%s6854_s20 + $0x88] sm:$0xff]   ;;  %v5995_v45 = vld [vmem:[%s6854_s20 + $0x80] sm:$0xff]   ;;  %v4157_v51 = vpack.c.bf16 %v4149_v52, %v4149_v52  ;;  %v5996_v11 = vld [vmem:[%s6854_s20 + $0x178] sm:$0xff]   ;;  %4754 = vmatprep.mubr.bf16.mxu1 %v4158_v49 }
 0x59f   : > { %5539 = vmatpush3.bf16.msra.mxu1 %v5975_v19  ;;  %5518 = vmatprep.subr.bf16.mxu0 %v5976_v28  ;;  %v4148_v46 = vld [vmem:[#allocation2] sm:$0xff]  ;;  %v5997_v53 = vld [vmem:[%s6854_s20 + $0x1f8] sm:$0xff]   ;;  %v6000_v59 = vld [vmem:[%s6854_s20 + $0x170] sm:$0xff]  }
 0x5a0   : > { %5540 = vmatprep.subr.bf16.mxu1 %v5977_v30  ;;  %v4156_v9 = vpack.c.bf16 %v4148_v46, %v4148_v46  ;;  %v5998_v54 = vld [vmem:[%s6854_s20 + $0x138] sm:$0xff]   ;;  %v6001_v29 = vld [vmem:[%s6854_s20 + $0x1f0] sm:$0xff]   ;;  %v6004_v57 = vld [vmem:[%s6854_s20 + $0x168] sm:$0xff]  }
 0x5a1   : > { %v5999_v58 = vld [vmem:[%s6854_s20 + $0x1b8] sm:$0xff]   ;;  %v6002_v31 = vld [vmem:[%s6854_s20 + $0x130] sm:$0xff]   ;;  %v6005_v61 = vld [vmem:[%s6854_s20 + $0x1e8] sm:$0xff]  }
 0x5a2   : > { %5519 = vmatpush3.bf16.msra.mxu0 %v5978_v32  ;;  %4714 = vmatprep.mubr.bf16.mxu0 %v4156_v9  ;;  %v6003_v60 = vld [vmem:[%s6854_s20 + $0x1b0] sm:$0xff]   ;;  %v6006_v62 = vld [vmem:[%s6854_s20 + $0x128] sm:$0xff]   ;;  %v6008_v6 = vld [vmem:[%s6854_s20 + $0x160] sm:$0xff]  }
 0x5a3   : > { %5541 = vmatpush3.bf16.msra.mxu1 %v5979_v38  ;;  %5520 = vmatprep.subr.bf16.mxu0 %v5980_v33  ;;  %v6007_v3 = vld [vmem:[%s6854_s20 + $0x1a8] sm:$0xff]   ;;  %v6009_v7 = vld [vmem:[%s6854_s20 + $0x1e0] sm:$0xff]   ;;  %v6012_v55 = vld [vmem:[%s6854_s20 + $0x158] sm:$0xff]  }
 0x5a4   : > { %5542 = vmatprep.subr.bf16.mxu1 %v5981_v2  ;;  %v6010_v56 = vld [vmem:[%s6854_s20 + $0x120] sm:$0xff]   ;;  %v6013_v14 = vld [vmem:[%s6854_s20 + $0x1d8] sm:$0xff]   ;;  %v6016_v22 = vld [vmem:[%s6854_s20 + $0x150] sm:$0xff]  }
 0x5a5   : > { %v6011_v10 = vld [vmem:[%s6854_s20 + $0x1a0] sm:$0xff]   ;;  %v6014_v16 = vld [vmem:[%s6854_s20 + $0x118] sm:$0xff]   ;;  %v6017_v23 = vld [vmem:[%s6854_s20 + $0x1d0] sm:$0xff]  }
 0x5a6   : > { %5521 = vmatpush3.bf16.msra.mxu0 %v5982_v35  ;;  %v6015_v17 = vld [vmem:[%s6854_s20 + $0x198] sm:$0xff]   ;;  %v6018_v12 = vld [vmem:[%s6854_s20 + $0x110] sm:$0xff]   ;;  %v6020_v34 = vld [vmem:[%s6854_s20 + $0x148] sm:$0xff]  }
 0x5a7   : > { %5543 = vmatpush3.bf16.msra.mxu1 %v5983_v36  ;;  %5522 = vmatprep.subr.bf16.mxu0 %v5984_v37  ;;  %v6019_v24 = vld [vmem:[%s6854_s20 + $0x190] sm:$0xff]   ;;  %v6021_v39 = vld [vmem:[%s6854_s20 + $0x1c8] sm:$0xff]   ;;  %v6024_v26 = vld [vmem:[%s6854_s20 + $0x140] sm:$0xff]  }
 0x5a8   : > { %5544 = vmatprep.subr.bf16.mxu1 %v5985_v40  ;;  %v6022_v13 = vld [vmem:[%s6854_s20 + $0x108] sm:$0xff]   ;;  %v6025_v27 = vld [vmem:[%s6854_s20 + $0x1c0] sm:$0xff]   ;;  %v4154_v21 = vld [vmem:[#allocation2 + $0x38] sm:$0xff] }
 0x5a9   : > { %v6023_v25 = vld [vmem:[%s6854_s20 + $0x188] sm:$0xff]   ;;  %v6026_v18 = vld [vmem:[%s6854_s20 + $0x100] sm:$0xff]   ;;  %v4162_v19 = vpack.c.bf16 %v4154_v21, %v4154_v21 }
 0x5aa   : > { %5523 = vmatpush3.bf16.msra.mxu0 %v5986_v41  ;;  %v6027_v15 = vld [vmem:[%s6854_s20 + $0x180] sm:$0xff]   ;;  %v4151_v28 = vld [vmem:[#allocation2 + $0x8] sm:$0xff] }
 0x5ab   : > { %5545 = vmatpush3.bf16.msra.mxu1 %v5987_v42  ;;  %5524 = vmatprep.subr.bf16.mxu0 %v5988_v63  ;;  %v4152_v20 = vld [vmem:[#allocation2 + $0x20] sm:$0xff]  ;;  %v4153_v30 = vld [vmem:[#allocation2 + $0x28] sm:$0xff]  ;;  %v4159_v32 = vpack.c.bf16 %v4151_v28, %v4151_v28 }
 0x5ac   : > { %5546 = vmatprep.subr.bf16.mxu1 %v5989_v0  ;;  %v4160_v8 = vpack.c.bf16 %v4152_v20, %v4152_v20  ;;  %v4161_v38 = vpack.c.bf16 %v4153_v30, %v4153_v30  ;;  %v5440_v0 = vld [vmem:[%s892_s16] ss:$0 sm:$0xff] }
 0x5ae   : > { %5525 = vmatpush3.bf16.msra.mxu0 %v5990_v1 }
 0x5af   : > { %5547 = vmatpush3.bf16.msra.mxu1 %v5991_v5  ;;  %5526 = vmatprep.subr.bf16.mxu0 %v5992_v43 }
 0x5b0   : > { %5548 = vmatprep.subr.bf16.mxu1 %v5993_v44 }
 0x5b2   : > { %5527 = vmatpush3.bf16.msra.mxu0 %v5994_v4 }
 0x5b3   : > { %5549 = vmatpush3.bf16.msra.mxu1 %v5995_v45  ;;  %5556 = vmatprep.subr.bf16.mxu0 %v5996_v11 }
 0x5b4   : > { %5578 = vmatprep.subr.bf16.mxu1 %v5997_v53 }
 0x5b5   : > { %4715 = vmatmul.mubr.bf16.vlgmr.msra.gmra.mxu0 %v4155_v50 }
 0x5b6   : > { %4755 = vmatmul.mubr.bf16.vlgmr.msra.gmra.mxu1 %v4157_v51  ;;  %5557 = vmatpush3.bf16.msra.mxu0 %v5998_v54 }
 0x5b7   : > { %5579 = vmatpush3.bf16.msra.mxu1 %v5999_v58  ;;  %5558 = vmatprep.subr.bf16.mxu0 %v6000_v59 }
 0x5b8   : > { %5580 = vmatprep.subr.bf16.mxu1 %v6001_v29  ;;  %4794 = vmatprep.mubr.bf16.mxu0 %v4160_v8 }
 0x5b9   : > { %4834 = vmatprep.mubr.bf16.mxu1 %v4162_v19 }
 0x5ba   : > { %5559 = vmatpush3.bf16.msra.mxu0 %v6002_v31 }
 0x5bb   : > { %5581 = vmatpush3.bf16.msra.mxu1 %v6003_v60  ;;  %5560 = vmatprep.subr.bf16.mxu0 %v6004_v57 }
 0x5bc   : > { %5582 = vmatprep.subr.bf16.mxu1 %v6005_v61 }
 0x5be   : > { %5561 = vmatpush3.bf16.msra.mxu0 %v6006_v62 }
 0x5bf   : > { %5583 = vmatpush3.bf16.msra.mxu1 %v6007_v3  ;;  %5562 = vmatprep.subr.bf16.mxu0 %v6008_v6 }
 0x5c0   : > { %5584 = vmatprep.subr.bf16.mxu1 %v6009_v7 }
 0x5c2   : > { %5563 = vmatpush3.bf16.msra.mxu0 %v6010_v56 }
 0x5c3   : > { %5585 = vmatpush3.bf16.msra.mxu1 %v6011_v10  ;;  %5564 = vmatprep.subr.bf16.mxu0 %v6012_v55 }
 0x5c4   : > { %5586 = vmatprep.subr.bf16.mxu1 %v6013_v14 }
 0x5c6   : > { %5565 = vmatpush3.bf16.msra.mxu0 %v6014_v16 }
 0x5c7   : > { %5587 = vmatpush3.bf16.msra.mxu1 %v6015_v17  ;;  %5566 = vmatprep.subr.bf16.mxu0 %v6016_v22 }
 0x5c8   : > { %5588 = vmatprep.subr.bf16.mxu1 %v6017_v23 }
 0x5ca   : > { %5567 = vmatpush3.bf16.msra.mxu0 %v6018_v12 }
 0x5cb   : > { %5589 = vmatpush3.bf16.msra.mxu1 %v6019_v24  ;;  %5568 = vmatprep.subr.bf16.mxu0 %v6020_v34 }
 0x5cc   : > { %5590 = vmatprep.subr.bf16.mxu1 %v6021_v39 }
 0x5ce   : > { %5569 = vmatpush3.bf16.msra.mxu0 %v6022_v13 }
 0x5cf   : > { %5591 = vmatpush3.bf16.msra.mxu1 %v6023_v25  ;;  %5570 = vmatprep.subr.bf16.mxu0 %v6024_v26 }
 0x5d0   : > { %5592 = vmatprep.subr.bf16.mxu1 %v6025_v27 }
 0x5d2   : > { %5571 = vmatpush3.bf16.msra.mxu0 %v6026_v18 }
 0x5d3   : > { %5593 = vmatpush3.bf16.msra.mxu1 %v6027_v15 }
 0x5d5   : > { %4795 = vmatmul.mubr.bf16.vlgmr.msra.gmra.mxu0 %v4159_v32 }
 0x5d6   : > { %4835 = vmatmul.mubr.bf16.vlgmr.msra.gmra.mxu1 %v4161_v38 }
 0x675   : > { %v5528_v33 = vpop.f32.mrf.mxu0 }
 0x676   : > { %v5550_v2 = vpop.f32.mrf.mxu1 }
 0x677   : > { %v5529_v35 = vpop.f32.mrf.mxu0 }
 0x678   : > { %v5551_v36 = vpop.f32.mrf.mxu1  ;;  %v5530_v63 = vadd.f32 %v5529_v35, %v5528_v33 }
 0x679   : > { %v5531_v37 = vpop.f32.mrf.mxu0  ;;  %v5552_v5 = vadd.f32 %v5551_v36, %v5550_v2 }
 0x67a   : > { %v5553_v40 = vpop.f32.mrf.mxu1  ;;  %v4717_v1 = vadd.f32 %v5530_v63, %v5440_v0 }
 0x67b   : > { %v5532_v41 = vpop.f32.mrf.mxu0 }
 0x67c   : > { %v5554_v42 = vpop.f32.mrf.mxu1  ;;  %v4757_v45 = vadd.f32 %v5552_v5, %v4717_v1 }
 0x695   : > { %v5572_v43 = vpop.f32.mrf.mxu0 }
 0x696   : > { %v5594_v44 = vpop.f32.mrf.mxu1 }
 0x697   : > { %v5573_v4 = vpop.f32.mrf.mxu0 }
 0x698   : > { %v5574_v46 = vadd.f32 %v5573_v4, %v5572_v43  ;;  %v5595_v47 = vpop.f32.mrf.mxu1 }
 0x699   : > { %v5575_v48 = vpop.f32.mrf.mxu0  ;;  %v5596_v49 = vadd.f32 %v5595_v47, %v5594_v44 }
 0x69a   : > { %v4797_v9 = vadd.f32 %v5574_v46, %v4757_v45  ;;  %v5597_v50 = vpop.f32.mrf.mxu1 }
 0x69b   : > { %v5576_v52 = vpop.f32.mrf.mxu0 }
 0x69c   : > { %v4837_v51 = vadd.f32 %v5596_v49, %v4797_v9  ;;  %v5598_v11 = vpop.f32.mrf.mxu1 }
 0x69e   : > { %6028 = vtanh.f32 %v4837_v51 }
 0x6ab   : > { %v6029_v53 = vpop.eup %6028 }
 0x6ac   : > { %4843 = vst [vmem:[%s6872_s1] sm:$0xff] %v6029_v53 }
 0x6ad PF: > { %s41_s28 = sadd.s32 1, %s6474_s28   ;;  %s7251_s2 = smov %s6458_s25 }
 0x6ae   : > { %p38_p13 = scmp.ge.s32.totalorder %s41_s28, 4   ;;  %s7252_s25 = smov %s6462_s26 }
 0x6af   : > { %s7253_s26 = smov %s6805_s4  ;;  %s7254_s27 = smov %s6470_s3 }
 0x6b0   : > { %s7255_s3 = smov %s7257_s21  ;;  %40 = sbr.rel (!%p38_p13) target bundleno = 27 (0x1b), region = 204 }
 0x6b5   :  { %4869 = vsyncpa [#allocation4], 1 }
 0x6b6   :  { %4871 = vsyncpa [#allocation4 + $0x1], 1 }
 0x6b7   :  { %4872 = vsyncpa [#allocation6], 1 }
 0x6b8   :  { %4873 = vsyncpa [#allocation9], 1 }
 0x6b9   :  { %4874 = vsyncpa [#allocation12], 1 }
 0x6ba   :  { %4875 = vsyncpa [#allocation15], 1 }
 0x6bb   :  { %4876 = vsyncpa [#allocation18], 1 }
 0x6bc   :  { %4877 = vsyncpa [#allocation21], 1 }
 0x6bd   :  { %4878 = vsyncpa [#allocation24], 1 }
 0x6be   :  { %4880 = vsyncpa [#allocation24 + $0x1], 1 }

</bundles_post_ra>
